<compile_context>
chip_gen: v7x
topology: tpu7x:2x2x1
jax: 0.10.0
libtpu: 0.0.40
codegen_flags: <defaults>
</compile_context>

<pallas_src>
import jax
import jax.numpy as jnp
from jax.experimental import pallas as pl
from jax.experimental.pallas import tpu as pltpu

N_BATCH = 2
H = W = 28          # MNIST-like spatial size implied by fc1 = Linear(3*7*7, 10)
C_OUT = 3
K = 3
POOL = 4
HP = H // POOL      # 7
FEAT = HP * HP      # 49
N_FEAT = C_OUT * FEAT   # 147
N_CLASSES = 10


def net_kernel(xp_ref,     # VMEM (nb, 30, 30) f32   zero-padded input (1 channel, squeezed)
               mask_ref,   # VMEM (3, nb, 28, 28) f32  dropout scale mask (0.0 or 2.0)
               cw_ref,     # SMEM (27,) f32  conv weight, index co*9 + kh*3 + kw
               cb_ref,     # SMEM (3,)  f32  conv bias
               w_ref,      # VMEM (147, 10) f32  fc weight, rows = c*49 + h*7 + w
               b_ref,      # VMEM (1, 10) f32    fc bias
               o_ref):     # VMEM (nb, 10) f32   softmax probabilities
    nb = xp_ref.shape[0]

    # Hoist the 9 shifted tap views out of the channel loop (loaded once, reused x3).
    taps = [xp_ref[:, kh:kh + H, kw:kw + W]          # each (nb, 28, 28)
            for kh in range(K) for kw in range(K)]

    feats = []
    for co in range(C_OUT):
        # --- 3x3 'same' conv (single input channel): tap-by-tap scalar FMA ---
        acc = jnp.zeros((nb, H, W), dtype=jnp.float32)
        for t in range(K * K):
            acc = acc + cw_ref[co * K * K + t] * taps[t]
        acc = acc + cb_ref[co]

        # --- ReLU + Dropout p=0.5 (pre-scaled keep mask: 0.0 / 2.0) ---
        acc = jnp.maximum(acc, 0.0) * mask_ref[co]

        # --- MaxPool 4x4 stride 4 via reshape-max (no per-element stores) ---
        hmax = jnp.max(acc.reshape(nb, HP, POOL, W), axis=2)        # (nb, 7, 28)
        pooled = jnp.max(hmax.reshape(nb, HP, HP, POOL), axis=3)    # (nb, 7, 7)
        feats.append(pooled.reshape(nb, FEAT))                      # (nb, 49)

    # --- flatten (channel-major, matches torch.flatten of NCHW) + single FC matmul ---
    feat = jnp.concatenate(feats, axis=-1)                          # (nb, 147)
    logits = jnp.dot(feat, w_ref[...], preferred_element_type=jnp.float32)
    logits = logits + b_ref[...]

    # --- stable softmax over last dim ---
    m = jnp.max(logits, axis=-1, keepdims=True)
    e = jnp.exp(logits - m)
    o_ref[...] = e / jnp.sum(e, axis=-1, keepdims=True)


def net_forward(x, params, seed):
    """x: (N, 1, 28, 28) NCHW float32, identical convention to the torch module."""
    n = x.shape[0]
    xp = jnp.pad(x[:, 0, :, :], ((0, 0), (1, 1), (1, 1)))            # (N, 30, 30)

    # Dropout p=0.5 in train mode: Bernoulli(keep=0.5) mask pre-scaled by 1/(1-p)=2.
    # TODO(synk): RNG stream differs from torch.Generator; the Bernoulli(0.5)
    # mask + 2x rescale semantics are preserved, values are not bitwise equal.
    keep = jax.random.bernoulli(jax.random.PRNGKey(seed), 0.5, (C_OUT, n, H, W))
    mask = keep.astype(jnp.float32) * 2.0

    cw = params["conv_w"].reshape(-1).astype(jnp.float32)            # (27,)
    cb = params["conv_b"].astype(jnp.float32)                        # (3,)
    # torch.flatten order: feature f = c*49 + h*7 + w ; fc weight is (10, 147)
    wr = params["fc_w"].astype(jnp.float32).T                        # (147, 10)
    fcb = params["fc_b"].reshape(1, N_CLASSES).astype(jnp.float32)   # (1, 10)

    nb = n   # one batch block today; leading axis stays 'parallel' for megacore
    grid_spec = pltpu.PrefetchScalarGridSpec(
        num_scalar_prefetch=0,
        grid=(n // nb,),
        in_specs=[
            pl.BlockSpec((nb, H + 2, W + 2), lambda i: (i, 0, 0)),   # padded x
            pl.BlockSpec((C_OUT, nb, H, W), lambda i: (0, i, 0, 0)), # dropout mask
            pl.BlockSpec(memory_space=pltpu.MemorySpace.SMEM),       # conv w
            pl.BlockSpec(memory_space=pltpu.MemorySpace.SMEM),       # conv b
            pl.BlockSpec((N_FEAT, N_CLASSES), lambda i: (0, 0)),     # fc w
            pl.BlockSpec((1, N_CLASSES), lambda i: (0, 0)),          # fc b
        ],
        out_specs=pl.BlockSpec((nb, N_CLASSES), lambda i: (i, 0)),
    )

    return pl.pallas_call(
        net_kernel,
        out_shape=jax.ShapeDtypeStruct((n, N_CLASSES), jnp.float32),
        grid_spec=grid_spec,
        compiler_params=pltpu.CompilerParams(
            dimension_semantics=("parallel",)),
    )(xp, mask, cw, cb, wr, fcb)


if __name__ == "__main__":
    key = jax.random.PRNGKey(0)
    k1, k2, k3, k4, kx = jax.random.split(key, 5)
    params = {
        "conv_w": jax.random.normal(k1, (C_OUT, 1, K, K), jnp.float32) * 0.2,
        "conv_b": jax.random.normal(k2, (C_OUT,), jnp.float32) * 0.1,
        "fc_w": jax.random.normal(k3, (N_CLASSES, C_OUT * FEAT), jnp.float32) * 0.1,
        "fc_b": jax.random.normal(k4, (N_CLASSES,), jnp.float32) * 0.1,
    }
    x = jax.random.normal(kx, (N_BATCH, 1, H, W), jnp.float32)

    out = net_forward(x, params, seed=1234)
    out = jax.block_until_ready(out)

    assert out.shape == (N_BATCH, N_CLASSES)
    assert bool(jnp.all(jnp.isfinite(out)))
    assert bool(jnp.allclose(jnp.sum(out, axis=-1), 1.0, atol=1e-5))
    print("KERNEL_OK")
</pallas_src>

<mosaic_0001>
module attributes {stable_mosaic.version = 11 : i64} {
  func.func @net_kernel(%arg0: i32, %arg1: memref<2x30x30xf32, #tpu.memory_space<vmem>>, %arg2: memref<3x2x28x28xf32, #tpu.memory_space<vmem>>, %arg3: memref<27xf32, #tpu.memory_space<smem>>, %arg4: memref<3xf32, #tpu.memory_space<smem>>, %arg5: memref<147x10xf32, #tpu.memory_space<vmem>>, %arg6: memref<1x10xf32, #tpu.memory_space<vmem>>, %arg7: memref<2x10xf32, #tpu.memory_space<vmem>>) attributes {dimension_semantics = [#tpu.dimension_semantics<parallel>], iteration_bounds = array<i64: 1>, scalar_prefetch = 0 : i64, scratch_operands = 0 : i64, tpu.core_type = #tpu.core_type<tc>, window_params = [{transform_indices = @transform_0, window_bounds = array<i64: 2, 30, 30>}, {transform_indices = @transform_1, window_bounds = array<i64: 3, 2, 28, 28>}, {transform_indices = @transform_2, window_bounds = array<i64: 27>}, {transform_indices = @transform_3, window_bounds = array<i64: 3>}, {pipeline_mode = #tpu.pipeline_mode<synchronous>, transform_indices = @transform_4, window_bounds = array<i64: 147, 10>}, {pipeline_mode = #tpu.pipeline_mode<synchronous>, transform_indices = @transform_5, window_bounds = array<i64: 1, 10>}, {transform_indices = @transform_6, window_bounds = array<i64: 2, 10>}]} {
    %c0 = arith.constant 0 : index
    %c0_0 = arith.constant 0 : index
    %c0_1 = arith.constant 0 : index
    %0 = vector.load %arg1[%c0, %c0_0, %c0_1] : memref<2x30x30xf32, #tpu.memory_space<vmem>>, vector<2x28x28xf32>
    %c0_2 = arith.constant 0 : index
    %c0_3 = arith.constant 0 : index
    %c1 = arith.constant 1 : index
    %1 = vector.load %arg1[%c0_2, %c0_3, %c1] : memref<2x30x30xf32, #tpu.memory_space<vmem>>, vector<2x28x28xf32>
    %c0_4 = arith.constant 0 : index
    %c0_5 = arith.constant 0 : index
    %c2 = arith.constant 2 : index
    %2 = vector.load %arg1[%c0_4, %c0_5, %c2] : memref<2x30x30xf32, #tpu.memory_space<vmem>>, vector<2x28x28xf32>
    %c0_6 = arith.constant 0 : index
    %c1_7 = arith.constant 1 : index
    %c0_8 = arith.constant 0 : index
    %3 = vector.load %arg1[%c0_6, %c1_7, %c0_8] : memref<2x30x30xf32, #tpu.memory_space<vmem>>, vector<2x28x28xf32>
    %c0_9 = arith.constant 0 : index
    %c1_10 = arith.constant 1 : index
    %c1_11 = arith.constant 1 : index
    %4 = vector.load %arg1[%c0_9, %c1_10, %c1_11] : memref<2x30x30xf32, #tpu.memory_space<vmem>>, vector<2x28x28xf32>
    %c0_12 = arith.constant 0 : index
    %c1_13 = arith.constant 1 : index
    %c2_14 = arith.constant 2 : index
    %5 = vector.load %arg1[%c0_12, %c1_13, %c2_14] : memref<2x30x30xf32, #tpu.memory_space<vmem>>, vector<2x28x28xf32>
    %c0_15 = arith.constant 0 : index
    %c2_16 = arith.constant 2 : index
    %c0_17 = arith.constant 0 : index
    %6 = vector.load %arg1[%c0_15, %c2_16, %c0_17] : memref<2x30x30xf32, #tpu.memory_space<vmem>>, vector<2x28x28xf32>
    %c0_18 = arith.constant 0 : index
    %c2_19 = arith.constant 2 : index
    %c1_20 = arith.constant 1 : index
    %7 = vector.load %arg1[%c0_18, %c2_19, %c1_20] : memref<2x30x30xf32, #tpu.memory_space<vmem>>, vector<2x28x28xf32>
    %c0_21 = arith.constant 0 : index
    %c2_22 = arith.constant 2 : index
    %c2_23 = arith.constant 2 : index
    %8 = vector.load %arg1[%c0_21, %c2_22, %c2_23] : memref<2x30x30xf32, #tpu.memory_space<vmem>>, vector<2x28x28xf32>
    %cst = arith.constant 0.000000e+00 : f32
    %9 = vector.broadcast %cst : f32 to vector<2x28x28xf32>
    %c0_24 = arith.constant 0 : index
    %10 = memref.load %arg3[%c0_24] : memref<27xf32, #tpu.memory_space<smem>>
    %11 = vector.broadcast %10 : f32 to vector<2x28x28xf32>
    %12 = arith.mulf %11, %0 : vector<2x28x28xf32>
    %13 = arith.addf %9, %12 : vector<2x28x28xf32>
    %c1_25 = arith.constant 1 : index
    %14 = memref.load %arg3[%c1_25] : memref<27xf32, #tpu.memory_space<smem>>
    %15 = vector.broadcast %14 : f32 to vector<2x28x28xf32>
    %16 = arith.mulf %15, %1 : vector<2x28x28xf32>
    %17 = arith.addf %13, %16 : vector<2x28x28xf32>
    %c2_26 = arith.constant 2 : index
    %18 = memref.load %arg3[%c2_26] : memref<27xf32, #tpu.memory_space<smem>>
    %19 = vector.broadcast %18 : f32 to vector<2x28x28xf32>
    %20 = arith.mulf %19, %2 : vector<2x28x28xf32>
    %21 = arith.addf %17, %20 : vector<2x28x28xf32>
    %c3 = arith.constant 3 : index
    %22 = memref.load %arg3[%c3] : memref<27xf32, #tpu.memory_space<smem>>
    %23 = vector.broadcast %22 : f32 to vector<2x28x28xf32>
    %24 = arith.mulf %23, %3 : vector<2x28x28xf32>
    %25 = arith.addf %21, %24 : vector<2x28x28xf32>
    %c4 = arith.constant 4 : index
    %26 = memref.load %arg3[%c4] : memref<27xf32, #tpu.memory_space<smem>>
    %27 = vector.broadcast %26 : f32 to vector<2x28x28xf32>
    %28 = arith.mulf %27, %4 : vector<2x28x28xf32>
    %29 = arith.addf %25, %28 : vector<2x28x28xf32>
    %c5 = arith.constant 5 : index
    %30 = memref.load %arg3[%c5] : memref<27xf32, #tpu.memory_space<smem>>
    %31 = vector.broadcast %30 : f32 to vector<2x28x28xf32>
    %32 = arith.mulf %31, %5 : vector<2x28x28xf32>
    %33 = arith.addf %29, %32 : vector<2x28x28xf32>
    %c6 = arith.constant 6 : index
    %34 = memref.load %arg3[%c6] : memref<27xf32, #tpu.memory_space<smem>>
    %35 = vector.broadcast %34 : f32 to vector<2x28x28xf32>
    %36 = arith.mulf %35, %6 : vector<2x28x28xf32>
    %37 = arith.addf %33, %36 : vector<2x28x28xf32>
    %c7 = arith.constant 7 : index
    %38 = memref.load %arg3[%c7] : memref<27xf32, #tpu.memory_space<smem>>
    %39 = vector.broadcast %38 : f32 to vector<2x28x28xf32>
    %40 = arith.mulf %39, %7 : vector<2x28x28xf32>
    %41 = arith.addf %37, %40 : vector<2x28x28xf32>
    %c8 = arith.constant 8 : index
    %42 = memref.load %arg3[%c8] : memref<27xf32, #tpu.memory_space<smem>>
    %43 = vector.broadcast %42 : f32 to vector<2x28x28xf32>
    %44 = arith.mulf %43, %8 : vector<2x28x28xf32>
    %45 = arith.addf %41, %44 : vector<2x28x28xf32>
    %c0_27 = arith.constant 0 : index
    %46 = memref.load %arg4[%c0_27] : memref<3xf32, #tpu.memory_space<smem>>
    %47 = vector.broadcast %46 : f32 to vector<2x28x28xf32>
    %48 = arith.addf %45, %47 : vector<2x28x28xf32>
    %cst_28 = arith.constant 0.000000e+00 : f32
    %49 = vector.broadcast %cst_28 : f32 to vector<2x28x28xf32>
    %50 = arith.maximumf %48, %49 : vector<2x28x28xf32>
    %c0_29 = arith.constant 0 : index
    %c0_30 = arith.constant 0 : index
    %c0_31 = arith.constant 0 : index
    %c0_32 = arith.constant 0 : index
    %51 = vector.load %arg2[%c0_29, %c0_30, %c0_31, %c0_32] : memref<3x2x28x28xf32, #tpu.memory_space<vmem>>, vector<1x2x28x28xf32>
    %52 = vector.shape_cast %51 : vector<1x2x28x28xf32> to vector<2x28x28xf32>
    %53 = arith.mulf %50, %52 : vector<2x28x28xf32>
    %54 = vector.shape_cast %53 : vector<2x28x28xf32> to vector<2x7x4x28xf32>
    %cst_33 = arith.constant dense<0xFF800000> : vector<2x7x28xf32>
    %55 = vector.multi_reduction <maximumf>, %54, %cst_33 [2] : vector<2x7x4x28xf32> to vector<2x7x28xf32>
    %56 = vector.shape_cast %55 : vector<2x7x28xf32> to vector<2x7x7x4xf32>
    %cst_34 = arith.constant dense<0xFF800000> : vector<2x7x7xf32>
    %57 = vector.multi_reduction <maximumf>, %56, %cst_34 [3] : vector<2x7x7x4xf32> to vector<2x7x7xf32>
    %58 = vector.shape_cast %57 : vector<2x7x7xf32> to vector<2x49xf32>
    %cst_35 = arith.constant 0.000000e+00 : f32
    %59 = vector.broadcast %cst_35 : f32 to vector<2x28x28xf32>
    %c9 = arith.constant 9 : index
    %60 = memref.load %arg3[%c9] : memref<27xf32, #tpu.memory_space<smem>>
    %61 = vector.broadcast %60 : f32 to vector<2x28x28xf32>
    %62 = arith.mulf %61, %0 : vector<2x28x28xf32>
    %63 = arith.addf %59, %62 : vector<2x28x28xf32>
    %c10 = arith.constant 10 : index
    %64 = memref.load %arg3[%c10] : memref<27xf32, #tpu.memory_space<smem>>
    %65 = vector.broadcast %64 : f32 to vector<2x28x28xf32>
    %66 = arith.mulf %65, %1 : vector<2x28x28xf32>
    %67 = arith.addf %63, %66 : vector<2x28x28xf32>
    %c11 = arith.constant 11 : index
    %68 = memref.load %arg3[%c11] : memref<27xf32, #tpu.memory_space<smem>>
    %69 = vector.broadcast %68 : f32 to vector<2x28x28xf32>
    %70 = arith.mulf %69, %2 : vector<2x28x28xf32>
    %71 = arith.addf %67, %70 : vector<2x28x28xf32>
    %c12 = arith.constant 12 : index
    %72 = memref.load %arg3[%c12] : memref<27xf32, #tpu.memory_space<smem>>
    %73 = vector.broadcast %72 : f32 to vector<2x28x28xf32>
    %74 = arith.mulf %73, %3 : vector<2x28x28xf32>
    %75 = arith.addf %71, %74 : vector<2x28x28xf32>
    %c13 = arith.constant 13 : index
    %76 = memref.load %arg3[%c13] : memref<27xf32, #tpu.memory_space<smem>>
    %77 = vector.broadcast %76 : f32 to vector<2x28x28xf32>
    %78 = arith.mulf %77, %4 : vector<2x28x28xf32>
    %79 = arith.addf %75, %78 : vector<2x28x28xf32>
    %c14 = arith.constant 14 : index
    %80 = memref.load %arg3[%c14] : memref<27xf32, #tpu.memory_space<smem>>
    %81 = vector.broadcast %80 : f32 to vector<2x28x28xf32>
    %82 = arith.mulf %81, %5 : vector<2x28x28xf32>
    %83 = arith.addf %79, %82 : vector<2x28x28xf32>
    %c15 = arith.constant 15 : index
    %84 = memref.load %arg3[%c15] : memref<27xf32, #tpu.memory_space<smem>>
    %85 = vector.broadcast %84 : f32 to vector<2x28x28xf32>
    %86 = arith.mulf %85, %6 : vector<2x28x28xf32>
    %87 = arith.addf %83, %86 : vector<2x28x28xf32>
    %c16 = arith.constant 16 : index
    %88 = memref.load %arg3[%c16] : memref<27xf32, #tpu.memory_space<smem>>
    %89 = vector.broadcast %88 : f32 to vector<2x28x28xf32>
    %90 = arith.mulf %89, %7 : vector<2x28x28xf32>
    %91 = arith.addf %87, %90 : vector<2x28x28xf32>
    %c17 = arith.constant 17 : index
    %92 = memref.load %arg3[%c17] : memref<27xf32, #tpu.memory_space<smem>>
    %93 = vector.broadcast %92 : f32 to vector<2x28x28xf32>
    %94 = arith.mulf %93, %8 : vector<2x28x28xf32>
    %95 = arith.addf %91, %94 : vector<2x28x28xf32>
    %c1_36 = arith.constant 1 : index
    %96 = memref.load %arg4[%c1_36] : memref<3xf32, #tpu.memory_space<smem>>
    %97 = vector.broadcast %96 : f32 to vector<2x28x28xf32>
    %98 = arith.addf %95, %97 : vector<2x28x28xf32>
    %cst_37 = arith.constant 0.000000e+00 : f32
    %99 = vector.broadcast %cst_37 : f32 to vector<2x28x28xf32>
    %100 = arith.maximumf %98, %99 : vector<2x28x28xf32>
    %c1_38 = arith.constant 1 : index
    %c0_39 = arith.constant 0 : index
    %c0_40 = arith.constant 0 : index
    %c0_41 = arith.constant 0 : index
    %101 = vector.load %arg2[%c1_38, %c0_39, %c0_40, %c0_41] : memref<3x2x28x28xf32, #tpu.memory_space<vmem>>, vector<1x2x28x28xf32>
    %102 = vector.shape_cast %101 : vector<1x2x28x28xf32> to vector<2x28x28xf32>
    %103 = arith.mulf %100, %102 : vector<2x28x28xf32>
    %104 = vector.shape_cast %103 : vector<2x28x28xf32> to vector<2x7x4x28xf32>
    %cst_42 = arith.constant dense<0xFF800000> : vector<2x7x28xf32>
    %105 = vector.multi_reduction <maximumf>, %104, %cst_42 [2] : vector<2x7x4x28xf32> to vector<2x7x28xf32>
    %106 = vector.shape_cast %105 : vector<2x7x28xf32> to vector<2x7x7x4xf32>
    %cst_43 = arith.constant dense<0xFF800000> : vector<2x7x7xf32>
    %107 = vector.multi_reduction <maximumf>, %106, %cst_43 [3] : vector<2x7x7x4xf32> to vector<2x7x7xf32>
    %108 = vector.shape_cast %107 : vector<2x7x7xf32> to vector<2x49xf32>
    %cst_44 = arith.constant 0.000000e+00 : f32
    %109 = vector.broadcast %cst_44 : f32 to vector<2x28x28xf32>
    %c18 = arith.constant 18 : index
    %110 = memref.load %arg3[%c18] : memref<27xf32, #tpu.memory_space<smem>>
    %111 = vector.broadcast %110 : f32 to vector<2x28x28xf32>
    %112 = arith.mulf %111, %0 : vector<2x28x28xf32>
    %113 = arith.addf %109, %112 : vector<2x28x28xf32>
    %c19 = arith.constant 19 : index
    %114 = memref.load %arg3[%c19] : memref<27xf32, #tpu.memory_space<smem>>
    %115 = vector.broadcast %114 : f32 to vector<2x28x28xf32>
    %116 = arith.mulf %115, %1 : vector<2x28x28xf32>
    %117 = arith.addf %113, %116 : vector<2x28x28xf32>
    %c20 = arith.constant 20 : index
    %118 = memref.load %arg3[%c20] : memref<27xf32, #tpu.memory_space<smem>>
    %119 = vector.broadcast %118 : f32 to vector<2x28x28xf32>
    %120 = arith.mulf %119, %2 : vector<2x28x28xf32>
    %121 = arith.addf %117, %120 : vector<2x28x28xf32>
    %c21 = arith.constant 21 : index
    %122 = memref.load %arg3[%c21] : memref<27xf32, #tpu.memory_space<smem>>
    %123 = vector.broadcast %122 : f32 to vector<2x28x28xf32>
    %124 = arith.mulf %123, %3 : vector<2x28x28xf32>
    %125 = arith.addf %121, %124 : vector<2x28x28xf32>
    %c22 = arith.constant 22 : index
    %126 = memref.load %arg3[%c22] : memref<27xf32, #tpu.memory_space<smem>>
    %127 = vector.broadcast %126 : f32 to vector<2x28x28xf32>
    %128 = arith.mulf %127, %4 : vector<2x28x28xf32>
    %129 = arith.addf %125, %128 : vector<2x28x28xf32>
    %c23 = arith.constant 23 : index
    %130 = memref.load %arg3[%c23] : memref<27xf32, #tpu.memory_space<smem>>
    %131 = vector.broadcast %130 : f32 to vector<2x28x28xf32>
    %132 = arith.mulf %131, %5 : vector<2x28x28xf32>
    %133 = arith.addf %129, %132 : vector<2x28x28xf32>
    %c24 = arith.constant 24 : index
    %134 = memref.load %arg3[%c24] : memref<27xf32, #tpu.memory_space<smem>>
    %135 = vector.broadcast %134 : f32 to vector<2x28x28xf32>
    %136 = arith.mulf %135, %6 : vector<2x28x28xf32>
    %137 = arith.addf %133, %136 : vector<2x28x28xf32>
    %c25 = arith.constant 25 : index
    %138 = memref.load %arg3[%c25] : memref<27xf32, #tpu.memory_space<smem>>
    %139 = vector.broadcast %138 : f32 to vector<2x28x28xf32>
    %140 = arith.mulf %139, %7 : vector<2x28x28xf32>
    %141 = arith.addf %137, %140 : vector<2x28x28xf32>
    %c26 = arith.constant 26 : index
    %142 = memref.load %arg3[%c26] : memref<27xf32, #tpu.memory_space<smem>>
    %143 = vector.broadcast %142 : f32 to vector<2x28x28xf32>
    %144 = arith.mulf %143, %8 : vector<2x28x28xf32>
    %145 = arith.addf %141, %144 : vector<2x28x28xf32>
    %c2_45 = arith.constant 2 : index
    %146 = memref.load %arg4[%c2_45] : memref<3xf32, #tpu.memory_space<smem>>
    %147 = vector.broadcast %146 : f32 to vector<2x28x28xf32>
    %148 = arith.addf %145, %147 : vector<2x28x28xf32>
    %cst_46 = arith.constant 0.000000e+00 : f32
    %149 = vector.broadcast %cst_46 : f32 to vector<2x28x28xf32>
    %150 = arith.maximumf %148, %149 : vector<2x28x28xf32>
    %c2_47 = arith.constant 2 : index
    %c0_48 = arith.constant 0 : index
    %c0_49 = arith.constant 0 : index
    %c0_50 = arith.constant 0 : index
    %151 = vector.load %arg2[%c2_47, %c0_48, %c0_49, %c0_50] : memref<3x2x28x28xf32, #tpu.memory_space<vmem>>, vector<1x2x28x28xf32>
    %152 = vector.shape_cast %151 : vector<1x2x28x28xf32> to vector<2x28x28xf32>
    %153 = arith.mulf %150, %152 : vector<2x28x28xf32>
    %154 = vector.shape_cast %153 : vector<2x28x28xf32> to vector<2x7x4x28xf32>
    %cst_51 = arith.constant dense<0xFF800000> : vector<2x7x28xf32>
    %155 = vector.multi_reduction <maximumf>, %154, %cst_51 [2] : vector<2x7x4x28xf32> to vector<2x7x28xf32>
    %156 = vector.shape_cast %155 : vector<2x7x28xf32> to vector<2x7x7x4xf32>
    %cst_52 = arith.constant dense<0xFF800000> : vector<2x7x7xf32>
    %157 = vector.multi_reduction <maximumf>, %156, %cst_52 [3] : vector<2x7x7x4xf32> to vector<2x7x7xf32>
    %158 = vector.shape_cast %157 : vector<2x7x7xf32> to vector<2x49xf32>
    %159 = tpu.concatenate %58, %108, %158 in 1 : vector<2x49xf32>, vector<2x49xf32>, vector<2x49xf32> -> vector<2x147xf32>
    %c0_53 = arith.constant 0 : index
    %c0_54 = arith.constant 0 : index
    %160 = vector.load %arg5[%c0_53, %c0_54] : memref<147x10xf32, #tpu.memory_space<vmem>>, vector<147x10xf32>
    %cst_55 = arith.constant dense<0.000000e+00> : vector<2x10xf32>
    %161 = tpu.matmul %159, %160, %cst_55 {dimension_numbers = #tpu.dot_dimension_numbers<[1], [0], [0], [1], [0, 0, 1, 1], [], []>} : vector<2x147xf32>, vector<147x10xf32>, vector<2x10xf32> -> vector<2x10xf32>
    %c0_56 = arith.constant 0 : index
    %c0_57 = arith.constant 0 : index
    %162 = vector.load %arg6[%c0_56, %c0_57] : memref<1x10xf32, #tpu.memory_space<vmem>>, vector<1x10xf32>
    %163 = vector.broadcast %162 : vector<1x10xf32> to vector<2x10xf32>
    %164 = arith.addf %161, %163 : vector<2x10xf32>
    %cst_58 = arith.constant dense<0xFF800000> : vector<2xf32>
    %165 = vector.multi_reduction <maximumf>, %164, %cst_58 [1] : vector<2x10xf32> to vector<2xf32>
    %166 = vector.shape_cast %165 : vector<2xf32> to vector<2x1xf32>
    %167 = vector.broadcast %166 : vector<2x1xf32> to vector<2x10xf32>
    %168 = arith.subf %164, %167 : vector<2x10xf32>
    %169 = math.exp %168 : vector<2x10xf32>
    %cst_59 = arith.constant dense<0.000000e+00> : vector<2xf32>
    %170 = vector.multi_reduction <add>, %169, %cst_59 [1] : vector<2x10xf32> to vector<2xf32>
    %171 = vector.shape_cast %170 : vector<2xf32> to vector<2x1xf32>
    %172 = vector.broadcast %171 : vector<2x1xf32> to vector<2x10xf32>
    %173 = arith.divf %169, %172 : vector<2x10xf32>
    %c0_60 = arith.constant 0 : index
    %c0_61 = arith.constant 0 : index
    %174 = vector.load %arg7[%c0_60, %c0_61] : memref<2x10xf32, #tpu.memory_space<vmem>>, vector<2x10xf32>
    tpu.vector_store %arg7[%c0_60, %c0_61], %173 {strides = array<i32>} : memref<2x10xf32, #tpu.memory_space<vmem>>, vector<2x10xf32>,
    return
  }
  func.func @transform_0(%arg0: i32) -> (i32, i32, i32) {
    %c0_i32 = arith.constant 0 : i32
    %c0_i32_0 = arith.constant 0 : i32
    %c0_i32_1 = arith.constant 0 : i32
    return %arg0, %c0_i32, %c0_i32_0 : i32, i32, i32
  }
  func.func @transform_1(%arg0: i32) -> (i32, i32, i32, i32) {
    %c0_i32 = arith.constant 0 : i32
    %c0_i32_0 = arith.constant 0 : i32
    %c0_i32_1 = arith.constant 0 : i32
    %c0_i32_2 = arith.constant 0 : i32
    return %c0_i32, %arg0, %c0_i32_0, %c0_i32_1 : i32, i32, i32, i32
  }
  func.func @transform_2(%arg0: i32) -> i32 {
    %c0_i32 = arith.constant 0 : i32
    %c0_i32_0 = arith.constant 0 : i32
    return %c0_i32 : i32
  }
  func.func @transform_3(%arg0: i32) -> i32 {
    %c0_i32 = arith.constant 0 : i32
    %c0_i32_0 = arith.constant 0 : i32
    return %c0_i32 : i32
  }
  func.func @transform_4(%arg0: i32) -> (i32, i32) {
    %c0_i32 = arith.constant 0 : i32
    %c0_i32_0 = arith.constant 0 : i32
    %c0_i32_1 = arith.constant 0 : i32
    return %c0_i32, %c0_i32_0 : i32, i32
  }
  func.func @transform_5(%arg0: i32) -> (i32, i32) {
    %c0_i32 = arith.constant 0 : i32
    %c0_i32_0 = arith.constant 0 : i32
    %c0_i32_1 = arith.constant 0 : i32
    return %c0_i32, %c0_i32_0 : i32, i32
  }
  func.func @transform_6(%arg0: i32) -> (i32, i32) {
    %c0_i32 = arith.constant 0 : i32
    %c0_i32_0 = arith.constant 0 : i32
    return %arg0, %c0_i32 : i32, i32
  }
}

</mosaic_0001>

<bundles_post_ra>
// kernel: tpu_custom_call.1
= control target key start
LH: loop header
LB: loop body
LE: loop exit
PB: predicated region body
PF: predicated region fallthrough
CT: control target
= control target key end

     0   :  { %11 = vsyncpa [#allocation4], 0  ;;  %s8383_s0 = inlined_call_operand.vmem [shape: f32[2,30,30], index: 0, kind: input, shape index: {}]   ;;  %s8384_s1 = inlined_call_operand.vmem [shape: f32[3,2,28,28], index: 1, kind: input, shape index: {}]   ;;  %s8385_s2 = inlined_call_operand.vmem [shape: f32[27], index: 2, kind: input, shape index: {}]   ;;  %s8386_s3 = inlined_call_operand.vmem [shape: f32[3], index: 3, kind: input, shape index: {}]   ;;  %s8387_s4 = inlined_call_operand.vmem [shape: f32[147,10], index: 4, kind: input, shape index: {}]   ;;  %s8388_s5 = inlined_call_operand.vmem [shape: f32[1,10], index: 5, kind: input, shape index: {}]   ;;  %s8389_s6 = inlined_call_operand.hbm [shape: f32[2,10], index: 6, kind: output, shape index: {}]  }
   0x1   :  { %12 = vsyncpa [#allocation6], 0 }
   0x2   :  { %13 = vsyncpa [#allocation3], 0  ;;  %s24_s23 = sshll.u32 %s8385_s2, 4  ;;  %s34_s26 = sshll.u32 %s8386_s3, 4  ;;  %s25_s23 = int_to_ptr.vmem [resolvable:$true] %s24_s23  ;;  %s35_s26 = int_to_ptr.vmem [resolvable:$true] %s34_s26 }
   0x3   :  { %s4433_s27 = scalar_lea.vmem %s25_s23, 16  ;;  %p4438_p1 = scmp.lt.s32.totalorder %s25_s23, %s25_s23 }
   0x4   :  { %p4434_p0 = scmp.ne.s32.totalorder %s25_s23, %s4433_s27  ;;  %p4439_p2 = scmp.lt.s32.totalorder %s4433_s27, %s4433_s27 }
   0x6   :  { %p4440_p3 = por %p4439_p2, %p4438_p1 }
   0x8   :  { %p4441_p4 = pnand %p4440_p3, %p4434_p0 }
   0xa   :  { %4444 = shalt.err (!%p4441_p4)
}
   0xb   :  { %s4485_s28 = smov [#allocation2]   ;;  %s4445_s29 = scalar_lea.vmem %s35_s26, 16 }
   0xc   :  { %27 = dma.vmem_to_smem %s25_s23, 16, %s4485_s28, [#allocation4]  }
   0xd   :  { %p4446_p5 = scmp.ne.s32.totalorder %s35_s26, %s4445_s29  ;;  %p4450_p6 = scmp.lt.s32.totalorder %s35_s26, %s35_s26 }
   0xe   :  { %p4451_p7 = scmp.lt.s32.totalorder %s4445_s29, %s4445_s29 }
  0x10   :  { %p4452_p8 = por %p4451_p7, %p4450_p6 }
  0x12   :  { %p4453_p9 = pnand %p4452_p8, %p4446_p5 }
  0x14   :  { %4456 = shalt.err (!%p4453_p9)
}
  0x15   :  { %s4486_s2 = smov [#allocation5]  }
  0x16   :  { %37 = dma.vmem_to_smem %s35_s26, 16, %s4486_s2, [#allocation6]  }
  0x17   :  { %4479 = dma.done.wait [#allocation4], 16  }
  0x18   :  { %4480 = vsyncadd [#allocation4], 4294967280 }
  0x19   :  { %4481 = dma.done.wait [#allocation6], 16  }
  0x1a   :  { %4482 = vsyncadd [#allocation6], 4294967280 }
  0x1b   :  { %48 = sfence }
  0x1c   :  { %s4306_s3 = sld [smem:[#allocation2 + $0x1]]  ;;  %v4552_v0 = vld [vmem:[%s8383_s0 + $0x10] sm:$0xff]  ;;  %v4557_v1 = vld [vmem:[%s8383_s0] sm:$0xff]  ;;  %v4562_v3 = vld [vmem:[%s8383_s0 + $0x18] sm:$0xf]  ;;  %s4487_s14 = smov 127  }
  0x1d   :  { %v4567_v4 = vld [vmem:[%s8383_s0 + $0x8] sm:$0xff]  ;;  %v4583_v10 = vld [vmem:[%s8383_s0 + $0x20] sm:$0xff]  ;;  %s4307_s19 = sld [smem:[#allocation2 + $0x2]]  ;;  %v4592_v13 = vld [vmem:[%s8383_s0 + $0x38] sm:$0xf]  ;;  %s4488_s24 = smov 126  }
  0x1e   :  { %v4578_v9 = vld [vmem:[%s8383_s0 + $0x28] sm:$0xff]  ;;  %v4597_v14 = vld [vmem:[%s8383_s0 + $0x30] sm:$0xff]  ;;  %s4309_s25 = sld [smem:[#allocation2 + $0x4]]  ;;  %v4636_v31 = vld [vmem:[%s8383_s0 + $0x19] sm:$0xf]  ;;  %s4310_s12 = sld [smem:[#allocation2 + $0x5]] }
  0x1f   :  { %8492 = vst [vmem:[#allocation11_spill] sm:$0xff] %v4578_v9  ;;  %v4622_v26 = vld [vmem:[%s8383_s0 + $0x9] sm:$0xff]  ;;  %v4627_v28 = vld [vmem:[%s8383_s0 + $0x1] sm:$0xff]  ;;  %v4641_v32 = vld [vmem:[%s8383_s0 + $0x11] sm:$0xff]  ;;  %s4312_s18 = sld [smem:[#allocation2 + $0x7]]  ;;  %s4313_s30 = sld [smem:[#allocation2 + $0x8]] }
  0x20   :  { %v4650_v35 = vld [vmem:[%s8383_s0 + $0x29] sm:$0xff]  ;;  %v4655_v36 = vld [vmem:[%s8383_s0 + $0x21] sm:$0xff]  ;;  %v4664_v39 = vld [vmem:[%s8383_s0 + $0x39] sm:$0xf]  ;;  %s73_s11 = sld [smem:[#allocation2]]  ;;  %s4311_s13 = sld [smem:[#allocation2 + $0x6]] }
  0x21   :  { %v4669_v40 = vld [vmem:[%s8383_s0 + $0x31] sm:$0xff]  ;;  %v4699_v54 = vld [vmem:[%s8383_s0 + $0x2] sm:$0xff]  ;;  %v4708_v57 = vld [vmem:[%s8383_s0 + $0x1a] sm:$0xf]  ;;  %s427_s15 = sld [smem:[#allocation5]]  ;;  %vm479_vm0 = vcmask 224256  }
  0x22   :  { %v92_v2 = vstv %s4306_s3  ;;  %v4694_v52 = vld [vmem:[%s8383_s0 + $0xa] sm:$0xff]  ;;  %v4713_v58 = vld [vmem:[%s8383_s0 + $0x12] sm:$0xff]  ;;  %v4727_v62 = vld [vmem:[%s8383_s0 + $0x22] sm:$0xff]  ;;  %s4489_s27 = smov 124   ;;  %s4490_s8 = smov 120   ;;  %vm761_vm1 = vcmask 1041409  }
  0x23   :  { %v95_v5 = vmul.f32 %v92_v2, %v4552_v0  ;;  %v93_v6 = vmul.f32 %v92_v2, %v4557_v1  ;;  %v96_v7 = vmul.f32 %v92_v2, %v4562_v3  ;;  %v94_v8 = vmul.f32 %v92_v2, %v4567_v4  ;;  %v4722_v61 = vld [vmem:[%s8383_s0 + $0x2a] sm:$0xff]  ;;  %s4491_s9 = smov 116   ;;  %s4492_s10 = smov 112  }
  0x24   :  { %v98_v11 = vmul.f32 %v92_v2, %v4578_v9  ;;  %v97_v12 = vmul.f32 %v92_v2, %v4583_v10  ;;  %v100_v15 = vmul.f32 %v92_v2, %v4592_v13  ;;  %v99_v16 = vmul.f32 %v92_v2, %v4597_v14  ;;  %s4334_s16 = sld [smem:[#allocation2 + $0x14]]  ;;  %s4318_s26 = sld [smem:[#allocation2 + $0xd]] }
  0x25   :  { %113 = vrot.lane.b32.xlu1 %v95_v5, %s4487_s14  ;;  %109 = vrot.lane.b32.xlu0 %v93_v6, %s4487_s14  ;;  %v142_v17 = vstv %s4307_s19  ;;  %v210_v27 = vstv %s4309_s25  ;;  %s4336_s2 = sld [smem:[#allocation2 + $0x16]]  ;;  %s4337_s21 = sld [smem:[#allocation2 + $0x17]]  ;;  %vm764_vm2 = vcmask 1042434   ;;  %vm767_vm3 = vcmask 1043459  }
  0x26   :  { %v144_v18 = vmul.f32 %v142_v17, %v4567_v4  ;;  %v143_v19 = vmul.f32 %v142_v17, %v4557_v1  ;;  %v146_v20 = vmul.f32 %v142_v17, %v4562_v3  ;;  %v145_v21 = vmul.f32 %v142_v17, %v4552_v0  ;;  %v4736_v5 = vld [vmem:[%s8383_s0 + $0x3a] sm:$0xf]  ;;  %v4741_v6 = vld [vmem:[%s8383_s0 + $0x32] sm:$0xff]  ;;  %s4319_s7 = sld [smem:[#allocation2 + $0xe]]  ;;  %s4321_s28 = sld [smem:[#allocation2 + $0x10]] }
  0x27   :  { %v148_v22 = vmul.f32 %v142_v17, %v4578_v9  ;;  %v147_v23 = vmul.f32 %v142_v17, %v4583_v10  ;;  %v150_v24 = vmul.f32 %v142_v17, %v4592_v13  ;;  %v149_v25 = vmul.f32 %v142_v17, %v4597_v14  ;;  %8493 = vst [vmem:[#allocation12_spill] sm:$0xff] %v4736_v5  ;;  %s4340_s22 = sld [smem:[#allocation2 + $0x1a]]  ;;  %s4335_s19 = sld [smem:[#allocation2 + $0x15]] }
  0x28   :  { %v212_v29 = vmul.f32 %v210_v27, %v4622_v26  ;;  %v211_v30 = vmul.f32 %v210_v27, %v4627_v28  ;;  %v214_v33 = vmul.f32 %v210_v27, %v4636_v31  ;;  %v213_v34 = vmul.f32 %v210_v27, %v4641_v32  ;;  %8494 = vst [vmem:[#allocation13_spill] sm:$0xff] %v4741_v6  ;;  %s4332_s17 = sld [smem:[#allocation2 + $0x12]]  ;;  %s4338_s20 = sld [smem:[#allocation2 + $0x18]] }
  0x29   :  { %115 = vrot.lane.b32.xlu1 %v96_v7, %s4487_s14  ;;  %111 = vrot.lane.b32.xlu0 %v94_v8, %s4487_s14  ;;  %v216_v37 = vmul.f32 %v210_v27, %v4650_v35  ;;  %v215_v38 = vmul.f32 %v210_v27, %v4655_v36  ;;  %v218_v41 = vmul.f32 %v210_v27, %v4664_v39  ;;  %v260_v43 = vstv %s4310_s12  ;;  %s4308_s12 = sld [smem:[#allocation2 + $0x3]]  ;;  %s4341_s23 = sld [smem:[#allocation5 + $0x2]] }
  0x2a   :  { %v217_v42 = vmul.f32 %v210_v27, %v4669_v40  ;;  %v262_v44 = vmul.f32 %v260_v43, %v4622_v26  ;;  %v261_v45 = vmul.f32 %v260_v43, %v4627_v28  ;;  %v264_v46 = vmul.f32 %v260_v43, %v4636_v31  ;;  %s4507_s3 = smov [#allocation7]  }
  0x2b   :  { %v263_v47 = vmul.f32 %v260_v43, %v4641_v32  ;;  %v266_v48 = vmul.f32 %v260_v43, %v4650_v35  ;;  %v265_v49 = vmul.f32 %v260_v43, %v4655_v36  ;;  %v268_v50 = vmul.f32 %v260_v43, %v4664_v39 }
  0x2c   :  { %v267_v51 = vmul.f32 %v260_v43, %v4669_v40  ;;  %v328_v53 = vstv %s4312_s18  ;;  %s4323_s18 = sld [smem:[#allocation5 + $0x1]]  ;;  %vm770_vm4 = vcmask 1044484   ;;  %vm773_vm5 = vcmask 1045509  }
  0x2d   :  { %119 = vrot.lane.b32.xlu1 %v98_v11, %s4487_s14  ;;  %117 = vrot.lane.b32.xlu0 %v97_v12, %s4487_s14  ;;  %v330_v55 = vmul.f32 %v328_v53, %v4694_v52  ;;  %v329_v56 = vmul.f32 %v328_v53, %v4699_v54  ;;  %v332_v59 = vmul.f32 %v328_v53, %v4708_v57  ;;  %v378_v11 = vstv %s4313_s30  ;;  %s4494_s30 = smov 104  }
  0x2e   :  { %v331_v60 = vmul.f32 %v328_v53, %v4713_v58  ;;  %v334_v63 = vmul.f32 %v328_v53, %v4722_v61  ;;  %v333_v2 = vmul.f32 %v328_v53, %v4727_v62  ;;  %v336_v7 = vmul.f32 %v328_v53, %v4736_v5 }
  0x2f   :  { %v335_v8 = vmul.f32 %v328_v53, %v4741_v6  ;;  %v380_v12 = vmul.f32 %v378_v11, %v4694_v52  ;;  %v381_v17 = vmul.f32 %v378_v11, %v4713_v58  ;;  %vm776_vm6 = vcmask 1046534  }
  0x30   :  { %vm1216_vm7 = vcmask 30720   ;;  %vm1434_vm8 = vcmask 56320   ;;  %vm4203_vm9 = vcmask 1042432   ;;  %vm1436_vm10 = vcmask 113664  }
  0x31   :  { %123 = vrot.lane.b32.xlu1 %v100_v15, %s4487_s14  ;;  %121 = vrot.lane.b32.xlu0 %v99_v16, %s4487_s14  ;;  %v379_v15 = vmul.f32 %v378_v11, %v4699_v54  ;;  %v382_v16 = vmul.f32 %v378_v11, %v4708_v57  ;;  %vm1438_vm11 = vcmask 171008   ;;  %vm1440_vm12 = vcmask 228352  }
  0x32   :  { %vm1444_vm13 = vcmask 343040   ;;  %vm1442_vm14 = vcmask 285696   ;;  %vm4170_vm15 = vcmask 400384  }
  0x35   :  { %161 = vrot.lane.b32.xlu1 %v144_v18, %s4488_s24  ;;  %159 = vrot.lane.b32.xlu0 %v143_v19, %s4488_s24  ;;  %v384_v18 = vmul.f32 %v378_v11, %v4722_v61  ;;  %v383_v19 = vmul.f32 %v378_v11, %v4727_v62 }
  0x39   :  { %165 = vrot.lane.b32.xlu1 %v146_v20, %s4488_s24  ;;  %163 = vrot.lane.b32.xlu0 %v145_v21, %s4488_s24  ;;  %v386_v20 = vmul.f32 %v378_v11, %v4736_v5  ;;  %v385_v21 = vmul.f32 %v378_v11, %v4741_v6 }
  0x3d   :  { %169 = vrot.lane.b32.xlu1 %v148_v22, %s4488_s24  ;;  %167 = vrot.lane.b32.xlu0 %v147_v23, %s4488_s24 }
  0x41   :  { %173 = vrot.lane.b32.xlu1 %v150_v24, %s4488_s24  ;;  %171 = vrot.lane.b32.xlu0 %v149_v25, %s4488_s24 }
  0x45   :  { %229 = vrot.lane.b32.xlu1 %v212_v29, %s4487_s14  ;;  %227 = vrot.lane.b32.xlu0 %v211_v30, %s4487_s14 }
  0x49   :  { %233 = vrot.lane.b32.xlu1 %v214_v33, %s4487_s14  ;;  %231 = vrot.lane.b32.xlu0 %v213_v34, %s4487_s14 }
  0x4d   :  { %237 = vrot.lane.b32.xlu1 %v216_v37, %s4487_s14  ;;  %235 = vrot.lane.b32.xlu0 %v215_v38, %s4487_s14 }
  0x51   :  { %241 = vrot.lane.b32.xlu1 %v218_v41, %s4487_s14  ;;  %239 = vrot.lane.b32.xlu0 %v217_v42, %s4487_s14 }
  0x55   :  { %279 = vrot.lane.b32.xlu1 %v262_v44, %s4488_s24  ;;  %277 = vrot.lane.b32.xlu0 %v261_v45, %s4488_s24 }
  0x59   :  { %283 = vrot.lane.b32.xlu1 %v264_v46, %s4488_s24  ;;  %281 = vrot.lane.b32.xlu0 %v263_v47, %s4488_s24 }
  0x5d   :  { %287 = vrot.lane.b32.xlu1 %v266_v48, %s4488_s24  ;;  %285 = vrot.lane.b32.xlu0 %v265_v49, %s4488_s24 }
  0x61   :  { %291 = vrot.lane.b32.xlu1 %v268_v50, %s4488_s24  ;;  %289 = vrot.lane.b32.xlu0 %v267_v51, %s4488_s24 }
  0x65   :  { %347 = vrot.lane.b32.xlu1 %v330_v55, %s4487_s14  ;;  %345 = vrot.lane.b32.xlu0 %v329_v56, %s4487_s14 }
  0x69   :  { %351 = vrot.lane.b32.xlu1 %v332_v59, %s4487_s14  ;;  %349 = vrot.lane.b32.xlu0 %v331_v60, %s4487_s14 }
  0x6d   :  { %355 = vrot.lane.b32.xlu1 %v334_v63, %s4487_s14  ;;  %353 = vrot.lane.b32.xlu0 %v333_v2, %s4487_s14  ;;  %v4785_v2 = vstv %s73_s11  ;;  %s4493_s11 = smov 108  }
  0x6e   :  { %v75_v11 = vmul.f32 %v4785_v2, %v4557_v1 }
  0x71   :  { %359 = vrot.lane.b32.xlu1 %v336_v7, %s4487_s14  ;;  %357 = vrot.lane.b32.xlu0 %v335_v8, %s4487_s14 }
  0x75   :  { %397 = vrot.lane.b32.xlu1 %v380_v12, %s4488_s24  ;;  %395 = vrot.lane.b32.xlu0 %v379_v15, %s4488_s24  ;;  %v76_v12 = vmul.f32 %v4785_v2, %v4567_v4 }
  0x79   :  { %401 = vrot.lane.b32.xlu1 %v382_v16, %s4488_s24  ;;  %399 = vrot.lane.b32.xlu0 %v381_v17, %s4488_s24  ;;  %v4799_v17 = vstv %s4308_s12  ;;  %s4315_s12 = sld [smem:[#allocation2 + $0xa]] }
  0x7a   :  { %v194_v4 = vmul.f32 %v4799_v17, %v4622_v26 }
  0x7d   :  { %405 = vrot.lane.b32.xlu1 %v384_v18, %s4488_s24  ;;  %403 = vrot.lane.b32.xlu0 %v383_v19, %s4488_s24  ;;  %v77_v18 = vmul.f32 %v4785_v2, %v4552_v0  ;;  %v80_v0 = vmul.f32 %v4785_v2, %v4578_v9 }
  0x81   :  { %409 = vrot.lane.b32.xlu1 %v386_v20, %s4488_s24  ;;  %407 = vrot.lane.b32.xlu0 %v385_v21, %s4488_s24  ;;  %v78_v20 = vmul.f32 %v4785_v2, %v4562_v3  ;;  %v195_v3 = vmul.f32 %v4799_v17, %v4641_v32 }
  0x97   :  { %v114_v22 = vpop.permute.xlu1 %113  ;;  %v110_v23 = vpop.permute.xlu0 %109 }
  0x98   :  { %v133_v19 = vadd.f32 %v110_v23, %v75_v11  ;;  %v196_v23 = vmul.f32 %v4799_v17, %v4636_v31 }
  0x9b   :  { %v116_v24 = vpop.permute.xlu1 %115  ;;  %v112_v25 = vpop.permute.xlu0 %111 }
  0x9c   :  { %v134_v21 = vadd.f32 %v112_v25, %v76_v12  ;;  %v136_v5 = vadd.f32 %v116_v24, %v78_v20  ;;  %v4815_v25 = vstv %s4311_s13  ;;  %s4333_s13 = sld [smem:[#allocation2 + $0x13]] }
  0x9d   :  { %v311_v31 = vmul.f32 %v4815_v25, %v4699_v54  ;;  %v314_v54 = vmul.f32 %v4815_v25, %v4708_v57 }
  0x9f   :  { %v120_v27 = vpop.permute.xlu1 %119  ;;  %v4765_v29 = vpop.permute.xlu0 %117 }
  0xa0   :  { %v138_v24 = vadd.f32 %v120_v27, %v80_v0  ;;  %v198_v27 = vmul.f32 %v4799_v17, %v4650_v35 }
  0xa3   :  { %v4767_v30 = vpop.permute.xlu1 %123  ;;  %v4769_v33 = vpop.permute.xlu0 %121 }
  0xa7   :  { %v162_v34 = vpop.permute.xlu1 %161  ;;  %v160_v37 = vpop.permute.xlu0 %159 }
  0xa8   :  { %v183_v6 = vadd.f32 %v160_v37, %v133_v19 }
  0xab   :  { %v166_v38 = vpop.permute.xlu1 %165  ;;  %v164_v41 = vpop.permute.xlu0 %163 }
  0xac   :  { %v186_v11 = vadd.f32 %v166_v38, %v136_v5 }
  0xaf   :  { %v170_v42 = vpop.permute.xlu1 %169  ;;  %v4771_v43 = vpop.permute.xlu0 %167 }
  0xb3   :  { %v4773_v44 = vpop.permute.xlu1 %173  ;;  %v4775_v45 = vpop.permute.xlu0 %171 }
  0xb7   :  { %v230_v46 = vpop.permute.xlu1 %229  ;;  %v228_v47 = vpop.permute.xlu0 %227 }
  0xbb   :  { %v234_v48 = vpop.permute.xlu1 %233  ;;  %v232_v49 = vpop.permute.xlu0 %231 }
  0xbf   :  { %v4777_v50 = vpop.permute.xlu1 %237  ;;  %v4779_v51 = vpop.permute.xlu0 %235 }
  0xc3   :  { %v4781_v53 = vpop.permute.xlu1 %241  ;;  %v4783_v55 = vpop.permute.xlu0 %239 }
  0xc4   :  { %8495 = vst [vmem:[#allocation14_spill] sm:$0xff] %v4781_v53  ;;  %8496 = vst [vmem:[#allocation15_spill] sm:$0xff] %v4783_v55  ;;  %v184_v53 = vadd.f32 %v162_v34, %v134_v21  ;;  %v204_v21 = vadd.f32 %v196_v23, %v186_v11  ;;  %v4844_v23 = vstv %s427_s15  ;;  %s4316_s15 = sld [smem:[#allocation2 + $0xb]] }
  0xc6   :  { %v202_v12 = vadd.f32 %v194_v4, %v184_v53 }
  0xc7   :  { %v280_v56 = vpop.permute.xlu1 %279  ;;  %v278_v59 = vpop.permute.xlu0 %277 }
  0xcb   :  { %v284_v60 = vpop.permute.xlu1 %283  ;;  %v282_v63 = vpop.permute.xlu0 %281 }
  0xcf   :  { %v4787_v7 = vpop.permute.xlu1 %287  ;;  %v4789_v8 = vpop.permute.xlu0 %285 }
  0xd3   :  { %v4795_v15 = vpop.permute.xlu1 %291  ;;  %v4797_v16 = vpop.permute.xlu0 %289 }
  0xd4   :  { %8497 = vst [vmem:[#allocation16_spill] sm:$0xff] %v4795_v15  ;;  %8498 = vst [vmem:[#allocation17_spill] sm:$0xff] %v4797_v16  ;;  %v193_v16 = vmul.f32 %v4799_v17, %v4627_v28  ;;  %v135_v15 = vadd.f32 %v114_v22, %v77_v18  ;;  %v252_v28 = vadd.f32 %v230_v46, %v202_v12 }
  0xd5   :  { %v312_v18 = vmul.f32 %v4815_v25, %v4694_v52  ;;  %v254_v52 = vadd.f32 %v234_v48, %v204_v21 }
  0xd6   :  { %v185_v26 = vadd.f32 %v164_v41, %v135_v15  ;;  %v201_v19 = vadd.f32 %v193_v16, %v183_v6  ;;  %v302_v5 = vadd.f32 %v280_v56, %v252_v28  ;;  %v79_v6 = vmul.f32 %v4785_v2, %v4583_v10 }
  0xd7   :  { %v348_v55 = vpop.permute.xlu1 %347  ;;  %v346_v1 = vpop.permute.xlu0 %345  ;;  %v188_v41 = vadd.f32 %v170_v42, %v138_v24  ;;  %v304_v56 = vadd.f32 %v284_v60, %v254_v52  ;;  %v200_v24 = vmul.f32 %v4799_v17, %v4664_v39 }
  0xd8   :  { %v251_v22 = vadd.f32 %v228_v47, %v201_v19  ;;  %v203_v9 = vadd.f32 %v195_v3, %v185_v26  ;;  %v313_v47 = vmul.f32 %v4815_v25, %v4713_v58  ;;  %v320_v16 = vadd.f32 %v312_v18, %v302_v5 }
  0xd9   :  { %v137_v42 = vadd.f32 %v4765_v29, %v79_v6  ;;  %v206_v0 = vadd.f32 %v198_v27, %v188_v41  ;;  %v322_v3 = vadd.f32 %v314_v54, %v304_v56  ;;  %v199_v54 = vmul.f32 %v4799_v17, %v4669_v40 }
  0xda   :  { %v301_v38 = vadd.f32 %v278_v59, %v251_v22  ;;  %v253_v46 = vadd.f32 %v232_v49, %v203_v9  ;;  %v82_v9 = vmul.f32 %v4785_v2, %v4592_v13  ;;  %v370_v35 = vadd.f32 %v348_v55, %v320_v16 }
  0xdb   :  { %v352_v34 = vpop.permute.xlu1 %351  ;;  %v350_v37 = vpop.permute.xlu0 %349  ;;  %v187_v57 = vadd.f32 %v4771_v43, %v137_v42  ;;  %v256_v58 = vadd.f32 %v4777_v50, %v206_v0  ;;  %v197_v49 = vmul.f32 %v4799_v17, %v4655_v36  ;;  %v81_v13 = vmul.f32 %v4785_v2, %v4597_v14  ;;  %v446_v2 = vld [vmem:[%s8384_s1 + $0x8] sm:$0xff]  ;;  %v8500_v0 = vld [vmem:[#allocation13_spill] sm:$0xff] }
  0xdc   :  { %v303_v59 = vadd.f32 %v282_v63, %v253_v46  ;;  %v319_v4 = vadd.f32 %v311_v31, %v301_v38  ;;  %v316_v43 = vmul.f32 %v4815_v25, %v4722_v61  ;;  %v372_v50 = vadd.f32 %v352_v34, %v322_v3  ;;  %v445_v61 = vld [vmem:[%s8384_s1] sm:$0xff] }
  0xdd   :  { %v306_v55 = vadd.f32 %v4787_v7, %v256_v58  ;;  %v140_v28 = vadd.f32 %v4767_v30, %v82_v9  ;;  %v205_v22 = vadd.f32 %v197_v49, %v187_v57  ;;  %v139_v30 = vadd.f32 %v4769_v33, %v81_v13  ;;  %v8502_v13 = vld [vmem:[#allocation15_spill] sm:$0xff] }
  0xde   :  { %v369_v48 = vadd.f32 %v346_v1, %v319_v4  ;;  %v321_v11 = vadd.f32 %v313_v47, %v303_v59  ;;  %v317_v9 = vmul.f32 %v4815_v25, %v8500_v0 }
  0xdf   :  { %v4821_v20 = vpop.permute.xlu1 %355  ;;  %v4823_v32 = vpop.permute.xlu0 %353  ;;  %v190_v5 = vadd.f32 %v4773_v44, %v140_v28  ;;  %v255_v39 = vadd.f32 %v4779_v51, %v205_v22  ;;  %v324_v38 = vadd.f32 %v316_v43, %v306_v55  ;;  %v189_v46 = vadd.f32 %v4775_v45, %v139_v30  ;;  %v448_v45 = vld [vmem:[%s8384_s1 + $0x18] sm:$0xf] }
  0xe0   :  { %v371_v1 = vadd.f32 %v350_v37, %v321_v11  ;;  %v315_v44 = vmul.f32 %v4815_v25, %v4727_v62  ;;  %v447_v62 = vld [vmem:[%s8384_s1 + $0x10] sm:$0xff] }
  0xe1   :  { %v305_v33 = vadd.f32 %v4789_v8, %v255_v39  ;;  %v374_v47 = vadd.f32 %v4821_v20, %v324_v38  ;;  %v208_v4 = vadd.f32 %v200_v24, %v190_v5  ;;  %v8499_v20 = vld [vmem:[#allocation12_spill] sm:$0xff] }
  0xe2   :  { %v318_v42 = vmul.f32 %v4815_v25, %v8499_v20  ;;  %v450_v25 = vld [vmem:[%s8384_s1 + $0x28] sm:$0xff] }
  0xe3   :  { %v4833_v53 = vpop.permute.xlu1 %359  ;;  %v4835_v15 = vpop.permute.xlu0 %357  ;;  %v323_v57 = vadd.f32 %v315_v44, %v305_v33 }
  0xe5   :  { %v373_v43 = vadd.f32 %v4823_v32, %v323_v57 }
  0xe7   :  { %v398_v60 = vpop.permute.xlu1 %397  ;;  %v396_v63 = vpop.permute.xlu0 %395 }
  0xe8   :  { %v420_v29 = vadd.f32 %v398_v60, %v370_v35  ;;  %v419_v26 = vadd.f32 %v396_v63, %v369_v48  ;;  %v207_v48 = vadd.f32 %v199_v54, %v189_v46  ;;  %v8501_v60 = vld [vmem:[#allocation14_spill] sm:$0xff] }
  0xe9   :  { %v258_v63 = vadd.f32 %v8501_v60, %v208_v4  ;;  %v451_v60 = vld [vmem:[%s8384_s1 + $0x30] sm:$0xff] }
  0xea   :  { %v430_v12 = vadd.f32 %v4844_v23, %v420_v29  ;;  %v429_v19 = vadd.f32 %v4844_v23, %v419_v26  ;;  %v257_v55 = vadd.f32 %v8502_v13, %v207_v48 }
  0xeb   :  { %v402_v7 = vpop.permute.xlu1 %401  ;;  %v400_v34 = vpop.permute.xlu0 %399 }
  0xec   :  { %v438_v37 = vmax.f32 %v430_v12, 0.0  ;;  %v437_v18 = vmax.f32 %v429_v19, 0.0  ;;  %v422_v31 = vadd.f32 %v402_v7, %v372_v50  ;;  %v421_v21 = vadd.f32 %v400_v34, %v371_v1  ;;  %v8503_v12 = vld [vmem:[#allocation16_spill] sm:$0xff] }
  0xed   :  { %v308_v19 = vadd.f32 %v8503_v12, %v258_v63 }
  0xee   :  { %v4865_v6 = vmul.f32 %v446_v2, %v438_v37  ;;  %v4867_v41 = vmul.f32 %v445_v61, %v437_v18  ;;  %v432_v27 = vadd.f32 %v4844_v23, %v422_v31  ;;  %v431_v52 = vadd.f32 %v4844_v23, %v421_v21  ;;  %v8504_v2 = vld [vmem:[#allocation17_spill] sm:$0xff] }
  0xef   :  { %v406_v51 = vpop.permute.xlu1 %405  ;;  %v404_v26 = vpop.permute.xlu0 %403  ;;  %v307_v61 = vadd.f32 %v8504_v2, %v257_v55  ;;  %v326_v38 = vadd.f32 %v318_v42, %v308_v19 }
  0xf0   :  { %v494_v56 = vsel %vm479_vm0, %v4865_v6, -inf  ;;  %v480_v59 = vsel %vm479_vm0, %v4867_v41, -inf  ;;  %v440_v17 = vmax.f32 %v432_v27, 0.0  ;;  %v439_v8 = vmax.f32 %v431_v52, 0.0 }
  0xf1   :  { %v495_v16 = vrot.slane %v494_v56, 4  ;;  %v481_v40 = vrot.slane %v480_v59, 4  ;;  %v424_v35 = vadd.f32 %v406_v51, %v374_v47  ;;  %v423_v37 = vadd.f32 %v404_v26, %v373_v43 }
  0xf2   :  { %v456_v3 = vmul.f32 %v448_v45, %v440_v17  ;;  %v4893_v11 = vmul.f32 %v447_v62, %v439_v8  ;;  %v325_v27 = vadd.f32 %v317_v9, %v307_v61  ;;  %v449_v17 = vld [vmem:[%s8384_s1 + $0x20] sm:$0xff] }
  0xf3   :  { %v496_v58 = vmax.f32 %v494_v56, %v495_v16  ;;  %v482_v49 = vmax.f32 %v480_v59, %v481_v40  ;;  %v434_v29 = vadd.f32 %v4844_v23, %v424_v35  ;;  %v433_v46 = vadd.f32 %v4844_v23, %v423_v37  ;;  %v410_v51 = vpop.permute.xlu1 %409  ;;  %v408_v47 = vpop.permute.xlu0 %407  ;;  %v452_v35 = vld [vmem:[%s8384_s1 + $0x38] sm:$0xf] }
  0xf4   :  { %v522_v28 = vsel %vm479_vm0, %v456_v3, -inf  ;;  %v508_v22 = vsel %vm479_vm0, %v4893_v11, -inf  ;;  %v376_v56 = vadd.f32 %v4833_v53, %v326_v38  ;;  %v375_v59 = vadd.f32 %v4835_v15, %v325_v27 }
  0xf5   :  { %v497_v50 = vrot.slane %v496_v58, 2  ;;  %v483_v1 = vrot.slane %v482_v49, 2  ;;  %v442_v24 = vmax.f32 %v434_v29, 0.0  ;;  %v523_v32 = vrot.slane %v522_v28, 4 }
  0xf6   :  { %v509_v18 = vrot.slane %v508_v22, 4  ;;  %v441_v8 = vmax.f32 %v433_v46, 0.0  ;;  %v426_v4 = vadd.f32 %v410_v51, %v376_v56  ;;  %v425_v20 = vadd.f32 %v408_v47, %v375_v59 }
  0xf7   :  { %v498_v7 = vmax.f32 %v496_v58, %v497_v50  ;;  %v484_v34 = vmax.f32 %v482_v49, %v483_v1  ;;  %v4906_v31 = vmul.f32 %v450_v25, %v442_v24  ;;  %v524_v5 = vmax.f32 %v522_v28, %v523_v32 }
  0xf8   :  { %v510_v39 = vmax.f32 %v508_v22, %v509_v18  ;;  %v457_v53 = vmul.f32 %v449_v17, %v441_v8  ;;  %v436_v15 = vadd.f32 %v4844_v23, %v426_v4  ;;  %v435_v0 = vadd.f32 %v4844_v23, %v425_v20 }
  0xf9   :  { %v485_v21 = vrot.slane %v484_v34, 1  ;;  %v499_v30 = vrot.slane %v498_v7, 1  ;;  %v525_v54 = vrot.slane %v524_v5, 2  ;;  %v543_v44 = vsel %vm479_vm0, %v4906_v31, -inf }
  0xfa   :  { %v511_v33 = vrot.slane %v510_v39, 2  ;;  %v544_v40 = vrot.slane %v543_v44, 4  ;;  %v529_v58 = vsel %vm479_vm0, %v457_v53, -inf  ;;  %v444_v49 = vmax.f32 %v436_v15, 0.0 }
  0xfb   :  { %v4908_v52 = vmax.f32 %v484_v34, %v485_v21  ;;  %v4917_v45 = vmax.f32 %v498_v7, %v499_v30  ;;  %v526_v62 = vmax.f32 %v524_v5, %v525_v54  ;;  %v530_v63 = vrot.slane %v529_v58, 4 }
  0xfc   :  { %v512_v16 = vmax.f32 %v510_v39, %v511_v33  ;;  %v545_v9 = vmax.f32 %v543_v44, %v544_v40  ;;  %v443_v23 = vmax.f32 %v435_v0, 0.0  ;;  %v460_v3 = vmul.f32 %v452_v35, %v444_v49 }
  0xfd   :  { %8505 = vst [vmem:[#allocation12_spill] sm:$0xff] %v4908_v52  ;;  %592 = vrot.lane.b32.xlu0 %v4908_v52, %s4489_s27  ;;  %8506 = vst [vmem:[#allocation13_spill] sm:$0xff] %v4917_v45  ;;  %v527_v48 = vrot.slane %v526_v62, 1  ;;  %v531_v26 = vmax.f32 %v529_v58, %v530_v63  ;;  %v470_v24 = vcombine.high %v457_v53, %v457_v53 }
  0xfe   :  { %v513_v42 = vrot.slane %v512_v16, 1  ;;  %v546_v29 = vrot.slane %v545_v9, 2  ;;  %v459_v13 = vmul.f32 %v451_v60, %v443_v23  ;;  %v571_v43 = vsel %vm479_vm0, %v460_v3, -inf }
  0xff   :  { %v4937_v55 = vmax.f32 %v526_v62, %v527_v48  ;;  %v532_v50 = vrot.slane %v531_v26, 2  ;;  %v572_v1 = vrot.slane %v571_v43, 4  ;;  %v471_v18 = vcombine.high %v4906_v31, %v4906_v31 }
 0x100   :  { %v4929_v57 = vmax.f32 %v512_v16, %v513_v42  ;;  %v557_v25 = vsel %vm479_vm0, %v459_v13, -inf  ;;  %v547_v12 = vmax.f32 %v545_v9, %v546_v29  ;;  %v536_v21 = vsel %vm479_vm0, %v470_v24, -inf }
 0x101   :  { %596 = vrot.lane.b32.xlu0 %v4917_v45, %s4489_s27  ;;  %8508 = vst [vmem:[#allocation15_spill] sm:$0xff] %v4937_v55  ;;  %v533_v19 = vmax.f32 %v531_v26, %v532_v50  ;;  %v573_v28 = vmax.f32 %v571_v43, %v572_v1  ;;  %v558_v22 = vrot.slane %v557_v25, 4  ;;  %v467_v27 = vcombine.high %v4867_v41, %v4867_v41 }
 0x102   :  { %8507 = vst [vmem:[#allocation14_spill] sm:$0xff] %v4929_v57  ;;  %v548_v7 = vrot.slane %v547_v12, 1  ;;  %v537_v46 = vrot.slane %v536_v21, 4  ;;  %v550_v54 = vsel %vm479_vm0, %v471_v18, -inf  ;;  %v472_v31 = vcombine.high %v459_v13, %v459_v13 }
 0x103   :  { %v534_v2 = vrot.slane %v533_v19, 1  ;;  %v559_v61 = vmax.f32 %v557_v25, %v558_v22  ;;  %v574_v37 = vrot.slane %v573_v28, 2  ;;  %v468_v33 = vcombine.high %v4865_v6, %v4865_v6 }
 0x104   :  { %v4954_v5 = vmax.f32 %v547_v12, %v548_v7  ;;  %v487_v47 = vsel %vm479_vm0, %v467_v27, -inf  ;;  %v551_v56 = vrot.slane %v550_v54, 4  ;;  %v538_v41 = vmax.f32 %v536_v21, %v537_v46 }
 0x105   :  { %600 = vrot.lane.b32.xlu0 %v4929_v57, %s4489_s27  ;;  %v4945_v34 = vmax.f32 %v533_v19, %v534_v2  ;;  %v560_v32 = vrot.slane %v559_v61, 2  ;;  %v575_v39 = vmax.f32 %v573_v28, %v574_v37  ;;  %v564_v59 = vsel %vm479_vm0, %v472_v31, -inf }
 0x106   :  { %8510 = vst [vmem:[#allocation17_spill] sm:$0xff] %v4954_v5  ;;  %v501_v16 = vsel %vm479_vm0, %v468_v33, -inf  ;;  %v488_v40 = vrot.slane %v487_v47, 4  ;;  %v469_v6 = vcombine.high %v4893_v11, %v4893_v11  ;;  %v552_v62 = vmax.f32 %v550_v54, %v551_v56 }
 0x107   :  { %8509 = vst [vmem:[#allocation16_spill] sm:$0xff] %v4945_v34  ;;  %v561_v30 = vmax.f32 %v559_v61, %v560_v32  ;;  %606 = vrot.lane.b32.xlu1 %v4945_v34, %s4489_s27  ;;  %v576_v44 = vrot.slane %v575_v39, 1  ;;  %v539_v8 = vrot.slane %v538_v41, 2  ;;  %v565_v4 = vrot.slane %v564_v59, 4 }
 0x108   :  { %v502_v20 = vrot.slane %v501_v16, 4  ;;  %v489_v42 = vmax.f32 %v487_v47, %v488_v40  ;;  %v515_v53 = vsel %vm479_vm0, %v469_v6, -inf  ;;  %v553_v15 = vrot.slane %v552_v62, 2  ;;  %v8528_v47 = vld [vmem:[#allocation11_spill] sm:$0xff] }
 0x109   :  { %604 = vrot.lane.b32.xlu0 %v4937_v55, %s4489_s27  ;;  %v562_v38 = vrot.slane %v561_v30, 1  ;;  %v4974_v17 = vmax.f32 %v575_v39, %v576_v44  ;;  %v540_v0 = vmax.f32 %v538_v41, %v539_v8  ;;  %v566_v9 = vmax.f32 %v564_v59, %v565_v4  ;;  %v5149_v8 = vld [vmem:[%s8383_s0] sm:$0xff] }
 0x10a   :  { %v503_v11 = vmax.f32 %v501_v16, %v502_v20  ;;  %v490_v35 = vrot.slane %v489_v42, 2  ;;  %v516_v48 = vrot.slane %v515_v53, 4  ;;  %v554_v58 = vmax.f32 %v552_v62, %v553_v15 }
 0x10b   :  { %610 = vrot.lane.b32.xlu1 %v4954_v5, %s4489_s27  ;;  %v4965_v51 = vmax.f32 %v561_v30, %v562_v38  ;;  %8512 = vst [vmem:[#allocation19_spill] sm:$0xff] %v4974_v17  ;;  %v541_v49 = vrot.slane %v540_v0, 1  ;;  %v567_v60 = vrot.slane %v566_v9, 2  ;;  %v5099_v30 = vstv %s4315_s12 }
 0x10c   :  { %v504_v63 = vrot.slane %v503_v11, 2  ;;  %v491_v23 = vmax.f32 %v489_v42, %v490_v35  ;;  %v517_v3 = vmax.f32 %v515_v53, %v516_v48  ;;  %v555_v29 = vrot.slane %v554_v58, 1  ;;  %v5176_v48 = vld [vmem:[%s8383_s0 + $0x8] sm:$0xff] }
 0x10d   :  { %620 = vrot.lane.b32.xlu0 %v4908_v52, %s4490_s8  ;;  %8511 = vst [vmem:[#allocation18_spill] sm:$0xff] %v4965_v51  ;;  %v4991_v26 = vmax.f32 %v540_v0, %v541_v49  ;;  %v568_v13 = vmax.f32 %v566_v9, %v567_v60  ;;  %v1470_v38 = vmul.f32 %v5099_v30, %v4583_v10  ;;  %v5111_v46 = vstv %s4333_s13 }
 0x10e   :  { %v505_v43 = vmax.f32 %v503_v11, %v504_v63  ;;  %v492_v50 = vrot.slane %v491_v23, 1  ;;  %v518_v1 = vrot.slane %v517_v3, 2  ;;  %v4997_v25 = vmax.f32 %v554_v58, %v555_v29 }
 0x10f   :  { %614 = vrot.lane.b32.xlu1 %v4965_v51, %s4489_s27  ;;  %8513 = vst [vmem:[#allocation20_spill] sm:$0xff] %v4991_v26  ;;  %v569_v12 = vrot.slane %v568_v13, 1  ;;  %v2828_v31 = vmul.f32 %v5111_v46, %v4583_v10  ;;  %v1471_v56 = vmul.f32 %v5099_v30, %v8528_v47  ;;  %v5131_v59 = vstv %s4316_s15  ;;  %s4322_s15 = sld [smem:[#allocation2 + $0x11]] }
 0x110   :  { %8514 = vst [vmem:[#allocation21_spill] sm:$0xff] %v4997_v25  ;;  %v506_v19 = vrot.slane %v505_v43, 1  ;;  %v5003_v28 = vmax.f32 %v491_v23, %v492_v50  ;;  %v519_v22 = vmax.f32 %v517_v3, %v518_v1  ;;  %v1520_v40 = vmul.f32 %v5131_v59, %v4583_v10  ;;  %v5194_v23 = vld [vmem:[%s8383_s0 + $0x28] sm:$0xff] }
 0x111   :  { %624 = vrot.lane.b32.xlu0 %v4917_v45, %s4490_s8  ;;  %v5005_v24 = vmax.f32 %v568_v13, %v569_v12  ;;  %v1466_v4 = vmul.f32 %v5149_v8, %v5099_v30  ;;  %v2829_v20 = vmul.f32 %v5111_v46, %v8528_v47  ;;  %v5158_v53 = vstv %s4334_s16  ;;  %s4320_s16 = sld [smem:[#allocation2 + $0xf]] }
 0x112   :  { %8515 = vst [vmem:[#allocation22_spill] sm:$0xff] %v5003_v28  ;;  %v5011_v2 = vmax.f32 %v505_v43, %v506_v19  ;;  %v520_v61 = vrot.slane %v519_v22, 1  ;;  %v2824_v0 = vmul.f32 %v5149_v8, %v5111_v46  ;;  %v2878_v9 = vmul.f32 %v5158_v53, %v4583_v10  ;;  %v5209_v43 = vld [vmem:[%s8383_s0 + $0x30] sm:$0xff] }
 0x113   :  { %618 = vrot.lane.b32.xlu1 %v4974_v17, %s4489_s27  ;;  %8516 = vst [vmem:[#allocation23_spill] sm:$0xff] %v5005_v24  ;;  %v1467_v58 = vmul.f32 %v5176_v48, %v5099_v30  ;;  %v1472_v49 = vmul.f32 %v5099_v30, %v4597_v14  ;;  %v1516_v63 = vmul.f32 %v5149_v8, %v5131_v59 }
 0x114   :  { %8517 = vst [vmem:[#allocation24_spill] sm:$0xff] %v5011_v2  ;;  %v5017_v7 = vmax.f32 %v519_v22, %v520_v61  ;;  %v1521_v3 = vmul.f32 %v5194_v23, %v5131_v59  ;;  %v2825_v13 = vmul.f32 %v5176_v48, %v5111_v46  ;;  %v2830_v50 = vmul.f32 %v5209_v43, %v5111_v46 }
 0x115   :  { %628 = vrot.lane.b32.xlu0 %v4929_v57, %s4490_s8  ;;  %v2874_v19 = vmul.f32 %v5149_v8, %v5158_v53  ;;  %v2879_v22 = vmul.f32 %v5194_v23, %v5158_v53 }
 0x116   :  { %8518 = vst [vmem:[#allocation25_spill] sm:$0xff] %v5017_v7 }
 0x117   :  { %634 = vrot.lane.b32.xlu1 %v4945_v34, %s4490_s8 }
 0x119   :  { %632 = vrot.lane.b32.xlu0 %v4937_v55, %s4490_s8 }
 0x11b   :  { %638 = vrot.lane.b32.xlu1 %v4954_v5, %s4490_s8 }
 0x11d   :  { %648 = vrot.lane.b32.xlu0 %v4908_v52, %s4491_s9 }
 0x11f   :  { %642 = vrot.lane.b32.xlu1 %v4965_v51, %s4490_s8 }
 0x121   :  { %652 = vrot.lane.b32.xlu0 %v4917_v45, %s4491_s9 }
 0x123   :  { %646 = vrot.lane.b32.xlu1 %v4974_v17, %s4490_s8 }
 0x125   :  { %656 = vrot.lane.b32.xlu0 %v4929_v57, %s4491_s9 }
 0x127   :  { %594 = vrot.lane.b32.xlu1 %v5003_v28, %s4489_s27 }
 0x129   :  { %608 = vrot.lane.b32.xlu0 %v4991_v26, %s4489_s27 }
 0x12b   :  { %598 = vrot.lane.b32.xlu1 %v5011_v2, %s4489_s27 }
 0x12d   :  { %612 = vrot.lane.b32.xlu0 %v4997_v25, %s4489_s27 }
 0x12f   :  { %602 = vrot.lane.b32.xlu1 %v5017_v7, %s4489_s27 }
 0x131   :  { %616 = vrot.lane.b32.xlu0 %v5005_v24, %s4489_s27 }
 0x133   :  { %622 = vrot.lane.b32.xlu1 %v5003_v28, %s4490_s8 }
 0x135   :  { %636 = vrot.lane.b32.xlu0 %v4991_v26, %s4490_s8 }
 0x137   :  { %626 = vrot.lane.b32.xlu1 %v5011_v2, %s4490_s8 }
 0x139   :  { %640 = vrot.lane.b32.xlu0 %v4997_v25, %s4490_s8 }
 0x13b   :  { %630 = vrot.lane.b32.xlu1 %v5017_v7, %s4490_s8 }
 0x13d   :  { %644 = vrot.lane.b32.xlu0 %v5005_v24, %s4490_s8 }
 0x13f   :  { %650 = vrot.lane.b32.xlu1 %v5003_v28, %s4491_s9 }
 0x141   :  { %660 = vrot.lane.b32.xlu0 %v4937_v55, %s4491_s9 }
 0x143   :  { %654 = vrot.lane.b32.xlu1 %v5011_v2, %s4491_s9 }
 0x145   :  { %664 = vrot.lane.b32.xlu0 %v4991_v26, %s4491_s9 }
 0x147   :  { %658 = vrot.lane.b32.xlu1 %v5017_v7, %s4491_s9 }
 0x149   :  { %668 = vrot.lane.b32.xlu0 %v4997_v25, %s4491_s9 }
 0x14b   :  { %662 = vrot.lane.b32.xlu1 %v4945_v34, %s4491_s9 }
 0x14d   :  { %672 = vrot.lane.b32.xlu0 %v5005_v24, %s4491_s9 }
 0x14f   :  { %666 = vrot.lane.b32.xlu1 %v4954_v5, %s4491_s9 }
 0x151   :  { %676 = vrot.lane.b32.xlu0 %v4908_v52, %s4492_s10 }
 0x153   :  { %670 = vrot.lane.b32.xlu1 %v4965_v51, %s4491_s9 }
 0x155   :  { %680 = vrot.lane.b32.xlu0 %v4917_v45, %s4492_s10 }
 0x157   :  { %674 = vrot.lane.b32.xlu1 %v4974_v17, %s4491_s9 }
 0x159   :  { %684 = vrot.lane.b32.xlu0 %v4929_v57, %s4492_s10 }
 0x15b   :  { %678 = vrot.lane.b32.xlu1 %v5003_v28, %s4492_s10 }
 0x15d   :  { %688 = vrot.lane.b32.xlu0 %v4937_v55, %s4492_s10 }
 0x15f   :  { %682 = vrot.lane.b32.xlu1 %v5011_v2, %s4492_s10 }
 0x161   :  { %692 = vrot.lane.b32.xlu0 %v4991_v26, %s4492_s10 }
 0x163   :  { %686 = vrot.lane.b32.xlu1 %v5017_v7, %s4492_s10 }
 0x165   :  { %696 = vrot.lane.b32.xlu0 %v4997_v25, %s4492_s10 }
 0x167   :  { %690 = vrot.lane.b32.xlu1 %v4945_v34, %s4492_s10 }
 0x169   :  { %700 = vrot.lane.b32.xlu0 %v5005_v24, %s4492_s10 }
 0x16b   :  { %694 = vrot.lane.b32.xlu1 %v4954_v5, %s4492_s10 }
 0x16d   :  { %704 = vrot.lane.b32.xlu0 %v4908_v52, %s4493_s11 }
 0x16f   :  { %v5075_v37 = vpop.permute.xlu0 %592  ;;  %698 = vrot.lane.b32.xlu1 %v4965_v51, %s4492_s10 }
 0x170   :  { %8519 = vst [vmem:[#allocation26_spill] sm:$0xff] %v5075_v37 }
 0x171   :  { %708 = vrot.lane.b32.xlu0 %v4917_v45, %s4493_s11 }
 0x173   :  { %v5081_v32 = vpop.permute.xlu0 %596  ;;  %702 = vrot.lane.b32.xlu1 %v4974_v17, %s4492_s10 }
 0x174   :  { %8520 = vst [vmem:[#allocation27_spill] sm:$0xff] %v5081_v32 }
 0x175   :  { %712 = vrot.lane.b32.xlu0 %v4929_v57, %s4493_s11 }
 0x177   :  { %v5087_v18 = vpop.permute.xlu0 %600  ;;  %706 = vrot.lane.b32.xlu1 %v5003_v28, %s4493_s11 }
 0x178   :  { %8521 = vst [vmem:[#allocation28_spill] sm:$0xff] %v5087_v18 }
 0x179   :  { %716 = vrot.lane.b32.xlu0 %v4937_v55, %s4493_s11  ;;  %v5109_v27 = vpop.permute.xlu1 %606 }
 0x17a   :  { %8524 = vst [vmem:[#allocation31_spill] sm:$0xff] %v5109_v27 }
 0x17b   :  { %v5093_v21 = vpop.permute.xlu0 %604  ;;  %710 = vrot.lane.b32.xlu1 %v5011_v2, %s4493_s11  ;;  %v5669_v2 = vld [vmem:[%s8383_s0 + $0x3a] sm:$0xf] }
 0x17c   :  { %8522 = vst [vmem:[#allocation29_spill] sm:$0xff] %v5093_v21  ;;  %8597 = vst [vmem:[#allocation102_spill] sm:$0xff] %v5669_v2 }
 0x17d   :  { %720 = vrot.lane.b32.xlu0 %v4991_v26, %s4493_s11  ;;  %v5120_v33 = vpop.permute.xlu1 %610 }
 0x17e   :  { %8526 = vst [vmem:[#allocation33_spill] sm:$0xff] %v5120_v33 }
 0x17f   :  { %v5101_v39 = vpop.permute.xlu0 %620  ;;  %714 = vrot.lane.b32.xlu1 %v5017_v7, %s4493_s11 }
 0x180   :  { %8523 = vst [vmem:[#allocation30_spill] sm:$0xff] %v5101_v39 }
 0x181   :  { %724 = vrot.lane.b32.xlu0 %v4997_v25, %s4493_s11  ;;  %v5129_v41 = vpop.permute.xlu1 %614 }
 0x182   :  { %8529 = vst [vmem:[#allocation11_spill] sm:$0xff] %v5129_v41 }
 0x183   :  { %v5113_v54 = vpop.permute.xlu0 %624  ;;  %718 = vrot.lane.b32.xlu1 %v4945_v34, %s4493_s11 }
 0x184   :  { %8525 = vst [vmem:[#allocation32_spill] sm:$0xff] %v5113_v54 }
 0x185   :  { %1490 = vrot.lane.b32.xlu0 %v1470_v38, %s4487_s14  ;;  %v5140_v6 = vpop.permute.xlu1 %618 }
 0x186   :  { %8531 = vst [vmem:[#allocation36_spill] sm:$0xff] %v5140_v6 }
 0x187   :  { %v5122_v44 = vpop.permute.xlu0 %628  ;;  %722 = vrot.lane.b32.xlu1 %v4954_v5, %s4493_s11 }
 0x188   :  { %8527 = vst [vmem:[#allocation34_spill] sm:$0xff] %v5122_v44  ;;  %v5565_v44 = vld [vmem:[%s8383_s0 + $0xa] sm:$0xff] }
 0x189   :  { %2848 = vrot.lane.b32.xlu0 %v2828_v31, %s4487_s14  ;;  %v5156_v42 = vpop.permute.xlu1 %634  ;;  %v5231_v31 = vld [vmem:[%s8383_s0 + $0x10] sm:$0xff] }
 0x18a   :  { %8533 = vst [vmem:[#allocation38_spill] sm:$0xff] %v5156_v42  ;;  %8545 = vst [vmem:[#allocation50_spill] sm:$0xff] %v5231_v31  ;;  %v1468_v47 = vmul.f32 %v5231_v31, %v5099_v30 }
 0x18b   :  { %v5133_v16 = vpop.permute.xlu0 %632  ;;  %1482 = vrot.lane.b32.xlu1 %v1466_v4, %s4487_s14  ;;  %v5240_v4 = vstv %s4318_s26  ;;  %s4314_s26 = sld [smem:[#allocation2 + $0x9]] }
 0x18c   :  { %8530 = vst [vmem:[#allocation35_spill] sm:$0xff] %v5133_v16 }
 0x18d   :  { %1492 = vrot.lane.b32.xlu0 %v1471_v56, %s4487_s14  ;;  %v5168_v11 = vpop.permute.xlu1 %638  ;;  %v1522_v56 = vmul.f32 %v5209_v43, %v5131_v59 }
 0x18e   :  { %8535 = vst [vmem:[#allocation40_spill] sm:$0xff] %v5168_v11 }
 0x18f   :  { %v5142_v62 = vpop.permute.xlu0 %648  ;;  %2840 = vrot.lane.b32.xlu1 %v2824_v0, %s4487_s14  ;;  %v1517_v0 = vmul.f32 %v5176_v48, %v5131_v59 }
 0x190   :  { %8532 = vst [vmem:[#allocation37_spill] sm:$0xff] %v5142_v62 }
 0x191   :  { %1540 = vrot.lane.b32.xlu0 %v1520_v40, %s4488_s24  ;;  %v5183_v10 = vpop.permute.xlu1 %642 }
 0x192   :  { %8537 = vst [vmem:[#allocation42_spill] sm:$0xff] %v5183_v10 }
 0x193   :  { %v5160_v15 = vpop.permute.xlu0 %652  ;;  %1484 = vrot.lane.b32.xlu1 %v1467_v58, %s4487_s14 }
 0x194   :  { %8534 = vst [vmem:[#allocation39_spill] sm:$0xff] %v5160_v15 }
 0x195   :  { %2850 = vrot.lane.b32.xlu0 %v2829_v20, %s4487_s14  ;;  %v5198_v14 = vpop.permute.xlu1 %646 }
 0x196   :  { %8539 = vst [vmem:[#allocation44_spill] sm:$0xff] %v5198_v14 }
 0x197   :  { %v5170_v35 = vpop.permute.xlu0 %656  ;;  %1532 = vrot.lane.b32.xlu1 %v1516_v63, %s4488_s24  ;;  %v2826_v63 = vmul.f32 %v5231_v31, %v5111_v46 }
 0x198   :  { %8536 = vst [vmem:[#allocation41_spill] sm:$0xff] %v5170_v35 }
 0x199   :  { %2898 = vrot.lane.b32.xlu0 %v2878_v9, %s4488_s24  ;;  %v5213_v1 = vpop.permute.xlu1 %594  ;;  %v1588_v9 = vmul.f32 %v5240_v4, %v4655_v36 }
 0x19a   :  { %8541 = vst [vmem:[#allocation46_spill] sm:$0xff] %v5213_v1 }
 0x19b   :  { %v5185_v60 = vpop.permute.xlu0 %608  ;;  %2842 = vrot.lane.b32.xlu1 %v2825_v13, %s4487_s14 }
 0x19c   :  { %8538 = vst [vmem:[#allocation43_spill] sm:$0xff] %v5185_v60 }
 0x19d   :  { %1494 = vrot.lane.b32.xlu0 %v1472_v49, %s4487_s14  ;;  %v5223_v61 = vpop.permute.xlu1 %598 }
 0x19e   :  { %8543 = vst [vmem:[#allocation48_spill] sm:$0xff] %v5223_v61 }
 0x19f   :  { %v5200_v29 = vpop.permute.xlu0 %612  ;;  %2890 = vrot.lane.b32.xlu1 %v2874_v19, %s4488_s24  ;;  %v2875_v19 = vmul.f32 %v5176_v48, %v5158_v53 }
 0x1a0   :  { %8540 = vst [vmem:[#allocation45_spill] sm:$0xff] %v5200_v29 }
 0x1a1   :  { %1542 = vrot.lane.b32.xlu0 %v1521_v3, %s4488_s24  ;;  %v5238_v40 = vpop.permute.xlu1 %602  ;;  %v5261_v3 = vld [vmem:[%s8383_s0 + $0x38] sm:$0xf] }
 0x1a2   :  { %8546 = vst [vmem:[#allocation51_spill] sm:$0xff] %v5238_v40  ;;  %8550 = vst [vmem:[#allocation55_spill] sm:$0xff] %v5261_v3  ;;  %v1473_v36 = vmul.f32 %v5261_v3, %v5099_v30 }
 0x1a3   :  { %v5215_v12 = vpop.permute.xlu0 %616  ;;  %1486 = vrot.lane.b32.xlu1 %v1468_v47, %s4487_s14 }
 0x1a4   :  { %8542 = vst [vmem:[#allocation47_spill] sm:$0xff] %v5215_v12 }
 0x1a5   :  { %2852 = vrot.lane.b32.xlu0 %v2830_v50, %s4487_s14  ;;  %v5250_v58 = vpop.permute.xlu1 %622 }
 0x1a6   :  { %8548 = vst [vmem:[#allocation53_spill] sm:$0xff] %v5250_v58 }
 0x1a7   :  { %v5225_v38 = vpop.permute.xlu0 %636  ;;  %1534 = vrot.lane.b32.xlu1 %v1517_v0, %s4488_s24 }
 0x1a8   :  { %8544 = vst [vmem:[#allocation49_spill] sm:$0xff] %v5225_v38 }
 0x1a9   :  { %2900 = vrot.lane.b32.xlu0 %v2879_v22, %s4488_s24  ;;  %v5265_v13 = vpop.permute.xlu1 %626  ;;  %v2880_v22 = vmul.f32 %v5209_v43, %v5158_v53 }
 0x1aa   :  { %8551 = vst [vmem:[#allocation56_spill] sm:$0xff] %v5265_v13  ;;  %v5574_v13 = vstv %s4340_s22 }
 0x1ab   :  { %v5242_v20 = vpop.permute.xlu0 %640  ;;  %2844 = vrot.lane.b32.xlu1 %v2826_v63, %s4487_s14  ;;  %v5288_v63 = vld [vmem:[%s8383_s0 + $0x21] sm:$0xff]  ;;  %v3117_v28 = vmul.f32 %v5669_v2, %v5574_v13 }
 0x1ac   :  { %8547 = vst [vmem:[#allocation52_spill] sm:$0xff] %v5242_v20 }
 0x1ad   :  { %1544 = vrot.lane.b32.xlu0 %v1522_v56, %s4488_s24  ;;  %v5275_v47 = vpop.permute.xlu1 %630  ;;  %v5277_v56 = vstv %s4336_s2  ;;  %s4317_s2 = sld [smem:[#allocation2 + $0xc]] }
 0x1ae   :  { %8553 = vst [vmem:[#allocation58_spill] sm:$0xff] %v5275_v47 }
 0x1af   :  { %v5252_v49 = vpop.permute.xlu0 %644  ;;  %2892 = vrot.lane.b32.xlu1 %v2875_v19, %s4488_s24  ;;  %v5300_v19 = vld [vmem:[%s8383_s0 + $0x1] sm:$0xff] }
 0x1b0   :  { %8549 = vst [vmem:[#allocation54_spill] sm:$0xff] %v5252_v49 }
 0x1b1   :  { %1608 = vrot.lane.b32.xlu0 %v1588_v9, %s4487_s14  ;;  %v1518_v9 = vmul.f32 %v5231_v31, %v5131_v59  ;;  %v5292_v14 = vpop.permute.xlu1 %650 }
 0x1b2   :  { %8555 = vst [vmem:[#allocation60_spill] sm:$0xff] %v5292_v14 }
 0x1b3   :  { %v5267_v50 = vpop.permute.xlu0 %660  ;;  %1536 = vrot.lane.b32.xlu1 %v1518_v9, %s4488_s24  ;;  %v5314_v9 = vstv %s4319_s7  ;;  %s4339_s7 = sld [smem:[#allocation2 + $0x19]] }
 0x1b4   :  { %8552 = vst [vmem:[#allocation57_spill] sm:$0xff] %v5267_v50  ;;  %v5308_v50 = vld [vmem:[%s8383_s0 + $0x29] sm:$0xff]  ;;  %v1638_v49 = vmul.f32 %v5288_v63, %v5314_v9 }
 0x1b5   :  { %1496 = vrot.lane.b32.xlu0 %v1473_v36, %s4487_s14  ;;  %v2946_v36 = vmul.f32 %v5288_v63, %v5277_v56 }
 0x1b7   :  { %v5279_v0 = vpop.permute.xlu0 %664 }
 0x1b8   :  { %8554 = vst [vmem:[#allocation59_spill] sm:$0xff] %v5279_v0  ;;  %v5312_v0 = vpop.permute.xlu1 %654 }
 0x1b9   :  { %2902 = vrot.lane.b32.xlu0 %v2880_v22, %s4488_s24  ;;  %v1584_v22 = vmul.f32 %v5300_v19, %v5240_v4  ;;  %8557 = vst [vmem:[#allocation62_spill] sm:$0xff] %v5312_v0  ;;  %v5490_v20 = vstv %s4339_s7  ;;  %s4296_s7 = sshll.u32 %s4507_s3, 4  ;;  %s4297_s7 = int_to_ptr.vmem [resolvable:$true] %s4296_s7 }
 0x1ba   :  { %p4462_p11 = scmp.lt.s32.totalorder %s4297_s7, %s4297_s7 }
 0x1bb   :  { %v5294_v6 = vpop.permute.xlu0 %668  ;;  %1600 = vrot.lane.b32.xlu1 %v1584_v22, %s4487_s14  ;;  %v2876_v22 = vmul.f32 %v5231_v31, %v5158_v53 }
 0x1bc   :  { %8556 = vst [vmem:[#allocation61_spill] sm:$0xff] %v5294_v6  ;;  %v1589_v6 = vmul.f32 %v5308_v50, %v5240_v4  ;;  %v5329_v40 = vpop.permute.xlu1 %658 }
 0x1bd   :  { %2966 = vrot.lane.b32.xlu0 %v2946_v36, %s4487_s14  ;;  %v5322_v36 = vld [vmem:[%s8383_s0 + $0x18] sm:$0xf]  ;;  %8560 = vst [vmem:[#allocation65_spill] sm:$0xff] %v5329_v40 }
 0x1be   :  { %8559 = vst [vmem:[#allocation64_spill] sm:$0xff] %v5322_v36  ;;  %v1469_v10 = vmul.f32 %v5322_v36, %v5099_v30 }
 0x1bf   :  { %v5316_v12 = vpop.permute.xlu0 %672 }
 0x1c0   :  { %8558 = vst [vmem:[#allocation63_spill] sm:$0xff] %v5316_v12  ;;  %1488 = vrot.lane.b32.xlu1 %v1469_v10, %s4487_s14  ;;  %v2831_v12 = vmul.f32 %v5261_v3, %v5111_v46  ;;  %v5339_v30 = vpop.permute.xlu1 %662  ;;  %v1523_v10 = vmul.f32 %v5261_v3, %v5131_v59 }
 0x1c1   :  { %1610 = vrot.lane.b32.xlu0 %v1589_v6, %s4487_s14  ;;  %8562 = vst [vmem:[#allocation67_spill] sm:$0xff] %v5339_v30 }
 0x1c3   :  { %v5331_v35 = vpop.permute.xlu0 %676 }
 0x1c4   :  { %8561 = vst [vmem:[#allocation66_spill] sm:$0xff] %v5331_v35  ;;  %2894 = vrot.lane.b32.xlu1 %v2876_v22, %s4488_s24  ;;  %v2942_v35 = vmul.f32 %v5300_v19, %v5277_v56  ;;  %v5349_v40 = vpop.permute.xlu1 %666 }
 0x1c5   :  { %1658 = vrot.lane.b32.xlu0 %v1638_v49, %s4488_s24  ;;  %8564 = vst [vmem:[#allocation69_spill] sm:$0xff] %v5349_v40  ;;  %v5366_v40 = vstv %s4337_s21 }
 0x1c6   :  { %v2996_v16 = vmul.f32 %v5288_v63, %v5366_v40 }
 0x1c7   :  { %v5341_v6 = vpop.permute.xlu0 %680 }
 0x1c8   :  { %8563 = vst [vmem:[#allocation68_spill] sm:$0xff] %v5341_v6  ;;  %2958 = vrot.lane.b32.xlu1 %v2942_v35, %s4487_s14  ;;  %v5357_v6 = vld [vmem:[%s8383_s0 + $0x9] sm:$0xff]  ;;  %v5364_v30 = vpop.permute.xlu1 %670  ;;  %v1634_v35 = vmul.f32 %v5300_v19, %v5314_v9 }
 0x1c9   :  { %2854 = vrot.lane.b32.xlu0 %v2831_v12, %s4487_s14  ;;  %v1585_v22 = vmul.f32 %v5357_v6, %v5240_v4  ;;  %v2947_v12 = vmul.f32 %v5308_v50, %v5277_v56  ;;  %8566 = vst [vmem:[#allocation71_spill] sm:$0xff] %v5364_v30  ;;  %v2827_v30 = vmul.f32 %v5322_v36, %v5111_v46 }
 0x1ca   :  { %v1639_v46 = vmul.f32 %v5308_v50, %v5314_v9 }
 0x1cb   :  { %v5351_v49 = vpop.permute.xlu0 %684 }
 0x1cc   :  { %8565 = vst [vmem:[#allocation70_spill] sm:$0xff] %v5351_v49  ;;  %1602 = vrot.lane.b32.xlu1 %v1585_v22, %s4487_s14  ;;  %v5387_v22 = vld [vmem:[%s8383_s0 + $0x31] sm:$0xff] }
 0x1cd   :  { %1546 = vrot.lane.b32.xlu0 %v1523_v10, %s4488_s24  ;;  %v5376_v10 = vpop.permute.xlu1 %674 }
 0x1ce   :  { %8568 = vst [vmem:[#allocation73_spill] sm:$0xff] %v5376_v10 }
 0x1cf   :  { %v5368_v49 = vpop.permute.xlu0 %688 }
 0x1d0   :  { %8567 = vst [vmem:[#allocation72_spill] sm:$0xff] %v5368_v49  ;;  %1650 = vrot.lane.b32.xlu1 %v1634_v35, %s4488_s24  ;;  %v1519_v35 = vmul.f32 %v5322_v36, %v5131_v59 }
 0x1d1   :  { %2968 = vrot.lane.b32.xlu0 %v2947_v12, %s4487_s14  ;;  %v1590_v12 = vmul.f32 %v5387_v22, %v5240_v4  ;;  %v5391_v49 = vpop.permute.xlu1 %678 }
 0x1d2   :  { %8570 = vst [vmem:[#allocation75_spill] sm:$0xff] %v5391_v49  ;;  %v2943_v49 = vmul.f32 %v5357_v6, %v5277_v56 }
 0x1d3   :  { %v5378_v47 = vpop.permute.xlu0 %692 }
 0x1d4   :  { %8569 = vst [vmem:[#allocation74_spill] sm:$0xff] %v5378_v47  ;;  %2846 = vrot.lane.b32.xlu1 %v2827_v30, %s4487_s14  ;;  %v2881_v30 = vmul.f32 %v5261_v3, %v5158_v53 }
 0x1d5   :  { %3016 = vrot.lane.b32.xlu0 %v2996_v16, %s4488_s24  ;;  %v5401_v16 = vpop.permute.xlu1 %682 }
 0x1d6   :  { %8572 = vst [vmem:[#allocation77_spill] sm:$0xff] %v5401_v16 }
 0x1d7   :  { %v5393_v10 = vpop.permute.xlu0 %696 }
 0x1d8   :  { %8571 = vst [vmem:[#allocation76_spill] sm:$0xff] %v5393_v10  ;;  %1538 = vrot.lane.b32.xlu1 %v1519_v35, %s4488_s24  ;;  %v2992_v10 = vmul.f32 %v5300_v19, %v5366_v40  ;;  %v2948_v35 = vmul.f32 %v5387_v22, %v5277_v56 }
 0x1d9   :  { %1612 = vrot.lane.b32.xlu0 %v1590_v12, %s4487_s14  ;;  %v5411_v59 = vpop.permute.xlu1 %686 }
 0x1da   :  { %8574 = vst [vmem:[#allocation79_spill] sm:$0xff] %v5411_v59 }
 0x1db   :  { %v5403_v47 = vpop.permute.xlu0 %700 }
 0x1dc   :  { %8573 = vst [vmem:[#allocation78_spill] sm:$0xff] %v5403_v47  ;;  %2960 = vrot.lane.b32.xlu1 %v2943_v49, %s4487_s14 }
 0x1dd   :  { %1660 = vrot.lane.b32.xlu0 %v1639_v46, %s4488_s24  ;;  %v5421_v47 = vpop.permute.xlu1 %690 }
 0x1de   :  { %8576 = vst [vmem:[#allocation81_spill] sm:$0xff] %v5421_v47 }
 0x1df   :  { %v5413_v12 = vpop.permute.xlu0 %704 }
 0x1e0   :  { %8575 = vst [vmem:[#allocation80_spill] sm:$0xff] %v5413_v12  ;;  %3008 = vrot.lane.b32.xlu1 %v2992_v10, %s4488_s24  ;;  %v5429_v12 = vld [vmem:[%s8383_s0 + $0x11] sm:$0xff]  ;;  %v1635_v10 = vmul.f32 %v5357_v6, %v5314_v9 }
 0x1e1   :  { %2904 = vrot.lane.b32.xlu0 %v2881_v30, %s4488_s24  ;;  %8578 = vst [vmem:[#allocation83_spill] sm:$0xff] %v5429_v12  ;;  %v1586_v49 = vmul.f32 %v5429_v12, %v5240_v4  ;;  %v2997_v30 = vmul.f32 %v5308_v50, %v5366_v40  ;;  %v5436_v59 = vpop.permute.xlu1 %694 }
 0x1e2   :  { %8579 = vst [vmem:[#allocation84_spill] sm:$0xff] %v5436_v59 }
 0x1e3   :  { %v5423_v46 = vpop.permute.xlu0 %708 }
 0x1e4   :  { %8577 = vst [vmem:[#allocation82_spill] sm:$0xff] %v5423_v46  ;;  %1604 = vrot.lane.b32.xlu1 %v1586_v49, %s4487_s14  ;;  %v1640_v46 = vmul.f32 %v5387_v22, %v5314_v9  ;;  %v5459_v49 = vld [vmem:[%s8383_s0 + $0x22] sm:$0xff] }
 0x1e5   :  { %2970 = vrot.lane.b32.xlu0 %v2948_v35, %s4487_s14  ;;  %v5446_v16 = vpop.permute.xlu1 %698  ;;  %v5448_v35 = vstv %s4321_s28  ;;  %v3114_v54 = vmul.f32 %v5459_v49, %v5574_v13  ;;  %s4506_s28 = smov 98  }
 0x1e6   :  { %8581 = vst [vmem:[#allocation86_spill] sm:$0xff] %v5446_v16 }
 0x1e7   :  { %v5438_v47 = vpop.permute.xlu0 %712 }
 0x1e8   :  { %8580 = vst [vmem:[#allocation85_spill] sm:$0xff] %v5438_v47  ;;  %1652 = vrot.lane.b32.xlu1 %v1635_v10, %s4488_s24  ;;  %v2877_v47 = vmul.f32 %v5322_v36, %v5158_v53  ;;  %v2944_v53 = vmul.f32 %v5429_v12, %v5277_v56 }
 0x1e9   :  { %3018 = vrot.lane.b32.xlu0 %v2997_v30, %s4488_s24  ;;  %v1706_v30 = vmul.f32 %v5459_v49, %v5448_v35  ;;  %v5463_v16 = vpop.permute.xlu1 %702 }
 0x1ea   :  { %8583 = vst [vmem:[#allocation88_spill] sm:$0xff] %v5463_v16 }
 0x1eb   :  { %v5450_v11 = vpop.permute.xlu0 %716 }
 0x1ec   :  { %8582 = vst [vmem:[#allocation87_spill] sm:$0xff] %v5450_v11  ;;  %2896 = vrot.lane.b32.xlu1 %v2877_v47, %s4488_s24  ;;  %v2993_v47 = vmul.f32 %v5357_v6, %v5366_v40 }
 0x1ed   :  { %1662 = vrot.lane.b32.xlu0 %v1640_v46, %s4488_s24  ;;  %v5474_v46 = vld [vmem:[%s8383_s0 + $0x39] sm:$0xf]  ;;  %v5478_v11 = vpop.permute.xlu1 %706 }
 0x1ee   :  { %8585 = vst [vmem:[#allocation90_spill] sm:$0xff] %v5474_v46  ;;  %v1591_v10 = vmul.f32 %v5474_v46, %v5240_v4  ;;  %8586 = vst [vmem:[#allocation91_spill] sm:$0xff] %v5478_v11  ;;  %v2949_v0 = vmul.f32 %v5474_v46, %v5277_v56 }
 0x1ef   :  { %v5465_v59 = vpop.permute.xlu0 %720 }
 0x1f0   :  { %8584 = vst [vmem:[#allocation89_spill] sm:$0xff] %v5465_v59  ;;  %2962 = vrot.lane.b32.xlu1 %v2944_v53, %s4487_s14  ;;  %v1636_v53 = vmul.f32 %v5429_v12, %v5314_v9 }
 0x1f1   :  { %1726 = vrot.lane.b32.xlu0 %v1706_v30, %s4487_s14  ;;  %v2998_v30 = vmul.f32 %v5387_v22, %v5366_v40  ;;  %v5488_v59 = vpop.permute.xlu1 %710 }
 0x1f2   :  { %8588 = vst [vmem:[#allocation93_spill] sm:$0xff] %v5488_v59  ;;  %v5508_v59 = vld [vmem:[%s8383_s0 + $0x2] sm:$0xff] }
 0x1f3   :  { %v5480_v16 = vpop.permute.xlu0 %724 }
 0x1f4   :  { %8587 = vst [vmem:[#allocation92_spill] sm:$0xff] %v5480_v16  ;;  %3010 = vrot.lane.b32.xlu1 %v2993_v47, %s4488_s24  ;;  %v1702_v47 = vmul.f32 %v5508_v59, %v5448_v35 }
 0x1f5   :  { %1614 = vrot.lane.b32.xlu0 %v1591_v10, %s4487_s14  ;;  %v3064_v10 = vmul.f32 %v5459_v49, %v5490_v20  ;;  %v5500_v16 = vpop.permute.xlu1 %714 }
 0x1f6   :  { %8589 = vst [vmem:[#allocation94_spill] sm:$0xff] %v5500_v16 }
 0x1f7   :  { %v5492_v42 = vpop.permute.xlu0 %1490 }
 0x1f8   :  { %1654 = vrot.lane.b32.xlu1 %v1636_v53, %s4488_s24  ;;  %v5522_v53 = vstv %s4322_s15 }
 0x1f9   :  { %3020 = vrot.lane.b32.xlu0 %v2998_v30, %s4488_s24  ;;  %v5516_v30 = vld [vmem:[%s8383_s0 + $0x2a] sm:$0xff]  ;;  %v5520_v61 = vpop.permute.xlu1 %718  ;;  %v1756_v37 = vmul.f32 %v5459_v49, %v5522_v53 }
 0x1fa   :  { %v1707_v16 = vmul.f32 %v5516_v30, %v5448_v35  ;;  %8590 = vst [vmem:[#allocation95_spill] sm:$0xff] %v5520_v61 }
 0x1fb   :  { %v5502_v11 = vpop.permute.xlu0 %2848 }
 0x1fc   :  { %1718 = vrot.lane.b32.xlu1 %v1702_v47, %s4487_s14  ;;  %v2994_v47 = vmul.f32 %v5429_v12, %v5366_v40 }
 0x1fd   :  { %3084 = vrot.lane.b32.xlu0 %v3064_v10, %s4487_s14  ;;  %v5530_v10 = vld [vmem:[%s8383_s0 + $0x19] sm:$0xf]  ;;  %v5537_v61 = vpop.permute.xlu1 %722 }
 0x1fe   :  { %8591 = vst [vmem:[#allocation96_spill] sm:$0xff] %v5530_v10  ;;  %v1587_v27 = vmul.f32 %v5530_v10, %v5240_v4  ;;  %8592 = vst [vmem:[#allocation97_spill] sm:$0xff] %v5537_v61  ;;  %v3060_v61 = vmul.f32 %v5508_v59, %v5490_v20  ;;  %v2945_v38 = vmul.f32 %v5530_v10, %v5277_v56 }
 0x1ff   :  { %v5524_v29 = vpop.permute.xlu0 %1492  ;;  %v1637_v56 = vmul.f32 %v5530_v10, %v5314_v9 }
 0x200   :  { %1606 = vrot.lane.b32.xlu1 %v1587_v27, %s4487_s14  ;;  %v1641_v27 = vmul.f32 %v5474_v46, %v5314_v9  ;;  %v2999_v9 = vmul.f32 %v5474_v46, %v5366_v40 }
 0x201   :  { %1728 = vrot.lane.b32.xlu0 %v1707_v16, %s4487_s14  ;;  %v5547_v4 = vpop.permute.xlu1 %1482 }
 0x203   :  { %v5539_v15 = vpop.permute.xlu0 %1540 }
 0x204   :  { %3012 = vrot.lane.b32.xlu1 %v2994_v47, %s4488_s24  ;;  %v1703_v47 = vmul.f32 %v5565_v44, %v5448_v35 }
 0x205   :  { %1776 = vrot.lane.b32.xlu0 %v1756_v37, %s4488_s24  ;;  %v5557_v62 = vpop.permute.xlu1 %2840 }
 0x207   :  { %v5549_v16 = vpop.permute.xlu0 %2850 }
 0x208   :  { %3076 = vrot.lane.b32.xlu1 %v3060_v61, %s4487_s14  ;;  %v1752_v61 = vmul.f32 %v5508_v59, %v5522_v53 }
 0x209   :  { %2972 = vrot.lane.b32.xlu0 %v2949_v0, %s4487_s14  ;;  %v3065_v0 = vmul.f32 %v5516_v30, %v5490_v20  ;;  %v5572_v41 = vpop.permute.xlu1 %1484 }
 0x20b   :  { %v5559_v37 = vpop.permute.xlu0 %2898 }
 0x20c   :  { %1720 = vrot.lane.b32.xlu1 %v1703_v47, %s4487_s14  ;;  %v5593_v47 = vld [vmem:[%s8383_s0 + $0x32] sm:$0xff] }
 0x20d   :  { %1664 = vrot.lane.b32.xlu0 %v1641_v27, %s4488_s24  ;;  %v5582_v27 = vpop.permute.xlu1 %1532  ;;  %8593 = vst [vmem:[#allocation98_spill] sm:$0xff] %v5593_v47 }
 0x20f   :  { %v1495_v39 = vpop.permute.xlu0 %1494 }
 0x210   :  { %1768 = vrot.lane.b32.xlu1 %v1752_v61, %s4488_s24  ;;  %v5604_v61 = vstv %s4314_s26 }
 0x211   :  { %3086 = vrot.lane.b32.xlu0 %v3065_v0, %s4487_s14  ;;  %v1708_v0 = vmul.f32 %v5593_v47, %v5448_v35  ;;  %v5597_v21 = vpop.permute.xlu1 %2842  ;;  %v1454_v60 = vmul.f32 %v5209_v43, %v5604_v61 }
 0x213   :  { %v5584_v33 = vpop.permute.xlu0 %1542  ;;  %v1512_v14 = vadd.f32 %v1495_v39, %v1454_v60  ;;  %v5641_v60 = vld [vmem:[%s8383_s0 + $0x12] sm:$0xff] }
 0x214   :  { %2964 = vrot.lane.b32.xlu1 %v2945_v38, %s4487_s14  ;;  %v3061_v38 = vmul.f32 %v5565_v44, %v5490_v20  ;;  %8595 = vst [vmem:[#allocation100_spill] sm:$0xff] %v5641_v60 }
 0x215   :  { %3134 = vrot.lane.b32.xlu0 %v3114_v54, %s4488_s24  ;;  %v1757_v54 = vmul.f32 %v5516_v30, %v5522_v53  ;;  %v5611_v1 = vpop.permute.xlu1 %2890 }
 0x217   :  { %v5599_v18 = vpop.permute.xlu0 %2852 }
 0x218   :  { %1656 = vrot.lane.b32.xlu1 %v1637_v56, %s4488_s24  ;;  %v3110_v56 = vmul.f32 %v5508_v59, %v5574_v13 }
 0x219   :  { %1730 = vrot.lane.b32.xlu0 %v1708_v0, %s4487_s14  ;;  %v5621_v0 = vstv %s4317_s2  ;;  %v1487_v58 = vpop.permute.xlu1 %1486 }
 0x21a   :  { %v1572_v17 = vmul.f32 %v5387_v22, %v5621_v0  ;;  %v1568_v5 = vmul.f32 %v5429_v12, %v5621_v0 }
 0x21b   :  { %v5613_v32 = vpop.permute.xlu0 %2900 }
 0x21c   :  { %3078 = vrot.lane.b32.xlu1 %v3061_v38, %s4487_s14 }
 0x21d   :  { %1778 = vrot.lane.b32.xlu0 %v1757_v54, %s4488_s24  ;;  %v3066_v54 = vmul.f32 %v5593_v47, %v5490_v20  ;;  %v5631_v7 = vpop.permute.xlu1 %1534 }
 0x21f   :  { %v1545_v55 = vpop.permute.xlu0 %1544 }
 0x220   :  { %v1562_v24 = vadd.f32 %v1545_v55, %v1512_v14  ;;  %3126 = vrot.lane.b32.xlu1 %v3110_v56, %s4488_s24  ;;  %v1704_v55 = vmul.f32 %v5641_v60, %v5448_v35  ;;  %v3115_v14 = vmul.f32 %v5516_v30, %v5574_v13  ;;  %v1758_v56 = vmul.f32 %v5593_v47, %v5522_v53 }
 0x221   :  { %3022 = vrot.lane.b32.xlu0 %v2999_v9, %s4488_s24  ;;  %v5648_v38 = vpop.permute.xlu1 %2844  ;;  %v1450_v9 = vmul.f32 %v5231_v31, %v5604_v61  ;;  %v5819_v31 = vstv %s4335_s19 }
 0x222   :  { %v5633_v51 = vadd.f32 %v1572_v17, %v1562_v24  ;;  %8596 = vst [vmem:[#allocation101_spill] sm:$0xff] %v5648_v38  ;;  %v1753_v24 = vmul.f32 %v5565_v44, %v5522_v53 }
 0x223   :  { %v5635_v39 = vpop.permute.xlu0 %1608  ;;  %v1508_v25 = vadd.f32 %v1487_v58, %v1450_v9  ;;  %v3116_v58 = vmul.f32 %v5593_v47, %v5574_v13 }
 0x224   :  { %8594 = vst [vmem:[#allocation99_spill] sm:$0xff] %v5633_v51  ;;  %1722 = vrot.lane.b32.xlu1 %v1704_v55, %s4487_s14  ;;  %v2995_v55 = vmul.f32 %v5530_v10, %v5366_v40  ;;  %v3062_v40 = vmul.f32 %v5641_v60, %v5490_v20 }
 0x225   :  { %3088 = vrot.lane.b32.xlu0 %v3066_v54, %s4487_s14  ;;  %v5658_v54 = vpop.permute.xlu1 %2892 }
 0x227   :  { %v1497_v17 = vpop.permute.xlu0 %1496 }
 0x228   :  { %1770 = vrot.lane.b32.xlu1 %v1753_v24, %s4488_s24 }
 0x229   :  { %3136 = vrot.lane.b32.xlu0 %v3115_v14, %s4488_s24  ;;  %v1709_v14 = vmul.f32 %v5669_v2, %v5448_v35  ;;  %v1537_v45 = vpop.permute.xlu1 %1536 }
 0x22a   :  { %v1558_v34 = vadd.f32 %v1537_v45, %v1508_v25  ;;  %v3111_v45 = vmul.f32 %v5565_v44, %v5574_v13  ;;  %v3067_v25 = vmul.f32 %v5669_v2, %v5490_v20 }
 0x22b   :  { %v5660_v57 = vpop.permute.xlu0 %2902 }
 0x22c   :  { %3014 = vrot.lane.b32.xlu1 %v2995_v55, %s4488_s24  ;;  %v5683_v9 = vadd.f32 %v1568_v5, %v1558_v34  ;;  %v1754_v34 = vmul.f32 %v5641_v60, %v5522_v53  ;;  %v1759_v5 = vmul.f32 %v5669_v2, %v5522_v53 }
 0x22d   :  { %1780 = vrot.lane.b32.xlu0 %v1758_v56, %s4488_s24  ;;  %v5685_v56 = vpop.permute.xlu1 %1600 }
 0x22e   :  { %8598 = vst [vmem:[#allocation103_spill] sm:$0xff] %v5683_v9 }
 0x22f   :  { %v5675_v24 = vpop.permute.xlu0 %2966 }
 0x230   :  { %3080 = vrot.lane.b32.xlu1 %v3062_v40, %s4487_s14  ;;  %v1455_v40 = vmul.f32 %v5261_v3, %v5604_v61  ;;  %v3112_v3 = vmul.f32 %v5641_v60, %v5574_v13 }
 0x231   :  { %1732 = vrot.lane.b32.xlu0 %v1709_v14, %s4487_s14 }
 0x232   :  { %v1489_v55 = vpop.permute.xlu1 %1488  ;;  %v1513_v9 = vadd.f32 %v1497_v17, %v1455_v40 }
 0x233   :  { %v5687_v52 = vpop.permute.xlu0 %1610 }
 0x234   :  { %3128 = vrot.lane.b32.xlu1 %v3111_v45, %s4488_s24  ;;  %v5713_v45 = vld [vmem:[%s8383_s0 + $0x1a] sm:$0xf] }
 0x235   :  { %3138 = vrot.lane.b32.xlu0 %v3116_v58, %s4488_s24  ;;  %8601 = vst [vmem:[#allocation106_spill] sm:$0xff] %v5713_v45  ;;  %v3063_v17 = vmul.f32 %v5713_v45, %v5490_v20  ;;  %v3113_v20 = vmul.f32 %v5713_v45, %v5574_v13 }
 0x236   :  { %v5705_v58 = vpop.permute.xlu1 %2894 }
 0x237   :  { %v5695_v14 = vpop.permute.xlu0 %1658  ;;  %8599 = vst [vmem:[#allocation104_spill] sm:$0xff] %v5705_v58 }
 0x238   :  { %1772 = vrot.lane.b32.xlu1 %v1754_v34, %s4488_s24 }
 0x239   :  { %3090 = vrot.lane.b32.xlu0 %v3067_v25, %s4487_s14  ;;  %v1705_v25 = vmul.f32 %v5713_v45, %v5448_v35 }
 0x23a   :  { %v5720_v51 = vpop.permute.xlu1 %2958 }
 0x23b   :  { %v5707_v26 = vpop.permute.xlu0 %2854 }
 0x23c   :  { %8600 = vst [vmem:[#allocation105_spill] sm:$0xff] %v5707_v26  ;;  %v1573_v26 = vmul.f32 %v5474_v46, %v5621_v0  ;;  %1724 = vrot.lane.b32.xlu1 %v1705_v25, %s4487_s14 }
 0x23d   :  { %1782 = vrot.lane.b32.xlu0 %v1759_v5, %s4488_s24 }
 0x23e   :  { %v5728_v35 = vpop.permute.xlu1 %1602 }
 0x23f   :  { %v1547_v34 = vpop.permute.xlu0 %1546 }
 0x240   :  { %v1563_v12 = vadd.f32 %v1547_v34, %v1513_v9  ;;  %3130 = vrot.lane.b32.xlu1 %v3112_v3, %s4488_s24  ;;  %v1569_v34 = vmul.f32 %v5530_v10, %v5621_v0 }
 0x241   :  { %3140 = vrot.lane.b32.xlu0 %v3117_v28, %s4488_s24  ;;  %v1755_v28 = vmul.f32 %v5713_v45, %v5522_v53 }
 0x242   :  { %v5730_v5 = vadd.f32 %v1573_v26, %v1563_v12  ;;  %v5737_v40 = vpop.permute.xlu1 %1650  ;;  %v1451_v26 = vmul.f32 %v5322_v36, %v5604_v61 }
 0x243   :  { %v5732_v2 = vpop.permute.xlu0 %2968 }
 0x244   :  { %8602 = vst [vmem:[#allocation107_spill] sm:$0xff] %v5730_v5  ;;  %3082 = vrot.lane.b32.xlu1 %v3063_v17, %s4487_s14  ;;  %v1509_v3 = vadd.f32 %v1489_v55, %v1451_v26 }
 0x246   :  { %v5746_v12 = vpop.permute.xlu1 %2846 }
 0x247   :  { %v5739_v25 = vpop.permute.xlu0 %3016  ;;  %8603 = vst [vmem:[#allocation108_spill] sm:$0xff] %v5746_v12 }
 0x248   :  { %1774 = vrot.lane.b32.xlu1 %v1755_v28, %s4488_s24 }
 0x24a   :  { %v1539_v17 = vpop.permute.xlu1 %1538 }
 0x24b   :  { %v5748_v9 = vpop.permute.xlu0 %1612  ;;  %v1559_v5 = vadd.f32 %v1539_v17, %v1509_v3 }
 0x24c   :  { %8604 = vst [vmem:[#allocation109_spill] sm:$0xff] %v5748_v9  ;;  %3132 = vrot.lane.b32.xlu1 %v3113_v20, %s4488_s24 }
 0x24d   :  { %v5758_v53 = vadd.f32 %v1569_v34, %v1559_v5  ;;  %v4430_v5 = vld [vmem:[%s8383_s0 + $0x20] sm:$0xff] }
 0x24e   :  { %v5760_v12 = vpop.permute.xlu1 %2960  ;;  %v1452_v20 = vmul.f32 %v4430_v5, %v5604_v61 }
 0x24f   :  { %v5755_v46 = vpop.permute.xlu0 %1660  ;;  %8605 = vst [vmem:[#allocation110_spill] sm:$0xff] %v5758_v53  ;;  %8606 = vst [vmem:[#allocation111_spill] sm:$0xff] %v5760_v12 }
 0x250   :  { %v1510_v53 = vadd.f32 %v5492_v42, %v1452_v20 }
 0x252   :  { %v5764_v28 = vpop.permute.xlu1 %3008  ;;  %v1560_v10 = vadd.f32 %v5539_v15, %v1510_v53 }
 0x253   :  { %v5762_v9 = vpop.permute.xlu0 %2904 }
 0x254   :  { %8607 = vst [vmem:[#allocation112_spill] sm:$0xff] %v5762_v9 }
 0x256   :  { %v5768_v13 = vpop.permute.xlu1 %1604 }
 0x257   :  { %v5766_v36 = vpop.permute.xlu0 %2970  ;;  %8609 = vst [vmem:[#allocation114_spill] sm:$0xff] %v5768_v13 }
 0x258   :  { %8608 = vst [vmem:[#allocation113_spill] sm:$0xff] %v5766_v36 }
 0x25a   :  { %v5772_v26 = vpop.permute.xlu1 %1652 }
 0x25b   :  { %v5770_v55 = vpop.permute.xlu0 %3018 }
 0x25e   :  { %v5780_v34 = vpop.permute.xlu1 %2896 }
 0x25f   :  { %v5774_v3 = vpop.permute.xlu0 %1662  ;;  %8611 = vst [vmem:[#allocation116_spill] sm:$0xff] %v5780_v34  ;;  %v5794_v34 = vstv %s4320_s16 }
 0x260   :  { %8610 = vst [vmem:[#allocation115_spill] sm:$0xff] %v5774_v3  ;;  %v1570_v3 = vmul.f32 %v5288_v63, %v5621_v0  ;;  %v1688_v53 = vmul.f32 %v5459_v49, %v5794_v34 }
 0x262   :  { %v5783_v45 = vpop.permute.xlu1 %2962  ;;  %v1578_v58 = vadd.f32 %v1570_v3, %v1560_v10 }
 0x263   :  { %v1727_v17 = vpop.permute.xlu0 %1726  ;;  %8612 = vst [vmem:[#allocation117_spill] sm:$0xff] %v5783_v45 }
 0x264   :  { %v1628_v47 = vadd.f32 %v5635_v39, %v1578_v58 }
 0x266   :  { %v5790_v9 = vpop.permute.xlu1 %3010  ;;  %v1678_v15 = vadd.f32 %v5695_v14, %v1628_v47  ;;  %v1566_v14 = vmul.f32 %v5300_v19, %v5621_v0 }
 0x267   :  { %v5785_v13 = vpop.permute.xlu0 %1614  ;;  %8614 = vst [vmem:[#allocation119_spill] sm:$0xff] %v5790_v9  ;;  %v5817_v9 = vstv %s4323_s18 }
 0x268   :  { %8613 = vst [vmem:[#allocation118_spill] sm:$0xff] %v5785_v13  ;;  %v1448_v13 = vmul.f32 %v5149_v8, %v5604_v61  ;;  %v1696_v45 = vadd.f32 %v1688_v53, %v1678_v15 }
 0x26a   :  { %v5797_v42 = vpop.permute.xlu1 %1654  ;;  %v1506_v39 = vadd.f32 %v5547_v4, %v1448_v13  ;;  %v1453_v4 = vmul.f32 %v5194_v23, %v5604_v61 }
 0x26b   :  { %v5792_v60 = vpop.permute.xlu0 %3020  ;;  %8616 = vst [vmem:[#allocation121_spill] sm:$0xff] %v5797_v42  ;;  %v1746_v42 = vadd.f32 %v1727_v17, %v1696_v45 }
 0x26c   :  { %8615 = vst [vmem:[#allocation120_spill] sm:$0xff] %v5792_v60  ;;  %v5808_v60 = vstv %s4332_s17  ;;  %v1556_v47 = vadd.f32 %v5582_v27, %v1506_v39  ;;  %v1511_v39 = vadd.f32 %v5524_v29, %v1453_v4 }
 0x26d   :  { %v2810_v58 = vmul.f32 %v4430_v5, %v5808_v60  ;;  %v4328_v5 = vld [vmem:[%s8384_s1 + $0x60] sm:$0xff] }
 0x26e   :  { %v1719_v10 = vpop.permute.xlu1 %1718  ;;  %v1574_v27 = vadd.f32 %v1566_v14, %v1556_v47  ;;  %v1684_v14 = vmul.f32 %v5508_v59, %v5794_v34 }
 0x26f   :  { %v5799_v20 = vpop.permute.xlu0 %3084  ;;  %v2868_v15 = vadd.f32 %v5502_v11, %v2810_v58 }
 0x270   :  { %v1624_v53 = vadd.f32 %v5685_v56, %v1574_v27  ;;  %v5851_v56 = vstv %s4338_s20 }
 0x272   :  { %v5812_v38 = vpop.permute.xlu1 %1606  ;;  %v1674_v47 = vadd.f32 %v5737_v40, %v1624_v53  ;;  %v2806_v53 = vmul.f32 %v5149_v8, %v5808_v60 }
 0x273   :  { %v5806_v3 = vpop.permute.xlu0 %1728  ;;  %8617 = vst [vmem:[#allocation122_spill] sm:$0xff] %v5812_v38 }
 0x274   :  { %v1692_v27 = vadd.f32 %v1684_v14, %v1674_v47  ;;  %v2864_v8 = vadd.f32 %v5557_v62, %v2806_v53  ;;  %v2924_v62 = vmul.f32 %v5300_v19, %v5819_v31 }
 0x276   :  { %v5824_v45 = vpop.permute.xlu1 %3012 }
 0x277   :  { %v1777_v36 = vpop.permute.xlu0 %1776 }
 0x278   :  { %v1796_v12 = vadd.f32 %v1777_v36, %v1746_v42  ;;  %v2918_v36 = vadd.f32 %v5559_v37, %v2868_v15  ;;  %v2928_v42 = vmul.f32 %v5288_v63, %v5819_v31  ;;  %v1561_v37 = vadd.f32 %v5584_v33, %v1511_v39 }
 0x279   :  { %v1571_v63 = vmul.f32 %v5308_v50, %v5621_v0  ;;  %v1742_v39 = vadd.f32 %v1719_v10, %v1692_v27  ;;  %v1449_v10 = vmul.f32 %v5176_v48, %v5604_v61 }
 0x27a   :  { %v1806_v13 = vadd.f32 %v5817_v9, %v1796_v12  ;;  %v5837_v58 = vpop.permute.xlu1 %3076  ;;  %v2936_v15 = vadd.f32 %v2928_v42, %v2918_v36  ;;  %v3046_v42 = vmul.f32 %v5459_v49, %v5851_v56  ;;  %v1689_v49 = vmul.f32 %v5516_v30, %v5794_v34 }
 0x27b   :  { %v5830_v17 = vpop.permute.xlu0 %2972  ;;  %v1579_v33 = vadd.f32 %v1571_v63, %v1561_v37  ;;  %v1507_v53 = vadd.f32 %v5572_v41, %v1449_v10 }
 0x27c   :  { %v1814_v11 = vmax.f32 %v1806_v13, 0.0  ;;  %v2986_v4 = vadd.f32 %v5675_v24, %v2936_v15  ;;  %v2811_v24 = vmul.f32 %v5194_v23, %v5808_v60 }
 0x27d   :  { %v1629_v47 = vadd.f32 %v5687_v52, %v1579_v33 }
 0x27e   :  { %v5839_v12 = vmul.f32 %v4328_v5, %v1814_v11  ;;  %v5855_v13 = vpop.permute.xlu1 %1720  ;;  %v3036_v36 = vadd.f32 %v5739_v25, %v2986_v4  ;;  %v2869_v52 = vadd.f32 %v5549_v16, %v2811_v24  ;;  %v2929_v16 = vmul.f32 %v5308_v50, %v5819_v31 }
 0x27f   :  { %v5844_v38 = vpop.permute.xlu0 %1664  ;;  %v1679_v25 = vadd.f32 %v5755_v46, %v1629_v47  ;;  %v4324_v46 = vld [vmem:[%s8384_s1 + $0x40] sm:$0xff]  ;;  %v1567_v50 = vmul.f32 %v5357_v6, %v5621_v0 }
 0x280   :  { %8618 = vst [vmem:[#allocation123_spill] sm:$0xff] %v5844_v38  ;;  %v1844_v29 = vcombine.high %v5839_v12, %v5839_v12  ;;  %v3054_v63 = vadd.f32 %v3046_v42, %v3036_v36  ;;  %v2919_v36 = vadd.f32 %v5613_v32, %v2869_v52  ;;  %v3047_v52 = vmul.f32 %v5516_v30, %v5851_v56 }
 0x281   :  { %v2807_v30 = vmul.f32 %v5176_v48, %v5808_v60 }
 0x282   :  { %v1909_v40 = vsel %vm479_vm0, %v1844_v29, -inf  ;;  %v1769_v14 = vpop.permute.xlu1 %1768 }
 0x283   :  { %v1910_v5 = vrot.slane %v1909_v40, 4  ;;  %v5857_v11 = vpop.permute.xlu0 %3086  ;;  %v1792_v29 = vadd.f32 %v1769_v14, %v1742_v39  ;;  %v1557_v14 = vadd.f32 %v5631_v7, %v1507_v53 }
 0x285   :  { %v1911_v38 = vmax.f32 %v1909_v40, %v1910_v5  ;;  %v1802_v23 = vadd.f32 %v5817_v9, %v1792_v29  ;;  %v3104_v40 = vadd.f32 %v5799_v20, %v3054_v63  ;;  %v2914_v5 = vadd.f32 %v5611_v1, %v2864_v8 }
 0x286   :  { %v5879_v27 = vpop.permute.xlu1 %2964  ;;  %v1697_v20 = vadd.f32 %v1689_v49, %v1679_v25  ;;  %v5894_v1 = vstv %s4341_s23  ;;  %v2937_v29 = vadd.f32 %v2929_v16, %v2919_v36  ;;  %v1575_v10 = vadd.f32 %v1567_v50, %v1557_v14 }
 0x287   :  { %v1912_v15 = vrot.slane %v1911_v38, 2  ;;  %v3135_v37 = vpop.permute.xlu0 %3134  ;;  %v1810_v61 = vmax.f32 %v1802_v23, 0.0  ;;  %v2932_v32 = vadd.f32 %v2924_v62, %v2914_v5  ;;  %v3042_v23 = vmul.f32 %v5508_v59, %v5851_v56  ;;  %v4346_v59 = vld [vmem:[%s8384_s1 + $0xa0] sm:$0xff] }
 0x288   :  { %v3154_v42 = vadd.f32 %v3135_v37, %v3104_v40  ;;  %v1747_v19 = vadd.f32 %v5806_v3, %v1697_v20  ;;  %v2987_v7 = vadd.f32 %v5732_v2, %v2937_v29  ;;  %v1625_v62 = vadd.f32 %v5728_v35, %v1575_v10 }
 0x289   :  { %v1913_v4 = vmax.f32 %v1911_v38, %v1912_v15  ;;  %v5892_v24 = vmul.f32 %v4324_v46, %v1810_v61  ;;  %v2982_v3 = vadd.f32 %v5720_v51, %v2932_v32  ;;  %v4329_v51 = vld [vmem:[%s8384_s1 + $0x68] sm:$0xff]  ;;  %v2812_v16 = vmul.f32 %v5209_v43, %v5808_v60 }
 0x28a   :  { %v5897_v47 = vpop.permute.xlu1 %1656  ;;  %v3164_v37 = vadd.f32 %v5894_v1, %v3154_v42  ;;  %v3037_v40 = vadd.f32 %v5770_v55, %v2987_v7  ;;  %v1675_v55 = vadd.f32 %v5772_v26, %v1625_v62  ;;  %v1685_v35 = vmul.f32 %v5565_v44, %v5794_v34  ;;  %v8620_v62 = vld [vmem:[#allocation111_spill] sm:$0xff] }
 0x28b   :  { %v1914_v33 = vrot.slane %v1913_v4, 1  ;;  %v5884_v38 = vpop.permute.xlu0 %1730  ;;  %v1841_v15 = vcombine.high %v5892_v24, %v5892_v24  ;;  %v2865_v26 = vadd.f32 %v5597_v21, %v2807_v30  ;;  %v2925_v50 = vmul.f32 %v5357_v6, %v5819_v31 }
 0x28c   :  { %v3172_v5 = vmax.f32 %v3164_v37, 0.0  ;;  %v3055_v48 = vadd.f32 %v3047_v52, %v3037_v40  ;;  %v2870_v37 = vadd.f32 %v5599_v18, %v2812_v16  ;;  %v2930_v10 = vmul.f32 %v5387_v22, %v5819_v31 }
 0x28d   :  { %v5890_v39 = vmax.f32 %v1913_v4, %v1914_v33  ;;  %v1860_v63 = vsel %vm479_vm0, %v1841_v15, -inf  ;;  %v3032_v4 = vadd.f32 %v5764_v28, %v2982_v3  ;;  %v2915_v7 = vadd.f32 %v5658_v54, %v2865_v26 }
 0x28e   :  { %v1861_v49 = vrot.slane %v1860_v63, 4  ;;  %v5910_v8 = vpop.permute.xlu1 %3078  ;;  %v2920_v18 = vadd.f32 %v5660_v57, %v2870_v37  ;;  %v3043_v26 = vmul.f32 %v5565_v44, %v5851_v56  ;;  %v8624_v37 = vld [vmem:[#allocation98_spill] sm:$0xff] }
 0x28f   :  { %1981 = vrot.lane.b32.xlu0 %v5890_v39, %s4489_s27  ;;  %v1779_v41 = vpop.permute.xlu0 %1778  ;;  %v3050_v20 = vadd.f32 %v3042_v23, %v3032_v4 }
 0x290   :  { %v1797_v25 = vadd.f32 %v1779_v41, %v1747_v19  ;;  %v1862_v46 = vmax.f32 %v1860_v63, %v1861_v49  ;;  %v5943_v19 = vmul.f32 %v4346_v59, %v3172_v5  ;;  %v3105_v41 = vadd.f32 %v5857_v11, %v3055_v48  ;;  %v8619_v5 = vld [vmem:[#allocation50_spill] sm:$0xff]  ;;  %v8621_v48 = vld [vmem:[#allocation113_spill] sm:$0xff] }
 0x291   :  { %v3100_v43 = vadd.f32 %v5837_v58, %v3050_v20  ;;  %v2938_v30 = vadd.f32 %v2930_v10, %v2920_v18  ;;  %v8627_v18 = vld [vmem:[#allocation83_spill] sm:$0xff] }
 0x292   :  { %v1807_v0 = vadd.f32 %v5817_v9, %v1797_v25  ;;  %v1863_v33 = vrot.slane %v1862_v46, 2  ;;  %v3127_v61 = vpop.permute.xlu1 %3126  ;;  %v1693_v25 = vadd.f32 %v1685_v35, %v1675_v55  ;;  %v3202_v6 = vcombine.high %v5943_v19, %v5943_v19 }
 0x293   :  { %2009 = vrot.lane.b32.xlu0 %v5890_v39, %s4490_s8  ;;  %v5923_v2 = vpop.permute.xlu0 %3022  ;;  %v3150_v3 = vadd.f32 %v3127_v61, %v3100_v43  ;;  %v8622_v43 = vld [vmem:[#allocation119_spill] sm:$0xff]  ;;  %v2926_v10 = vmul.f32 %v8627_v18, %v5819_v31 }
 0x294   :  { %v1815_v28 = vmax.f32 %v1807_v0, 0.0  ;;  %v1864_v53 = vmax.f32 %v1862_v46, %v1863_v33  ;;  %v1743_v11 = vadd.f32 %v5855_v13, %v1693_v25  ;;  %v2933_v13 = vadd.f32 %v2925_v50, %v2915_v7  ;;  %v4325_v33 = vld [vmem:[%s8384_s1 + $0x48] sm:$0xff] }
 0x295   :  { %v3160_v23 = vadd.f32 %v5894_v1, %v3150_v3  ;;  %v3267_v57 = vsel %vm479_vm0, %v3202_v6, -inf  ;;  %v3048_v25 = vmul.f32 %v8624_v37, %v5851_v56 }
 0x296   :  { %v5932_v36 = vmul.f32 %v4329_v51, %v1815_v28  ;;  %v1865_v15 = vrot.slane %v1864_v53, 1  ;;  %v5952_v29 = vpop.permute.xlu1 %1722  ;;  %v2808_v28 = vmul.f32 %v8619_v5, %v5808_v60  ;;  %v2983_v59 = vadd.f32 %v8620_v62, %v2933_v13 }
 0x297   :  { %2037 = vrot.lane.b32.xlu0 %v5890_v39, %s4491_s9  ;;  %v5941_v42 = vpop.permute.xlu0 %3088  ;;  %v3268_v16 = vrot.slane %v3267_v57, 4  ;;  %v3168_v55 = vmax.f32 %v3160_v23, 0.0 }
 0x298   :  { %v1916_v14 = vsel %vm479_vm0, %v5932_v36, -inf  ;;  %v5958_v21 = vmax.f32 %v1864_v53, %v1865_v15  ;;  %v4342_v53 = vld [vmem:[%s8384_s1 + $0x80] sm:$0xff]  ;;  %v8623_v15 = vld [vmem:[#allocation101_spill] sm:$0xff] }
 0x299   :  { %v1917_v32 = vrot.slane %v1916_v14, 4  ;;  %v3269_v6 = vmax.f32 %v3267_v57, %v3268_v16 }
 0x29a   :  { %1967 = vrot.lane.b32.xlu1 %v5958_v21, %s4489_s27  ;;  %v1771_v4 = vpop.permute.xlu1 %1770 }
 0x29b   :  { %v1918_v63 = vmax.f32 %v1916_v14, %v1917_v32  ;;  %2065 = vrot.lane.b32.xlu0 %v5890_v39, %s4492_s10  ;;  %v3137_v58 = vpop.permute.xlu0 %3136  ;;  %v1793_v51 = vadd.f32 %v1771_v4, %v1743_v11  ;;  %v2988_v14 = vadd.f32 %v8621_v48, %v2938_v30  ;;  %v3033_v32 = vadd.f32 %v8622_v43, %v2983_v59  ;;  %v8626_v11 = vld [vmem:[#allocation104_spill] sm:$0xff] }
 0x29c   :  { %v3155_v49 = vadd.f32 %v3137_v58, %v3105_v41  ;;  %v2866_v41 = vadd.f32 %v8623_v15, %v2808_v28  ;;  %v8625_v58 = vld [vmem:[#allocation120_spill] sm:$0xff]  ;;  %v3270_v13 = vrot.slane %v3269_v6, 2 }
 0x29d   :  { %v1919_v0 = vrot.slane %v1918_v63, 2  ;;  %v1803_v46 = vadd.f32 %v5817_v9, %v1793_v51  ;;  %v3038_v7 = vadd.f32 %v8625_v58, %v2988_v14  ;;  %v3051_v23 = vadd.f32 %v3043_v26, %v3033_v32  ;;  %v8631_v58 = vld [vmem:[#allocation64_spill] sm:$0xff] }
 0x29e   :  { %v5969_v54 = vadd.f32 %v5894_v1, %v3155_v49  ;;  %1995 = vrot.lane.b32.xlu1 %v5958_v21, %s4490_s8  ;;  %v5986_v61 = vpop.permute.xlu1 %3014  ;;  %v6007_v49 = vmul.f32 %v4342_v53, %v3168_v55  ;;  %v8629_v55 = vld [vmem:[#allocation117_spill] sm:$0xff]  ;;  %v3271_v48 = vmax.f32 %v3269_v6, %v3270_v13 }
 0x29f   :  { %v1920_v52 = vmax.f32 %v1918_v63, %v1919_v0  ;;  %2121 = vrot.lane.b32.xlu0 %v5890_v39, %s4494_s30  ;;  %v5975_v40 = vpop.permute.xlu0 %1780  ;;  %v1811_v35 = vmax.f32 %v1803_v46, 0.0  ;;  %v2916_v0 = vadd.f32 %v8626_v11, %v2866_v41  ;;  %v3101_v57 = vadd.f32 %v5910_v8, %v3051_v23  ;;  %v8630_v41 = vld [vmem:[#allocation100_spill] sm:$0xff] }
 0x2a0   :  { %v3056_v46 = vadd.f32 %v3048_v25, %v3038_v7  ;;  %v3044_v25 = vmul.f32 %v8630_v41, %v5851_v56  ;;  %v2809_v7 = vmul.f32 %v8631_v58, %v5808_v60 }
 0x2a1   :  { %v1921_v22 = vrot.slane %v1920_v52, 1  ;;  %v1828_v50 = vmul.f32 %v4325_v33, %v1811_v35  ;;  %v2934_v5 = vadd.f32 %v2926_v10, %v2916_v0  ;;  %v8628_v33 = vld [vmem:[#allocation55_spill] sm:$0xff]  ;;  %v8632_v0 = vld [vmem:[#allocation105_spill] sm:$0xff] }
 0x2a2   :  { %2023 = vrot.lane.b32.xlu1 %v5958_v21, %s4491_s9  ;;  %v3081_v3 = vpop.permute.xlu1 %3080  ;;  %v3106_v59 = vadd.f32 %v5941_v42, %v3056_v46  ;;  %v2813_v16 = vmul.f32 %v8628_v33, %v5808_v60  ;;  %v8633_v60 = vld [vmem:[#allocation112_spill] sm:$0xff] }
 0x2a3   :  { %v5988_v20 = vmax.f32 %v1920_v52, %v1921_v22  ;;  %v6004_v63 = vpop.permute.xlu0 %1732  ;;  %v1867_v44 = vsel %vm479_vm0, %v1828_v50, -inf  ;;  %v3199_v22 = vcombine.high %v6007_v49, %v6007_v49  ;;  %v2984_v35 = vadd.f32 %v8629_v55, %v2934_v5 }
 0x2a4   :  { %v1868_v4 = vrot.slane %v1867_v44, 4  ;;  %v1842_v32 = vcombine.high %v1828_v50, %v1828_v50  ;;  %v2871_v18 = vadd.f32 %v8632_v0, %v2813_v16  ;;  %v3272_v50 = vrot.slane %v3271_v48, 1  ;;  %v8637_v16 = vld [vmem:[#allocation96_spill] sm:$0xff] }
 0x2a5   :  { %1983 = vrot.lane.b32.xlu0 %v5988_v20, %s4489_s27  ;;  %v3218_v14 = vsel %vm479_vm0, %v3199_v22, -inf  ;;  %v3034_v15 = vadd.f32 %v5824_v45, %v2984_v35  ;;  %v1845_v45 = vcombine.high %v5932_v36, %v5932_v36  ;;  %v2927_v55 = vmul.f32 %v8637_v16, %v5819_v31 }
 0x2a6   :  { %v1869_v52 = vmax.f32 %v1867_v44, %v1868_v4  ;;  %2051 = vrot.lane.b32.xlu1 %v5958_v21, %s4492_s10  ;;  %v3129_v51 = vpop.permute.xlu1 %3128  ;;  %v3219_v6 = vrot.slane %v3218_v14, 4  ;;  %v1874_v4 = vsel %vm479_vm0, %v1842_v32, -inf  ;;  %v2921_v23 = vadd.f32 %v8633_v60, %v2871_v18  ;;  %v8639_v60 = vld [vmem:[#allocation106_spill] sm:$0xff] }
 0x2a7   :  { %v3139_v62 = vpop.permute.xlu0 %3138  ;;  %v3151_v30 = vadd.f32 %v3129_v51, %v3101_v57  ;;  %v3052_v13 = vadd.f32 %v3044_v25, %v3034_v15  ;;  %v8635_v57 = vld [vmem:[#allocation108_spill] sm:$0xff]  ;;  %v6060_v36 = vmax.f32 %v3271_v48, %v3272_v50  ;;  %v1923_v35 = vsel %vm479_vm0, %v1845_v45, -inf }
 0x2a8   :  { %v1870_v28 = vrot.slane %v1869_v52, 2  ;;  %v3156_v43 = vadd.f32 %v3139_v62, %v3106_v59  ;;  %v2867_v22 = vadd.f32 %v8635_v57, %v2809_v7  ;;  %v3220_v46 = vmax.f32 %v3218_v14, %v3219_v6  ;;  %v8638_v7 = vld [vmem:[#allocation102_spill] sm:$0xff] }
 0x2a9   :  { %2011 = vrot.lane.b32.xlu0 %v5988_v20, %s4490_s8  ;;  %v6032_v42 = vadd.f32 %v5894_v1, %v3151_v30  ;;  %v1875_v62 = vrot.slane %v1874_v4, 4  ;;  %v3102_v59 = vadd.f32 %v3081_v3, %v3052_v13  ;;  %v8636_v30 = vld [vmem:[#allocation116_spill] sm:$0xff]  ;;  %v1924_v3 = vrot.slane %v1923_v35, 4 }
 0x2aa   :  { %v1871_v53 = vmax.f32 %v1869_v52, %v1870_v28  ;;  %2107 = vrot.lane.b32.xlu1 %v5958_v21, %s4494_s30  ;;  %v6028_v8 = vpop.permute.xlu1 %1772  ;;  %v6047_v10 = vadd.f32 %v5894_v1, %v3156_v43  ;;  %v8634_v52 = vld [vmem:[#allocation90_spill] sm:$0xff]  ;;  %v2917_v33 = vadd.f32 %v8636_v30, %v2867_v22  ;;  %v3221_v14 = vrot.slane %v3220_v46, 2 }
 0x2ab   :  { %v2931_v51 = vmul.f32 %v8634_v52, %v5819_v31  ;;  %v3091_v5 = vpop.permute.xlu0 %3090  ;;  %v3049_v6 = vmul.f32 %v8638_v7, %v5851_v56  ;;  %v1925_v18 = vmax.f32 %v1923_v35, %v1924_v3  ;;  %v1902_v30 = vsel %vm479_vm0, %v5839_v12, -inf  ;;  %v4347_v7 = vld [vmem:[%s8384_s1 + $0xa8] sm:$0xff] }
 0x2ac   :  { %v1872_v26 = vrot.slane %v1871_v53, 1  ;;  %v2935_v31 = vadd.f32 %v2927_v55, %v2917_v33  ;;  %v3222_v0 = vmax.f32 %v3220_v46, %v3221_v14  ;;  %v1903_v55 = vrot.slane %v1902_v30, 4 }
 0x2ad   :  { %2039 = vrot.lane.b32.xlu0 %v5988_v20, %s4491_s9  ;;  %v1926_v13 = vrot.slane %v1925_v18, 2 }
 0x2ae   :  { %v6041_v44 = vmax.f32 %v1871_v53, %v1872_v26  ;;  %v6043_v11 = vpop.permute.xlu1 %1724  ;;  %v2939_v53 = vadd.f32 %v2931_v51, %v2921_v23  ;;  %v1876_v26 = vmax.f32 %v1874_v4, %v1875_v62  ;;  %v3045_v23 = vmul.f32 %v8639_v60, %v5851_v56 }
 0x2af   :  { %v6074_v25 = vpop.permute.xlu0 %1782  ;;  %v3223_v52 = vrot.slane %v3222_v0, 1  ;;  %v1904_v12 = vmax.f32 %v1902_v30, %v1903_v55 }
 0x2b0   :  { %1969 = vrot.lane.b32.xlu1 %v6041_v44, %s4489_s27  ;;  %v2989_v32 = vadd.f32 %v5830_v17, %v2939_v53  ;;  %v2985_v17 = vadd.f32 %v5879_v27, %v2935_v31  ;;  %v1877_v50 = vrot.slane %v1876_v26, 2  ;;  %v1853_v27 = vsel %vm479_vm0, %v5892_v24, -inf }
 0x2b1   :  { %2067 = vrot.lane.b32.xlu0 %v5988_v20, %s4492_s10  ;;  %v6099_v62 = vmax.f32 %v3222_v0, %v3223_v52  ;;  %v1927_v24 = vmax.f32 %v1925_v18, %v1926_v13 }
 0x2b2   :  { %v3131_v28 = vpop.permute.xlu1 %3130  ;;  %v3039_v58 = vadd.f32 %v5923_v2, %v2989_v32  ;;  %v3035_v4 = vadd.f32 %v5986_v61, %v2985_v17  ;;  %v1878_v57 = vmax.f32 %v1876_v26, %v1877_v50  ;;  %v8641_v17 = vld [vmem:[#allocation109_spill] sm:$0xff] }
 0x2b3   :  { %v3152_v43 = vadd.f32 %v3131_v28, %v3102_v59  ;;  %v3141_v51 = vpop.permute.xlu0 %3140  ;;  %v1854_v28 = vrot.slane %v1853_v27, 4 }
 0x2b4   :  { %1997 = vrot.lane.b32.xlu1 %v6041_v44, %s4490_s8  ;;  %v3057_v2 = vadd.f32 %v3049_v6, %v3039_v58  ;;  %v3053_v46 = vadd.f32 %v3045_v23, %v3035_v4  ;;  %v1879_v33 = vrot.slane %v1878_v57, 1  ;;  %v3173_v58 = vmax.f32 %v5969_v54, 0.0  ;;  %v8640_v6 = vld [vmem:[#allocation99_spill] sm:$0xff] }
 0x2b5   :  { %2123 = vrot.lane.b32.xlu0 %v5988_v20, %s4494_s30  ;;  %v6072_v15 = vadd.f32 %v5894_v1, %v3152_v43  ;;  %v1855_v35 = vmax.f32 %v1853_v27, %v1854_v28  ;;  %v1928_v43 = vrot.slane %v1927_v24, 1  ;;  %v1630_v0 = vadd.f32 %v8641_v17, %v8640_v6  ;;  %v8642_v4 = vld [vmem:[#allocation115_spill] sm:$0xff]  ;;  %v8645_v28 = vld [vmem:[#allocation121_spill] sm:$0xff] }
 0x2b6   :  { %v3083_v48 = vpop.permute.xlu1 %3082  ;;  %v3107_v22 = vadd.f32 %v3091_v5, %v3057_v2  ;;  %v6113_v14 = vmax.f32 %v1878_v57, %v1879_v33  ;;  %v1690_v54 = vmul.f32 %v8624_v37, %v5794_v34  ;;  %v6144_v23 = vmul.f32 %v4347_v7, %v3173_v58 }
 0x2b7   :  { %v3103_v59 = vadd.f32 %v3083_v48, %v3053_v46  ;;  %v1856_v48 = vrot.slane %v1855_v35, 2  ;;  %v6119_v32 = vmax.f32 %v1927_v24, %v1928_v43  ;;  %v1680_v60 = vadd.f32 %v8642_v4, %v1630_v0  ;;  %v4326_v0 = vld [vmem:[%s8384_s1 + $0x50] sm:$0xff] }
 0x2b8   :  { %2025 = vrot.lane.b32.xlu1 %v6041_v44, %s4491_s9  ;;  %v3157_v56 = vadd.f32 %v3141_v51, %v3107_v22  ;;  %v3274_v51 = vsel %vm479_vm0, %v6144_v23, -inf  ;;  %v3169_v22 = vmax.f32 %v6032_v42, 0.0  ;;  %v1686_v42 = vmul.f32 %v8630_v41, %v5794_v34 }
 0x2b9   :  { %3339 = vrot.lane.b32.xlu0 %v6060_v36, %s4489_s27  ;;  %v1857_v3 = vmax.f32 %v1855_v35, %v1856_v48  ;;  %v1698_v52 = vadd.f32 %v1690_v54, %v1680_v60  ;;  %v3275_v27 = vrot.slane %v3274_v51, 4 }
 0x2ba   :  { %v6084_v45 = vpop.permute.xlu1 %1774  ;;  %v6104_v5 = vadd.f32 %v5894_v1, %v3157_v56  ;;  %v4343_v56 = vld [vmem:[%s8384_s1 + $0x88] sm:$0xff] }
 0x2bb   :  { %v1858_v31 = vrot.slane %v1857_v3, 1  ;;  %v1748_v37 = vadd.f32 %v5884_v38, %v1698_v52  ;;  %v3276_v57 = vmax.f32 %v3274_v51, %v3275_v27  ;;  %v8643_v38 = vld [vmem:[#allocation103_spill] sm:$0xff]  ;;  %v3186_v24 = vmul.f32 %v4343_v56, %v3169_v22 }
 0x2bc   :  { %2053 = vrot.lane.b32.xlu1 %v6041_v44, %s4492_s10 }
 0x2bd   :  { %3367 = vrot.lane.b32.xlu0 %v6060_v36, %s4490_s8  ;;  %v6139_v50 = vmax.f32 %v1857_v3, %v1858_v31  ;;  %v1798_v13 = vadd.f32 %v5975_v40, %v1748_v37  ;;  %v8644_v40 = vld [vmem:[#allocation114_spill] sm:$0xff]  ;;  %v3277_v30 = vrot.slane %v3276_v57, 2  ;;  %v3225_v43 = vsel %vm479_vm0, %v3186_v24, -inf }
 0x2be   :  { %v3133_v61 = vpop.permute.xlu1 %3132  ;;  %v3226_v48 = vrot.slane %v3225_v43, 4 }
 0x2bf   :  { %v3153_v16 = vadd.f32 %v3133_v61, %v3103_v59  ;;  %v1808_v46 = vadd.f32 %v5817_v9, %v1798_v13  ;;  %v1626_v61 = vadd.f32 %v8644_v40, %v8643_v38  ;;  %v3278_v35 = vmax.f32 %v3276_v57, %v3277_v30 }
 0x2c0   :  { %2109 = vrot.lane.b32.xlu1 %v6041_v44, %s4494_s30  ;;  %v3227_v31 = vmax.f32 %v3225_v43, %v3226_v48 }
 0x2c1   :  { %3395 = vrot.lane.b32.xlu0 %v6060_v36, %s4491_s9  ;;  %v6111_v53 = vadd.f32 %v5894_v1, %v3153_v16  ;;  %v1905_v1 = vrot.slane %v1904_v12, 2  ;;  %v1676_v59 = vadd.f32 %v8645_v28, %v1626_v61  ;;  %v1816_v33 = vmax.f32 %v1808_v46, 0.0  ;;  %v4330_v16 = vld [vmem:[%s8384_s1 + $0x70] sm:$0xff] }
 0x2c2   :  { %v3200_v46 = vcombine.high %v3186_v24, %v3186_v24  ;;  %v3203_v61 = vcombine.high %v6144_v23, %v6144_v23 }
 0x2c3   :  { %v1906_v26 = vmax.f32 %v1904_v12, %v1905_v1  ;;  %v1694_v55 = vadd.f32 %v1686_v42, %v1676_v59  ;;  %v6186_v12 = vmul.f32 %v4330_v16, %v1816_v33  ;;  %v3279_v1 = vrot.slane %v3278_v35, 1 }
 0x2c4   :  { %3325 = vrot.lane.b32.xlu1 %v6099_v62, %s4489_s27  ;;  %v3232_v28 = vsel %vm479_vm0, %v3200_v46, -inf  ;;  %v3281_v24 = vsel %vm479_vm0, %v3203_v61, -inf }
 0x2c5   :  { %3423 = vrot.lane.b32.xlu0 %v6060_v36, %s4492_s10  ;;  %v1907_v18 = vrot.slane %v1906_v26, 1  ;;  %v1744_v41 = vadd.f32 %v5952_v29, %v1694_v55  ;;  %v6200_v58 = vmax.f32 %v3278_v35, %v3279_v1  ;;  %v3233_v30 = vrot.slane %v3232_v28, 4 }
 0x2c6   :  { %v3282_v16 = vrot.slane %v3281_v24, 4 }
 0x2c7   :  { %v6150_v2 = vmax.f32 %v1906_v26, %v1907_v18  ;;  %v1794_v3 = vadd.f32 %v6028_v8, %v1744_v41  ;;  %v1930_v26 = vsel %vm479_vm0, %v6186_v12, -inf  ;;  %v3228_v8 = vrot.slane %v3227_v31, 2 }
 0x2c8   :  { %3353 = vrot.lane.b32.xlu1 %v6099_v62, %s4490_s8  ;;  %v1931_v29 = vrot.slane %v1930_v26, 4  ;;  %v3234_v55 = vmax.f32 %v3232_v28, %v3233_v30  ;;  %v3283_v48 = vmax.f32 %v3281_v24, %v3282_v16 }
 0x2c9   :  { %3479 = vrot.lane.b32.xlu0 %v6060_v36, %s4494_s30  ;;  %v1804_v7 = vadd.f32 %v5817_v9, %v1794_v3  ;;  %v3229_v18 = vmax.f32 %v3227_v31, %v3228_v8 }
 0x2ca   :  { %v1932_v6 = vmax.f32 %v1930_v26, %v1931_v29  ;;  %v3235_v1 = vrot.slane %v3234_v55, 2  ;;  %v3211_v29 = vsel %vm479_vm0, %v6007_v49, -inf }
 0x2cb   :  { %v1812_v17 = vmax.f32 %v1804_v7, 0.0  ;;  %v3230_v52 = vrot.slane %v3229_v18, 1  ;;  %v3284_v7 = vrot.slane %v3283_v48, 2 }
 0x2cc   :  { %3381 = vrot.lane.b32.xlu1 %v6099_v62, %s4491_s9  ;;  %v1933_v4 = vrot.slane %v1932_v6, 2  ;;  %v3236_v8 = vmax.f32 %v3234_v55, %v3235_v1 }
 0x2cd   :  { %1971 = vrot.lane.b32.xlu0 %v6113_v14, %s4489_s27  ;;  %v6214_v60 = vmul.f32 %v4326_v0, %v1812_v17  ;;  %v6230_v13 = vmax.f32 %v3229_v18, %v3230_v52  ;;  %v3212_v0 = vrot.slane %v3211_v29, 4  ;;  %v3260_v18 = vsel %vm479_vm0, %v5943_v19, -inf }
 0x2ce   :  { %v1934_v51 = vmax.f32 %v1932_v6, %v1933_v4  ;;  %v3285_v4 = vmax.f32 %v3283_v48, %v3284_v7  ;;  %v3237_v52 = vrot.slane %v3236_v8, 1  ;;  %v3261_v49 = vrot.slane %v3260_v18, 4 }
 0x2cf   :  { %v1881_v37 = vsel %vm479_vm0, %v6214_v60, -inf }
 0x2d0   :  { %3409 = vrot.lane.b32.xlu1 %v6099_v62, %s4492_s10  ;;  %v1882_v57 = vrot.slane %v1881_v37, 4  ;;  %v1935_v22 = vrot.slane %v1934_v51, 1  ;;  %v6294_v46 = vmax.f32 %v3236_v8, %v3237_v52  ;;  %v3262_v19 = vmax.f32 %v3260_v18, %v3261_v49 }
 0x2d1   :  { %1985 = vrot.lane.b32.xlu0 %v6119_v32, %s4489_s27 }
 0x2d2   :  { %v1883_v38 = vmax.f32 %v1881_v37, %v1882_v57  ;;  %v6238_v40 = vmax.f32 %v1934_v51, %v1935_v22  ;;  %v3213_v37 = vmax.f32 %v3211_v29, %v3212_v0  ;;  %v3286_v22 = vrot.slane %v3285_v4, 1 }
 0x2d3   :  { %v3263_v24 = vrot.slane %v3262_v19, 2 }
 0x2d4   :  { %3465 = vrot.lane.b32.xlu1 %v6099_v62, %s4494_s30  ;;  %v1884_v42 = vrot.slane %v1883_v38, 2  ;;  %v3214_v61 = vrot.slane %v3213_v37, 2 }
 0x2d5   :  { %1999 = vrot.lane.b32.xlu0 %v6113_v14, %s4490_s8 }
 0x2d6   :  { %v1885_v23 = vmax.f32 %v1883_v38, %v1884_v42  ;;  %v6304_v42 = vmax.f32 %v3285_v4, %v3286_v22  ;;  %v1846_v4 = vcombine.high %v6186_v12, %v6186_v12 }
 0x2d8   :  { %1965 = vrot.lane.b32.xlu1 %v6139_v50, %s4489_s27  ;;  %v1886_v41 = vrot.slane %v1885_v23, 1  ;;  %v1937_v22 = vsel %vm479_vm0, %v1846_v4, -inf  ;;  %v1843_v4 = vcombine.high %v6214_v60, %v6214_v60 }
 0x2d9   :  { %2013 = vrot.lane.b32.xlu0 %v6119_v32, %s4490_s8 }
 0x2da   :  { %v6272_v31 = vmax.f32 %v1885_v23, %v1886_v41  ;;  %v3215_v23 = vmax.f32 %v3213_v37, %v3214_v61  ;;  %v3264_v41 = vmax.f32 %v3262_v19, %v3263_v24  ;;  %v1938_v19 = vrot.slane %v1937_v22, 4 }
 0x2dc   :  { %1979 = vrot.lane.b32.xlu1 %v6150_v2, %s4489_s27  ;;  %v3216_v48 = vrot.slane %v3215_v23, 1  ;;  %v3265_v7 = vrot.slane %v3264_v41, 1 }
 0x2dd   :  { %2027 = vrot.lane.b32.xlu0 %v6113_v14, %s4491_s9 }
 0x2de   :  { %v6328_v8 = vmax.f32 %v3215_v23, %v3216_v48  ;;  %v6340_v52 = vmax.f32 %v3264_v41, %v3265_v7  ;;  %v1939_v23 = vmax.f32 %v1937_v22, %v1938_v19 }
 0x2e0   :  { %1993 = vrot.lane.b32.xlu1 %v6139_v50, %s4490_s8  ;;  %v1940_v7 = vrot.slane %v1939_v23, 2 }
 0x2e1   :  { %2041 = vrot.lane.b32.xlu0 %v6119_v32, %s4491_s9 }
 0x2e2   :  { %v1941_v19 = vmax.f32 %v1939_v23, %v1940_v7  ;;  %v4348_v23 = vld [vmem:[%s8384_s1 + $0xb0] sm:$0xff] }
 0x2e4   :  { %2007 = vrot.lane.b32.xlu1 %v6150_v2, %s4490_s8 }
 0x2e5   :  { %2055 = vrot.lane.b32.xlu0 %v6113_v14, %s4492_s10 }
 0x2e8   :  { %2021 = vrot.lane.b32.xlu1 %v6139_v50, %s4491_s9 }
 0x2e9   :  { %2069 = vrot.lane.b32.xlu0 %v6119_v32, %s4492_s10 }
 0x2ec   :  { %2035 = vrot.lane.b32.xlu1 %v6150_v2, %s4491_s9 }
 0x2ed   :  { %2093 = vrot.lane.b32.xlu0 %v5890_v39, %s4493_s11 }
 0x2f0   :  { %2049 = vrot.lane.b32.xlu1 %v6139_v50, %s4492_s10 }
 0x2f1   :  { %2111 = vrot.lane.b32.xlu0 %v6113_v14, %s4494_s30 }
 0x2f4   :  { %2063 = vrot.lane.b32.xlu1 %v6150_v2, %s4492_s10 }
 0x2f5   :  { %2125 = vrot.lane.b32.xlu0 %v6119_v32, %s4494_s30 }
 0x2f8   :  { %2079 = vrot.lane.b32.xlu1 %v5958_v21, %s4493_s11 }
 0x2f9   :  { %3341 = vrot.lane.b32.xlu0 %v6200_v58, %s4489_s27 }
 0x2fc   :  { %2105 = vrot.lane.b32.xlu1 %v6139_v50, %s4494_s30 }
 0x2fd   :  { %3369 = vrot.lane.b32.xlu0 %v6200_v58, %s4490_s8 }
 0x300   :  { %2119 = vrot.lane.b32.xlu1 %v6150_v2, %s4494_s30 }
 0x301   :  { %v6218_v54 = vpop.permute.xlu0 %1981  ;;  %3397 = vrot.lane.b32.xlu0 %v6200_v58, %s4491_s9 }
 0x302   :  { %8646 = vst [vmem:[#allocation50_spill] sm:$0xff] %v6218_v54  ;;  %v8800_v54 = vld [vmem:[#allocation32_spill] sm:$0xff] }
 0x304   :  { %3327 = vrot.lane.b32.xlu1 %v6230_v13, %s4489_s27 }
 0x305   :  { %v6226_v27 = vpop.permute.xlu0 %2009  ;;  %3425 = vrot.lane.b32.xlu0 %v6200_v58, %s4492_s10 }
 0x306   :  { %8647 = vst [vmem:[#allocation111_spill] sm:$0xff] %v6226_v27 }
 0x308   :  { %3355 = vrot.lane.b32.xlu1 %v6230_v13, %s4490_s8 }
 0x309   :  { %v6234_v56 = vpop.permute.xlu0 %2037  ;;  %3481 = vrot.lane.b32.xlu0 %v6200_v58, %s4494_s30 }
 0x30a   :  { %8648 = vst [vmem:[#allocation113_spill] sm:$0xff] %v6234_v56  ;;  %v8796_v56 = vld [vmem:[#allocation49_spill] sm:$0xff] }
 0x30c   :  { %3383 = vrot.lane.b32.xlu1 %v6230_v13, %s4491_s9  ;;  %v6252_v33 = vpop.permute.xlu1 %1967 }
 0x30d   :  { %v6245_v59 = vpop.permute.xlu0 %2065  ;;  %1987 = vrot.lane.b32.xlu0 %v6238_v40, %s4489_s27  ;;  %8650 = vst [vmem:[#allocation101_spill] sm:$0xff] %v6252_v33 }
 0x30e   :  { %8649 = vst [vmem:[#allocation119_spill] sm:$0xff] %v6245_v59  ;;  %v8785_v59 = vld [vmem:[#allocation53_spill] sm:$0xff] }
 0x310   :  { %3411 = vrot.lane.b32.xlu1 %v6230_v13, %s4492_s10  ;;  %v6260_v43 = vpop.permute.xlu1 %1995 }
 0x311   :  { %2015 = vrot.lane.b32.xlu0 %v6238_v40, %s4490_s8  ;;  %v6256_v35 = vpop.permute.xlu0 %2121  ;;  %8652 = vst [vmem:[#allocation120_spill] sm:$0xff] %v6260_v43  ;;  %v790_v43 = vrot.slane %v8785_v59, 7 }
 0x312   :  { %8651 = vst [vmem:[#allocation98_spill] sm:$0xff] %v6256_v35 }
 0x314   :  { %3467 = vrot.lane.b32.xlu1 %v6230_v13, %s4494_s30  ;;  %v6268_v26 = vpop.permute.xlu1 %2023 }
 0x315   :  { %2043 = vrot.lane.b32.xlu0 %v6238_v40, %s4491_s9  ;;  %8654 = vst [vmem:[#allocation83_spill] sm:$0xff] %v6268_v26 }
 0x317   :  { %v6264_v3 = vpop.permute.xlu0 %1983 }
 0x318   :  { %8653 = vst [vmem:[#allocation104_spill] sm:$0xff] %v6264_v3  ;;  %1973 = vrot.lane.b32.xlu1 %v6272_v31, %s4489_s27  ;;  %v6280_v17 = vpop.permute.xlu1 %2051 }
 0x319   :  { %2071 = vrot.lane.b32.xlu0 %v6238_v40, %s4492_s10  ;;  %8656 = vst [vmem:[#allocation117_spill] sm:$0xff] %v6280_v17  ;;  %v8779_v17 = vlaneseq }
 0x31b   :  { %v6276_v6 = vpop.permute.xlu0 %2011 }
 0x31c   :  { %8655 = vst [vmem:[#allocation55_spill] sm:$0xff] %v6276_v6  ;;  %2001 = vrot.lane.b32.xlu1 %v6272_v31, %s4490_s8  ;;  %v6292_v57 = vpop.permute.xlu1 %2107 }
 0x31d   :  { %2095 = vrot.lane.b32.xlu0 %v5988_v20, %s4493_s11  ;;  %8658 = vst [vmem:[#allocation64_spill] sm:$0xff] %v6292_v57 }
 0x31f   :  { %v6286_v51 = vpop.permute.xlu0 %2039 }
 0x320   :  { %8657 = vst [vmem:[#allocation100_spill] sm:$0xff] %v6286_v51  ;;  %2029 = vrot.lane.b32.xlu1 %v6272_v31, %s4491_s9 }
 0x321   :  { %2127 = vrot.lane.b32.xlu0 %v6238_v40, %s4494_s30 }
 0x322   :  { %v6302_v28 = vpop.permute.xlu1 %1969 }
 0x323   :  { %v6296_v38 = vpop.permute.xlu0 %2067  ;;  %8660 = vst [vmem:[#allocation112_spill] sm:$0xff] %v6302_v28  ;;  %v4495_v28 = vmov 1983009808  }
 0x324   :  { %8659 = vst [vmem:[#allocation105_spill] sm:$0xff] %v6296_v38  ;;  %2057 = vrot.lane.b32.xlu1 %v6272_v31, %s4492_s10  ;;  %v951_v57 = vunpack.c.l.s4 %v4495_v28 }
 0x325   :  { %3329 = vrot.lane.b32.xlu0 %v6294_v46, %s4489_s27 }
 0x326   :  { %v6312_v16 = vpop.permute.xlu1 %1997 }
 0x327   :  { %v6306_v30 = vpop.permute.xlu0 %2123  ;;  %8662 = vst [vmem:[#allocation108_spill] sm:$0xff] %v6312_v16 }
 0x328   :  { %8661 = vst [vmem:[#allocation90_spill] sm:$0xff] %v6306_v30  ;;  %2081 = vrot.lane.b32.xlu1 %v6041_v44, %s4493_s11  ;;  %v8772_v30 = vld [vmem:[#allocation14_spill] sm:$0xff] }
 0x329   :  { %3343 = vrot.lane.b32.xlu0 %v6304_v42, %s4489_s27 }
 0x32a   :  { %v6320_v1 = vpop.permute.xlu1 %2025 }
 0x32b   :  { %v6314_v55 = vpop.permute.xlu0 %3339  ;;  %8664 = vst [vmem:[#allocation96_spill] sm:$0xff] %v6320_v1  ;;  %v769_v1 = vrot.slane %v8772_v30, 4 }
 0x32c   :  { %8663 = vst [vmem:[#allocation116_spill] sm:$0xff] %v6314_v55  ;;  %2113 = vrot.lane.b32.xlu1 %v6272_v31, %s4494_s30 }
 0x32d   :  { %3357 = vrot.lane.b32.xlu0 %v6294_v46, %s4490_s8 }
 0x32e   :  { %v6330_v0 = vpop.permute.xlu1 %2053 }
 0x32f   :  { %v6322_v29 = vpop.permute.xlu0 %3367  ;;  %8666 = vst [vmem:[#allocation106_spill] sm:$0xff] %v6330_v0 }
 0x330   :  { %8665 = vst [vmem:[#allocation102_spill] sm:$0xff] %v6322_v29  ;;  %3323 = vrot.lane.b32.xlu1 %v6328_v8, %s4489_s27 }
 0x331   :  { %3371 = vrot.lane.b32.xlu0 %v6304_v42, %s4490_s8 }
 0x332   :  { %v6342_v49 = vpop.permute.xlu1 %2109 }
 0x333   :  { %v6332_v18 = vpop.permute.xlu0 %3395  ;;  %8668 = vst [vmem:[#allocation109_spill] sm:$0xff] %v6342_v49 }
 0x334   :  { %8667 = vst [vmem:[#allocation99_spill] sm:$0xff] %v6332_v18  ;;  %3337 = vrot.lane.b32.xlu1 %v6340_v52, %s4489_s27 }
 0x335   :  { %3385 = vrot.lane.b32.xlu0 %v6294_v46, %s4491_s9 }
 0x336   :  { %v6351_v12 = vpop.permute.xlu1 %3325 }
 0x337   :  { %v6344_v37 = vpop.permute.xlu0 %3423  ;;  %8670 = vst [vmem:[#allocation103_spill] sm:$0xff] %v6351_v12  ;;  %v3174_v12 = vmax.f32 %v6047_v10, 0.0  ;;  %v8683_v10 = vld [vmem:[#allocation107_spill] sm:$0xff] }
 0x338   :  { %8669 = vst [vmem:[#allocation115_spill] sm:$0xff] %v6344_v37  ;;  %3351 = vrot.lane.b32.xlu1 %v6328_v8, %s4490_s8 }
 0x339   :  { %3399 = vrot.lane.b32.xlu0 %v6304_v42, %s4491_s9 }
 0x33a   :  { %v6359_v24 = vpop.permute.xlu1 %3353 }
 0x33b   :  { %v6353_v61 = vpop.permute.xlu0 %3479  ;;  %8672 = vst [vmem:[#allocation121_spill] sm:$0xff] %v6359_v24 }
 0x33c   :  { %8671 = vst [vmem:[#allocation114_spill] sm:$0xff] %v6353_v61  ;;  %3365 = vrot.lane.b32.xlu1 %v6340_v52, %s4490_s8 }
 0x33d   :  { %3413 = vrot.lane.b32.xlu0 %v6294_v46, %s4492_s10 }
 0x33e   :  { %v6367_v48 = vpop.permute.xlu1 %3381 }
 0x33f   :  { %v6361_v41 = vpop.permute.xlu0 %1971  ;;  %8674 = vst [vmem:[#allocation125_spill] sm:$0xff] %v6367_v48  ;;  %v1942_v48 = vrot.slane %v1941_v19, 1 }
 0x340   :  { %8673 = vst [vmem:[#allocation124_spill] sm:$0xff] %v6361_v41  ;;  %3379 = vrot.lane.b32.xlu1 %v6328_v8, %s4491_s9  ;;  %v1888_v41 = vsel %vm479_vm0, %v1843_v4, -inf }
 0x341   :  { %3427 = vrot.lane.b32.xlu0 %v6304_v42, %s4492_s10  ;;  %v1889_v60 = vrot.slane %v1888_v41, 4 }
 0x342   :  { %v6377_v22 = vpop.permute.xlu1 %3409 }
 0x343   :  { %v6371_v61 = vpop.permute.xlu0 %1985  ;;  %8676 = vst [vmem:[#allocation127_spill] sm:$0xff] %v6377_v22  ;;  %v1890_v7 = vmax.f32 %v1888_v41, %v1889_v60  ;;  %v8684_v22 = vld [vmem:[#allocation118_spill] sm:$0xff] }
 0x344   :  { %8675 = vst [vmem:[#allocation126_spill] sm:$0xff] %v6371_v61  ;;  %3393 = vrot.lane.b32.xlu1 %v6340_v52, %s4491_s9  ;;  %v1631_v49 = vadd.f32 %v8684_v22, %v8683_v10 }
 0x345   :  { %3451 = vrot.lane.b32.xlu0 %v6060_v36, %s4493_s11  ;;  %v1891_v18 = vrot.slane %v1890_v7, 2 }
 0x346   :  { %v6386_v61 = vpop.permute.xlu1 %3465 }
 0x347   :  { %v6380_v24 = vpop.permute.xlu0 %1999  ;;  %8678 = vst [vmem:[#allocation129_spill] sm:$0xff] %v6386_v61  ;;  %v1892_v22 = vmax.f32 %v1890_v7, %v1891_v18  ;;  %v3170_v18 = vmax.f32 %v6072_v15, 0.0 }
 0x348   :  { %8677 = vst [vmem:[#allocation128_spill] sm:$0xff] %v6380_v24  ;;  %3407 = vrot.lane.b32.xlu1 %v6328_v8, %s4492_s10  ;;  %v6400_v24 = vmax.f32 %v1941_v19, %v1942_v48  ;;  %v8687_v48 = vld [vmem:[#allocation123_spill] sm:$0xff] }
 0x349   :  { %3469 = vrot.lane.b32.xlu0 %v6294_v46, %s4494_s30  ;;  %v1681_v19 = vadd.f32 %v8687_v48, %v1631_v49 }
 0x34a   :  { %v6398_v4 = vpop.permute.xlu1 %1965  ;;  %8681 = vst [vmem:[#allocation132_spill] sm:$0xff] %v6400_v24 }
 0x34b   :  { %v6388_v37 = vpop.permute.xlu0 %2013  ;;  %8680 = vst [vmem:[#allocation131_spill] sm:$0xff] %v6398_v4 }
 0x34c   :  { %8679 = vst [vmem:[#allocation130_spill] sm:$0xff] %v6388_v37  ;;  %v6404_v37 = vmul.f32 %v4348_v23, %v3174_v12  ;;  %3421 = vrot.lane.b32.xlu1 %v6340_v52, %s4492_s10  ;;  %v4431_v12 = vld [vmem:[%s8383_s0 + $0x3a] sm:$0xf] }
 0x34d   :  { %3483 = vrot.lane.b32.xlu0 %v6304_v42, %s4494_s30  ;;  %v1691_v60 = vmul.f32 %v4431_v12, %v5794_v34 }
 0x34e   :  { %v6412_v29 = vpop.permute.xlu1 %1979  ;;  %v3288_v23 = vsel %vm479_vm0, %v6404_v37, -inf }
 0x34f   :  { %v6402_v61 = vpop.permute.xlu0 %2027  ;;  %8685 = vst [vmem:[#allocation107_spill] sm:$0xff] %v6412_v29  ;;  %v1699_v48 = vadd.f32 %v1691_v60, %v1681_v19  ;;  %v4344_v19 = vld [vmem:[%s8384_s1 + $0x90] sm:$0xff] }
 0x350   :  { %8682 = vst [vmem:[#allocation133_spill] sm:$0xff] %v6402_v61  ;;  %3437 = vrot.lane.b32.xlu1 %v6099_v62, %s4493_s11  ;;  %v1893_v61 = vrot.slane %v1892_v22, 1  ;;  %v6453_v15 = vmul.f32 %v4344_v19, %v3170_v18  ;;  %v4432_v18 = vld [vmem:[%s8383_s0 + $0x1a] sm:$0xf] }
 0x351   :  { %1989 = vrot.lane.b32.xlu0 %v6400_v24, %s4489_s27  ;;  %v1749_v12 = vadd.f32 %v6004_v63, %v1699_v48  ;;  %v1687_v19 = vmul.f32 %v4432_v18, %v5794_v34 }
 0x352   :  { %v6427_v10 = vpop.permute.xlu1 %1993  ;;  %v6449_v63 = vmax.f32 %v1892_v22, %v1893_v61 }
 0x353   :  { %v6414_v41 = vpop.permute.xlu0 %2041  ;;  %8688 = vst [vmem:[#allocation123_spill] sm:$0xff] %v6427_v10  ;;  %v1799_v60 = vadd.f32 %v6074_v25, %v1749_v12  ;;  %v8695_v25 = vld [vmem:[#allocation110_spill] sm:$0xff] }
 0x354   :  { %8686 = vst [vmem:[#allocation118_spill] sm:$0xff] %v6414_v41  ;;  %v3289_v41 = vrot.slane %v3288_v23, 4  ;;  %3463 = vrot.lane.b32.xlu1 %v6328_v8, %s4494_s30  ;;  %8692 = vst [vmem:[#allocation137_spill] sm:$0xff] %v6449_v63  ;;  %v8696_v12 = vld [vmem:[#allocation122_spill] sm:$0xff] }
 0x355   :  { %2017 = vrot.lane.b32.xlu0 %v6400_v24, %s4490_s8 }
 0x356   :  { %v6436_v29 = vpop.permute.xlu1 %2007  ;;  %v3290_v4 = vmax.f32 %v3288_v23, %v3289_v41 }
 0x357   :  { %v6429_v49 = vpop.permute.xlu0 %2055  ;;  %8690 = vst [vmem:[#allocation135_spill] sm:$0xff] %v6436_v29 }
 0x358   :  { %8689 = vst [vmem:[#allocation134_spill] sm:$0xff] %v6429_v49  ;;  %3477 = vrot.lane.b32.xlu1 %v6340_v52, %s4494_s30  ;;  %v3291_v41 = vrot.slane %v3290_v4, 2  ;;  %v1627_v49 = vadd.f32 %v8696_v12, %v8695_v25 }
 0x359   :  { %2045 = vrot.lane.b32.xlu0 %v6400_v24, %s4491_s9 }
 0x35a   :  { %v6451_v48 = vpop.permute.xlu1 %2021  ;;  %v1677_v22 = vadd.f32 %v5897_v47, %v1627_v49  ;;  %v4331_v47 = vld [vmem:[%s8384_s1 + $0x78] sm:$0xf] }
 0x35b   :  { %v6439_v7 = vpop.permute.xlu0 %2069  ;;  %8693 = vst [vmem:[#allocation138_spill] sm:$0xff] %v6451_v48  ;;  %v3292_v48 = vmax.f32 %v3290_v4, %v3291_v41 }
 0x35c   :  { %8691 = vst [vmem:[#allocation136_spill] sm:$0xff] %v6439_v7  ;;  %v1809_v7 = vadd.f32 %v5817_v9, %v1799_v60  ;;  %1975 = vrot.lane.b32.xlu1 %v6449_v63, %s4489_s27  ;;  %v3239_v60 = vsel %vm479_vm0, %v6453_v15, -inf  ;;  %v1695_v41 = vadd.f32 %v1687_v19, %v1677_v22 }
 0x35d   :  { %2073 = vrot.lane.b32.xlu0 %v6400_v24, %s4492_s10  ;;  %v3240_v4 = vrot.slane %v3239_v60, 4  ;;  %v3293_v34 = vrot.slane %v3292_v48, 1 }
 0x35e   :  { %v6464_v61 = vpop.permute.xlu1 %2035  ;;  %v1817_v25 = vmax.f32 %v1809_v7, 0.0  ;;  %v1745_v7 = vadd.f32 %v6043_v11, %v1695_v41 }
 0x35f   :  { %v6455_v23 = vpop.permute.xlu0 %2093  ;;  %8697 = vst [vmem:[#allocation110_spill] sm:$0xff] %v6464_v61  ;;  %v6493_v29 = vmax.f32 %v3292_v48, %v3293_v34 }
 0x360   :  { %8694 = vst [vmem:[#allocation139_spill] sm:$0xff] %v6455_v23  ;;  %2003 = vrot.lane.b32.xlu1 %v6449_v63, %s4490_s8  ;;  %v1834_v18 = vmul.f32 %v4331_v47, %v1817_v25 }
 0x361   :  { %2083 = vrot.lane.b32.xlu0 %v6113_v14, %s4493_s11 }
 0x362   :  { %v6482_v49 = vpop.permute.xlu1 %2049  ;;  %v1944_v22 = vsel %vm479_vm0, %v1834_v18, -inf  ;;  %v4327_v18 = vld [vmem:[%s8384_s1 + $0x58] sm:$0xf] }
 0x363   :  { %v6473_v23 = vpop.permute.xlu0 %2111  ;;  %8699 = vst [vmem:[#allocation140_spill] sm:$0xff] %v6482_v49  ;;  %v1795_v49 = vadd.f32 %v6084_v45, %v1745_v7 }
 0x364   :  { %8698 = vst [vmem:[#allocation122_spill] sm:$0xff] %v6473_v23  ;;  %2031 = vrot.lane.b32.xlu1 %v6449_v63, %s4491_s9  ;;  %v3241_v23 = vmax.f32 %v3239_v60, %v3240_v4  ;;  %v1945_v60 = vrot.slane %v1944_v22, 4 }
 0x365   :  { %2097 = vrot.lane.b32.xlu0 %v6119_v32, %s4493_s11  ;;  %v1805_v25 = vadd.f32 %v5817_v9, %v1795_v49 }
 0x366   :  { %v6491_v61 = vpop.permute.xlu1 %2063  ;;  %v3242_v11 = vrot.slane %v3241_v23, 2  ;;  %v1946_v4 = vmax.f32 %v1944_v22, %v1945_v60 }
 0x367   :  { %v6484_v12 = vpop.permute.xlu0 %2125  ;;  %8701 = vst [vmem:[#allocation142_spill] sm:$0xff] %v6491_v61  ;;  %v1813_v34 = vmax.f32 %v1805_v25, 0.0 }
 0x368   :  { %8700 = vst [vmem:[#allocation141_spill] sm:$0xff] %v6484_v12  ;;  %2059 = vrot.lane.b32.xlu1 %v6449_v63, %s4492_s10  ;;  %v3243_v45 = vmax.f32 %v3241_v23, %v3242_v11  ;;  %v1947_v23 = vrot.slane %v1946_v4, 2  ;;  %v8767_v12 = vld [vmem:[#allocation17_spill] sm:$0xff] }
 0x369   :  { %2129 = vrot.lane.b32.xlu0 %v6400_v24, %s4494_s30  ;;  %v1830_v7 = vmul.f32 %v4327_v18, %v1813_v34 }
 0x36a   :  { %v6503_v19 = vpop.permute.xlu1 %2079  ;;  %v3244_v9 = vrot.slane %v3243_v45, 1  ;;  %v1948_v25 = vmax.f32 %v1946_v4, %v1947_v23 }
 0x36b   :  { %v6496_v10 = vpop.permute.xlu0 %3341  ;;  %8703 = vst [vmem:[#allocation144_spill] sm:$0xff] %v6503_v19 }
 0x36c   :  { %8702 = vst [vmem:[#allocation143_spill] sm:$0xff] %v6496_v10  ;;  %2077 = vrot.lane.b32.xlu1 %v6139_v50, %s4493_s11  ;;  %v6531_v22 = vmax.f32 %v3243_v45, %v3244_v9  ;;  %v3204_v45 = vcombine.high %v6404_v37, %v6404_v37  ;;  %v8766_v10 = vld [vmem:[#allocation13_spill] sm:$0xff] }
 0x36d   :  { %3345 = vrot.lane.b32.xlu0 %v6493_v29, %s4489_s27 }
 0x36e   :  { %v6512_v47 = vpop.permute.xlu1 %2105  ;;  %8709 = vst [vmem:[#allocation150_spill] sm:$0xff] %v6531_v22 }
 0x36f   :  { %v6506_v48 = vpop.permute.xlu0 %3369  ;;  %8705 = vst [vmem:[#allocation146_spill] sm:$0xff] %v6512_v47 }
 0x370   :  { %8704 = vst [vmem:[#allocation145_spill] sm:$0xff] %v6506_v48  ;;  %2091 = vrot.lane.b32.xlu1 %v6150_v2, %s4493_s11 }
 0x371   :  { %3373 = vrot.lane.b32.xlu0 %v6493_v29, %s4490_s8 }
 0x372   :  { %v6523_v49 = vpop.permute.xlu1 %2119 }
 0x373   :  { %v6514_v41 = vpop.permute.xlu0 %3397  ;;  %8707 = vst [vmem:[#allocation148_spill] sm:$0xff] %v6523_v49  ;;  %v852_v49 = vrot.slane %v8767_v12, 6 }
 0x374   :  { %8706 = vst [vmem:[#allocation147_spill] sm:$0xff] %v6514_v41  ;;  %2115 = vrot.lane.b32.xlu1 %v6449_v63, %s4494_s30  ;;  %v1895_v41 = vsel %vm479_vm0, %v1830_v7, -inf }
 0x375   :  { %3401 = vrot.lane.b32.xlu0 %v6493_v29, %s4491_s9  ;;  %v1896_v34 = vrot.slane %v1895_v41, 4 }
 0x376   :  { %v6533_v60 = vpop.permute.xlu1 %3327 }
 0x377   :  { %v6525_v11 = vpop.permute.xlu0 %3425  ;;  %8710 = vst [vmem:[#allocation151_spill] sm:$0xff] %v6533_v60  ;;  %v1897_v4 = vmax.f32 %v1895_v41, %v1896_v34 }
 0x378   :  { %8708 = vst [vmem:[#allocation149_spill] sm:$0xff] %v6525_v11  ;;  %3331 = vrot.lane.b32.xlu1 %v6531_v22, %s4489_s27  ;;  %v1949_v11 = vrot.slane %v1948_v25, 1 }
 0x379   :  { %3429 = vrot.lane.b32.xlu0 %v6493_v29, %s4492_s10  ;;  %v1898_v37 = vrot.slane %v1897_v4, 2 }
 0x37a   :  { %v6542_v18 = vpop.permute.xlu1 %3355  ;;  %v6554_v23 = vmax.f32 %v1948_v25, %v1949_v11 }
 0x37b   :  { %v6536_v48 = vpop.permute.xlu0 %3481  ;;  %8712 = vst [vmem:[#allocation153_spill] sm:$0xff] %v6542_v18  ;;  %v3295_v18 = vsel %vm479_vm0, %v3204_v45, -inf  ;;  %v1899_v41 = vmax.f32 %v1897_v4, %v1898_v37 }
 0x37c   :  { %8711 = vst [vmem:[#allocation152_spill] sm:$0xff] %v6536_v48  ;;  %3359 = vrot.lane.b32.xlu1 %v6531_v22, %s4490_s8  ;;  %8715 = vst [vmem:[#allocation156_spill] sm:$0xff] %v6554_v23  ;;  %v3296_v60 = vrot.slane %v3295_v18, 4 }
 0x37d   :  { %3453 = vrot.lane.b32.xlu0 %v6200_v58, %s4493_s11  ;;  %v1900_v45 = vrot.slane %v1899_v41, 1 }
 0x37e   :  { %v6552_v9 = vpop.permute.xlu1 %3383  ;;  %v3297_v25 = vmax.f32 %v3295_v18, %v3296_v60 }
 0x37f   :  { %v6544_v19 = vpop.permute.xlu0 %1987  ;;  %8714 = vst [vmem:[#allocation155_spill] sm:$0xff] %v6552_v9  ;;  %v6589_v60 = vmax.f32 %v1899_v41, %v1900_v45  ;;  %v3175_v45 = vmax.f32 %v6104_v5, 0.0 }
 0x380   :  { %8713 = vst [vmem:[#allocation154_spill] sm:$0xff] %v6544_v19  ;;  %3387 = vrot.lane.b32.xlu1 %v6531_v22, %s4491_s9  ;;  %v3298_v9 = vrot.slane %v3297_v25, 2 }
 0x381   :  { %3485 = vrot.lane.b32.xlu0 %v6493_v29, %s4494_s30  ;;  %8723 = vst [vmem:[#allocation164_spill] sm:$0xff] %v6589_v60 }
 0x382   :  { %v6563_v48 = vpop.permute.xlu1 %3411  ;;  %v3299_v4 = vmax.f32 %v3297_v25, %v3298_v9 }
 0x383   :  { %v6556_v7 = vpop.permute.xlu0 %2015  ;;  %8717 = vst [vmem:[#allocation158_spill] sm:$0xff] %v6563_v48 }
 0x384   :  { %8716 = vst [vmem:[#allocation157_spill] sm:$0xff] %v6556_v7  ;;  %3415 = vrot.lane.b32.xlu1 %v6531_v22, %s4492_s10 }
 0x385   :  { %1991 = vrot.lane.b32.xlu0 %v6554_v23, %s4489_s27 }
 0x386   :  { %v6571_v11 = vpop.permute.xlu1 %3467 }
 0x387   :  { %v6565_v19 = vpop.permute.xlu0 %2043  ;;  %8719 = vst [vmem:[#allocation160_spill] sm:$0xff] %v6571_v11 }
 0x388   :  { %8718 = vst [vmem:[#allocation159_spill] sm:$0xff] %v6565_v19  ;;  %3439 = vrot.lane.b32.xlu1 %v6230_v13, %s4493_s11  ;;  %v3201_v19 = vcombine.high %v6453_v15, %v6453_v15 }
 0x389   :  { %2019 = vrot.lane.b32.xlu0 %v6554_v23, %s4490_s8 }
 0x38a   :  { %v6579_v48 = vpop.permute.xlu1 %1973  ;;  %v3246_v37 = vsel %vm479_vm0, %v3201_v19, -inf }
 0x38b   :  { %v6573_v34 = vpop.permute.xlu0 %2071  ;;  %8721 = vst [vmem:[#allocation162_spill] sm:$0xff] %v6579_v48  ;;  %v3247_v15 = vrot.slane %v3246_v37, 4 }
 0x38c   :  { %8720 = vst [vmem:[#allocation161_spill] sm:$0xff] %v6573_v34  ;;  %3471 = vrot.lane.b32.xlu1 %v6531_v22, %s4494_s30  ;;  %v3300_v34 = vrot.slane %v3299_v4, 1 }
 0x38d   :  { %2047 = vrot.lane.b32.xlu0 %v6554_v23, %s4491_s9  ;;  %v3248_v19 = vmax.f32 %v3246_v37, %v3247_v15 }
 0x38e   :  { %v6591_v18 = vpop.permute.xlu1 %2001  ;;  %v6610_v41 = vmax.f32 %v3299_v4, %v3300_v34 }
 0x38f   :  { %v6583_v7 = vpop.permute.xlu0 %2095  ;;  %8724 = vst [vmem:[#allocation165_spill] sm:$0xff] %v6591_v18 }
 0x390   :  { %8722 = vst [vmem:[#allocation163_spill] sm:$0xff] %v6583_v7  ;;  %1977 = vrot.lane.b32.xlu1 %v6589_v60, %s4489_s27  ;;  %8729 = vst [vmem:[#allocation170_spill] sm:$0xff] %v6610_v41 }
 0x391   :  { %2075 = vrot.lane.b32.xlu0 %v6554_v23, %s4492_s10 }
 0x392   :  { %v6600_v7 = vpop.permute.xlu1 %2029 }
 0x393   :  { %v6594_v11 = vpop.permute.xlu0 %2127  ;;  %8726 = vst [vmem:[#allocation167_spill] sm:$0xff] %v6600_v7  ;;  %v3249_v7 = vrot.slane %v3248_v19, 2 }
 0x394   :  { %8725 = vst [vmem:[#allocation166_spill] sm:$0xff] %v6594_v11  ;;  %2005 = vrot.lane.b32.xlu1 %v6589_v60, %s4490_s8 }
 0x395   :  { %2099 = vrot.lane.b32.xlu0 %v6238_v40, %s4493_s11  ;;  %v3250_v5 = vmax.f32 %v3248_v19, %v3249_v7 }
 0x396   :  { %v6608_v9 = vpop.permute.xlu1 %2057 }
 0x397   :  { %v6602_v48 = vpop.permute.xlu0 %3329  ;;  %8728 = vst [vmem:[#allocation169_spill] sm:$0xff] %v6608_v9 }
 0x398   :  { %8727 = vst [vmem:[#allocation168_spill] sm:$0xff] %v6602_v48  ;;  %2033 = vrot.lane.b32.xlu1 %v6589_v60, %s4491_s9  ;;  %v4349_v48 = vld [vmem:[%s8384_s1 + $0xb8] sm:$0xf] }
 0x399   :  { %2131 = vrot.lane.b32.xlu0 %v6554_v23, %s4494_s30  ;;  %v3192_v34 = vmul.f32 %v4349_v48, %v3175_v45  ;;  %v3251_v48 = vrot.slane %v3250_v5, 1 }
 0x39a   :  { %v6622_v37 = vpop.permute.xlu1 %2081 }
 0x39b   :  { %v6612_v25 = vpop.permute.xlu0 %3343  ;;  %8731 = vst [vmem:[#allocation172_spill] sm:$0xff] %v6622_v37  ;;  %v3302_v9 = vsel %vm479_vm0, %v3192_v34, -inf  ;;  %v6647_v7 = vmax.f32 %v3250_v5, %v3251_v48 }
 0x39c   :  { %8730 = vst [vmem:[#allocation171_spill] sm:$0xff] %v6612_v25  ;;  %2061 = vrot.lane.b32.xlu1 %v6589_v60, %s4492_s10 }
 0x39d   :  { %3347 = vrot.lane.b32.xlu0 %v6610_v41, %s4489_s27  ;;  %8737 = vst [vmem:[#allocation178_spill] sm:$0xff] %v6647_v7 }
 0x39e   :  { %v6630_v4 = vpop.permute.xlu1 %2113 }
 0x39f   :  { %v6624_v15 = vpop.permute.xlu0 %3357  ;;  %8733 = vst [vmem:[#allocation174_spill] sm:$0xff] %v6630_v4 }
 0x3a0   :  { %8732 = vst [vmem:[#allocation173_spill] sm:$0xff] %v6624_v15  ;;  %2085 = vrot.lane.b32.xlu1 %v6272_v31, %s4493_s11  ;;  %v3303_v15 = vrot.slane %v3302_v9, 4 }
 0x3a1   :  { %3375 = vrot.lane.b32.xlu0 %v6610_v41, %s4490_s8 }
 0x3a2   :  { %v6639_v45 = vpop.permute.xlu1 %3323  ;;  %v3304_v34 = vmax.f32 %v3302_v9, %v3303_v15 }
 0x3a3   :  { %v6632_v25 = vpop.permute.xlu0 %3371  ;;  %8735 = vst [vmem:[#allocation176_spill] sm:$0xff] %v6639_v45  ;;  %v4345_v45 = vld [vmem:[%s8384_s1 + $0x98] sm:$0xf]  ;;  %s4498_s1 = smov 14  }
 0x3a4   :  { %8734 = vst [vmem:[#allocation175_spill] sm:$0xff] %v6632_v25  ;;  %2117 = vrot.lane.b32.xlu1 %v6589_v60, %s4494_s30  ;;  %v3171_v25 = vmax.f32 %v6111_v53, 0.0  ;;  %v3305_v5 = vrot.slane %v3304_v34, 2 }
 0x3a5   :  { %3403 = vrot.lane.b32.xlu0 %v6610_v41, %s4491_s9 }
 0x3a6   :  { %v6649_v19 = vpop.permute.xlu1 %3337  ;;  %v3188_v48 = vmul.f32 %v4345_v45, %v3171_v25  ;;  %v3306_v9 = vmax.f32 %v3304_v34, %v3305_v5 }
 0x3a7   :  { %v6641_v37 = vpop.permute.xlu0 %3385  ;;  %8738 = vst [vmem:[#allocation179_spill] sm:$0xff] %v6649_v19 }
 0x3a8   :  { %8736 = vst [vmem:[#allocation177_spill] sm:$0xff] %v6641_v37  ;;  %3333 = vrot.lane.b32.xlu1 %v6647_v7, %s4489_s27  ;;  %v3253_v15 = vsel %vm479_vm0, %v3188_v48, -inf  ;;  %vm4200_vm0 = vcmask 154624  }
 0x3a9   :  { %3431 = vrot.lane.b32.xlu0 %v6610_v41, %s4492_s10  ;;  %v3254_v25 = vrot.slane %v3253_v15, 4 }
 0x3aa   :  { %v6661_v37 = vpop.permute.xlu1 %3351 }
 0x3ab   :  { %v6652_v4 = vpop.permute.xlu0 %3399  ;;  %8740 = vst [vmem:[#allocation181_spill] sm:$0xff] %v6661_v37  ;;  %v3255_v34 = vmax.f32 %v3253_v15, %v3254_v25 }
 0x3ac   :  { %8739 = vst [vmem:[#allocation180_spill] sm:$0xff] %v6652_v4  ;;  %3361 = vrot.lane.b32.xlu1 %v6647_v7, %s4490_s8 }
 0x3ad   :  { %3441 = vrot.lane.b32.xlu0 %v6294_v46, %s4493_s11 }
 0x3ae   :  { %v6669_v53 = vpop.permute.xlu1 %3365 }
 0x3af   :  { %v6663_v19 = vpop.permute.xlu0 %3413  ;;  %8742 = vst [vmem:[#allocation183_spill] sm:$0xff] %v6669_v53 }
 0x3b0   :  { %8741 = vst [vmem:[#allocation182_spill] sm:$0xff] %v6663_v19  ;;  %3389 = vrot.lane.b32.xlu1 %v6647_v7, %s4491_s9  ;;  %v3307_v19 = vrot.slane %v3306_v9, 1 }
 0x3b1   :  { %3455 = vrot.lane.b32.xlu0 %v6304_v42, %s4493_s11 }
 0x3b2   :  { %v6678_v45 = vpop.permute.xlu1 %3379  ;;  %v6688_v48 = vmax.f32 %v3306_v9, %v3307_v19 }
 0x3b3   :  { %v6672_v4 = vpop.permute.xlu0 %3427  ;;  %8744 = vst [vmem:[#allocation185_spill] sm:$0xff] %v6678_v45 }
 0x3b4   :  { %8743 = vst [vmem:[#allocation184_spill] sm:$0xff] %v6672_v4  ;;  %3417 = vrot.lane.b32.xlu1 %v6647_v7, %s4492_s10  ;;  %8747 = vst [vmem:[#allocation188_spill] sm:$0xff] %v6688_v48 }
 0x3b5   :  { %3487 = vrot.lane.b32.xlu0 %v6610_v41, %s4494_s30 }
 0x3b6   :  { %v6686_v5 = vpop.permute.xlu1 %3393 }
 0x3b7   :  { %v6680_v37 = vpop.permute.xlu0 %3451  ;;  %8746 = vst [vmem:[#allocation187_spill] sm:$0xff] %v6686_v5  ;;  %v8764_v5 = vld [vmem:[#allocation16_spill] sm:$0xff] }
 0x3b8   :  { %8745 = vst [vmem:[#allocation186_spill] sm:$0xff] %v6680_v37  ;;  %3435 = vrot.lane.b32.xlu1 %v6328_v8, %s4493_s11  ;;  %v3256_v37 = vrot.slane %v3255_v34, 2 }
 0x3b9   :  { %2101 = vrot.lane.b32.xlu0 %v6400_v24, %s4493_s11 }
 0x3ba   :  { %v6696_v45 = vpop.permute.xlu1 %3407  ;;  %v3257_v19 = vmax.f32 %v3255_v34, %v3256_v37 }
 0x3bb   :  { %v6690_v4 = vpop.permute.xlu0 %3469  ;;  %8749 = vst [vmem:[#allocation190_spill] sm:$0xff] %v6696_v45 }
 0x3bc   :  { %8748 = vst [vmem:[#allocation189_spill] sm:$0xff] %v6690_v4  ;;  %3449 = vrot.lane.b32.xlu1 %v6340_v52, %s4493_s11  ;;  %v3258_v25 = vrot.slane %v3257_v19, 1 }
 0x3bd   :  { %3349 = vrot.lane.b32.xlu0 %v6688_v48, %s4489_s27 }
 0x3be   :  { %v6704_v9 = vpop.permute.xlu1 %3421  ;;  %v6720_v37 = vmax.f32 %v3257_v19, %v3258_v25  ;;  %v8759_v19 = vld [vmem:[#allocation22_spill] sm:$0xff] }
 0x3bf   :  { %v6698_v53 = vpop.permute.xlu0 %3483  ;;  %8751 = vst [vmem:[#allocation192_spill] sm:$0xff] %v6704_v9  ;;  %v760_v25 = vrot.slane %v8759_v19, 7 }
 0x3c0   :  { %8750 = vst [vmem:[#allocation191_spill] sm:$0xff] %v6698_v53  ;;  %3473 = vrot.lane.b32.xlu1 %v6647_v7, %s4494_s30 }
 0x3c1   :  { %3377 = vrot.lane.b32.xlu0 %v6688_v48, %s4490_s8 }
 0x3c2   :  { %v6712_v4 = vpop.permute.xlu1 %3437 }
 0x3c3   :  { %v6706_v15 = vpop.permute.xlu0 %1989  ;;  %8753 = vst [vmem:[#allocation194_spill] sm:$0xff] %v6712_v4 }
 0x3c4   :  { %8752 = vst [vmem:[#allocation193_spill] sm:$0xff] %v6706_v15  ;;  %2087 = vrot.lane.b32.xlu1 %v6449_v63, %s4493_s11 }
 0x3c5   :  { %3405 = vrot.lane.b32.xlu0 %v6688_v48, %s4491_s9 }
 0x3c6   :  { %v6722_v34 = vpop.permute.xlu1 %3463 }
 0x3c7   :  { %v6714_v53 = vpop.permute.xlu0 %2017  ;;  %8755 = vst [vmem:[#allocation196_spill] sm:$0xff] %v6722_v34  ;;  %v8760_v34 = vld [vmem:[#allocation20_spill] sm:$0xff] }
 0x3c8   :  { %8754 = vst [vmem:[#allocation195_spill] sm:$0xff] %v6714_v53  ;;  %3335 = vrot.lane.b32.xlu1 %v6720_v37, %s4489_s27  ;;  %s4499_s27 = smov 7  }
 0x3c9   :  { %3433 = vrot.lane.b32.xlu0 %v6688_v48, %s4492_s10 }
 0x3ca   :  { %v6730_v4 = vpop.permute.xlu1 %3477 }
 0x3cb   :  { %v6724_v15 = vpop.permute.xlu0 %2045  ;;  %8757 = vst [vmem:[#allocation198_spill] sm:$0xff] %v6730_v4 }
 0x3cc   :  { %8756 = vst [vmem:[#allocation197_spill] sm:$0xff] %v6724_v15  ;;  %3363 = vrot.lane.b32.xlu1 %v6720_v37, %s4490_s8  ;;  %v850_v15 = vrot.slane %v8760_v34, 7  ;;  %s4500_s8 = smov 21  }
 0x3cd   :  { %3457 = vrot.lane.b32.xlu0 %v6493_v29, %s4493_s11 }
 0x3ce   :  { %v6740_v9 = vpop.permute.xlu1 %1975  ;;  %v851_v11 = vsel %vm761_vm1, %v850_v15, %v8764_v5  ;;  %v8769_v15 = vld [vmem:[#allocation24_spill] sm:$0xff] }
 0x3cf   :  { %v6732_v53 = vpop.permute.xlu0 %2073  ;;  %8761 = vst [vmem:[#allocation22_spill] sm:$0xff] %v6740_v9  ;;  %v763_v9 = vrot.slane %v8766_v10, 6  ;;  %v853_v61 = vsel %vm764_vm2, %v852_v49, %v851_v11  ;;  %v8775_v11 = vld [vmem:[#allocation25_spill] sm:$0xff] }
 0x3d0   :  { %8758 = vst [vmem:[#allocation199_spill] sm:$0xff] %v6732_v53  ;;  %3391 = vrot.lane.b32.xlu1 %v6720_v37, %s4491_s9  ;;  %v8763_v53 = vld [vmem:[#allocation12_spill] sm:$0xff]  ;;  %s4501_s9 = smov 28  }
 0x3d1   :  { %3489 = vrot.lane.b32.xlu0 %v6688_v48, %s4494_s30  ;;  %v762_v4 = vsel %vm761_vm1, %v760_v25, %v8763_v53  ;;  %v766_v25 = vrot.slane %v8769_v15, 5 }
 0x3d2   :  { %v6752_v18 = vpop.permute.xlu1 %2003  ;;  %v765_v47 = vsel %vm764_vm2, %v763_v9, %v762_v4  ;;  %v772_v9 = vrot.slane %v8775_v11, 3 }
 0x3d3   :  { %v6742_v45 = vpop.permute.xlu0 %2083  ;;  %8765 = vst [vmem:[#allocation12_spill] sm:$0xff] %v6752_v18  ;;  %v8770_v18 = vld [vmem:[#allocation21_spill] sm:$0xff]  ;;  %v768_v4 = vsel %vm767_vm3, %v766_v25, %v765_v47  ;;  %v4496_v25 = vmov 1934713408  }
 0x3d4   :  { %8762 = vst [vmem:[#allocation20_spill] sm:$0xff] %v6742_v45  ;;  %3419 = vrot.lane.b32.xlu1 %v6720_v37, %s4492_s10  ;;  %v854_v0 = vrot.slane %v8770_v18, 5  ;;  %v771_v47 = vsel %vm770_vm4, %v769_v1, %v768_v4  ;;  %v6793_v1 = vshrl.u32 %v8779_v17, 7  ;;  %v8782_v4 = vld [vmem:[#allocation15_spill] sm:$0xff]  ;;  %v8790_v17 = vld [vmem:[#allocation46_spill] sm:$0xff]  ;;  %s4502_s10 = smov 35  }
 0x3d5   :  { %2103 = vrot.lane.b32.xlu0 %v6554_v23, %s4493_s11  ;;  %v774_v28 = vsel %vm773_vm5, %v772_v9, %v771_v47  ;;  %v8789_v47 = vld [vmem:[#allocation27_spill] sm:$0xff] }
 0x3d6   :  { %v6766_v55 = vpop.permute.xlu1 %2031  ;;  %v855_v49 = vsel %vm767_vm3, %v854_v0, %v853_v61  ;;  %8780 = vst [vmem:[#allocation14_spill] sm:$0xff] %v6793_v1 }
 0x3d7   :  { %v6756_v45 = vpop.permute.xlu0 %2097  ;;  %8771 = vst [vmem:[#allocation13_spill] sm:$0xff] %v6766_v55  ;;  %v8776_v55 = vld [vmem:[#allocation23_spill] sm:$0xff] }
 0x3d8   :  { %8768 = vst [vmem:[#allocation16_spill] sm:$0xff] %v6756_v45  ;;  %v8773_v45 = vld [vmem:[#allocation18_spill] sm:$0xff]  ;;  %3443 = vrot.lane.b32.xlu1 %v6531_v22, %s4493_s11  ;;  %v858_v51 = vrot.slane %v8776_v55, 3  ;;  %v8815_v22 = vld [vmem:[#allocation40_spill] sm:$0xff] }
 0x3d9   :  { %3459 = vrot.lane.b32.xlu0 %v6610_v41, %s4493_s11  ;;  %v856_v16 = vrot.slane %v8773_v45, 4  ;;  %v8810_v41 = vld [vmem:[#allocation45_spill] sm:$0xff] }
 0x3da   :  { %v6780_v3 = vpop.permute.xlu1 %2059 }
 0x3db   :  { %v6770_v38 = vpop.permute.xlu0 %2129  ;;  %8777 = vst [vmem:[#allocation24_spill] sm:$0xff] %v6780_v3  ;;  %v857_v0 = vsel %vm770_vm4, %v856_v16, %v855_v49  ;;  %v952_v3 = vunpack.c.0.s8 %v951_v57  ;;  %v775_v49 = vrot.slane %v8782_v4, 2 }
 0x3dc   :  { %8774 = vst [vmem:[#allocation17_spill] sm:$0xff] %v6770_v38  ;;  %v1014_v38 = vunpack.c.l.s4 %v4496_v25  ;;  %3475 = vrot.lane.b32.xlu1 %v6720_v37, %s4494_s30  ;;  %v859_v6 = vsel %vm773_vm5, %v858_v51, %v857_v0  ;;  %v8783_v25 = vld [vmem:[#allocation19_spill] sm:$0xff]  ;;  %v780_v0 = vrot.slane %v8789_v47, 6  ;;  %v8799_v47 = vld [vmem:[#allocation33_spill] sm:$0xff] }
 0x3dd   :  { %3461 = vrot.lane.b32.xlu0 %v6688_v48, %s4493_s11  ;;  %v6805_v51 = vsel %vm776_vm6, %v775_v49, %v774_v28  ;;  %v8794_v28 = vld [vmem:[#allocation28_spill] sm:$0xff] }
 0x3de   :  { %v6795_v16 = vpop.permute.xlu1 %2077  ;;  %v1015_v35 = vunpack.c.0.s8 %v1014_v38  ;;  %8786 = vst [vmem:[#allocation23_spill] sm:$0xff] %v6805_v51  ;;  %v778_v38 = vrot.slane %v8790_v17, 7  ;;  %v784_v49 = vrot.slane %v8794_v28, 4  ;;  %v864_v17 = vrot.slane %v8799_v47, 6  ;;  %v8802_v48 = vld [vmem:[#allocation56_spill] sm:$0xff]  ;;  %v8803_v28 = vld [vmem:[#allocation11_spill] sm:$0xff] }
 0x3df   :  { %v6784_v61 = vpop.permute.xlu0 %3345  ;;  %8781 = vst [vmem:[#allocation18_spill] sm:$0xff] %v6795_v16  ;;  %v6817_v16 = vsub.s32 %v952_v3, %v6793_v1 }
 0x3e0   :  { %8778 = vst [vmem:[#allocation21_spill] sm:$0xff] %v6784_v61  ;;  %v860_v61 = vrot.slane %v8783_v25, 2  ;;  %2089 = vrot.lane.b32.xlu1 %v6589_v60, %s4493_s11  ;;  %v8801_v25 = vld [vmem:[#allocation30_spill] sm:$0xff] }
 0x3e1   :  { %748 = vrot.lane.b32.xlu0 %v8760_v34, %s4494_s30  ;;  %v8788_v34 = vld [vmem:[#allocation60_spill] sm:$0xff]  ;;  %8792 = vst [vmem:[#allocation53_spill] sm:$0xff] %v6817_v16  ;;  %v791_v3 = vsel %vm761_vm1, %v790_v43, %v8801_v25  ;;  %v8808_v43 = vld [vmem:[#allocation26_spill] sm:$0xff]  ;;  %v8809_v25 = vld [vmem:[#allocation31_spill] sm:$0xff] }
 0x3e2   :  { %v6808_v57 = vsel %vm776_vm6, %v860_v61, %v859_v6  ;;  %v802_v9 = vrot.slane %v8788_v34, 7  ;;  %v6819_v33 = vpop.permute.xlu1 %2091  ;;  %v8795_v6 = vld [vmem:[#allocation29_spill] sm:$0xff]  ;;  %v874_v34 = vrot.slane %v8796_v56, 7  ;;  %v868_v61 = vrot.slane %v8803_v28, 4  ;;  %v8804_v56 = vld [vmem:[#allocation34_spill] sm:$0xff] }
 0x3e3   :  { %v6799_v26 = vpop.permute.xlu0 %3373  ;;  %8787 = vst [vmem:[#allocation15_spill] sm:$0xff] %v6808_v57  ;;  %8793 = vst [vmem:[#allocation60_spill] sm:$0xff] %v6819_v33  ;;  %v794_v33 = vrot.slane %v8802_v48, 5  ;;  %v796_v60 = vrot.slane %v8804_v56, 4  ;;  %v779_v48 = vsel %vm761_vm1, %v778_v38, %v8808_v43  ;;  %v866_v28 = vrot.slane %v8810_v41, 5  ;;  %v8812_v56 = vld [vmem:[#allocation48_spill] sm:$0xff] }
 0x3e4   :  { %8784 = vst [vmem:[#allocation25_spill] sm:$0xff] %v6799_v26  ;;  %v8791_v26 = vld [vmem:[#allocation43_spill] sm:$0xff]  ;;  %3445 = vrot.lane.b32.xlu1 %v6647_v7, %s4493_s11  ;;  %v782_v63 = vrot.slane %v8812_v56, 5  ;;  %v876_v38 = vrot.slane %v8815_v22, 6  ;;  %v8819_v22 = vld [vmem:[#allocation41_spill] sm:$0xff]  ;;  %v8909_v57 = vld [vmem:[#allocation102_spill] sm:$0xff] }
 0x3e5   :  { %750 = vrot.lane.b32.xlu0 %v8767_v12, %s4494_s30  ;;  %v862_v59 = vrot.slane %v8791_v26, 7  ;;  %v6827_v12 = vsub.s32 %v1015_v35, %v6793_v1  ;;  %v792_v26 = vrot.slane %v8800_v54, 6  ;;  %v8806_v1 = vld [vmem:[#allocation62_spill] sm:$0xff]  ;;  %v8807_v54 = vld [vmem:[#allocation39_spill] sm:$0xff] }
 0x3e6   :  { %v804_v47 = vrot.slane %v8807_v54, 6  ;;  %v6849_v23 = vpop.permute.xlu1 %2115  ;;  %v8817_v56 = vld [vmem:[#allocation35_spill] sm:$0xff] }
 0x3e7   :  { %v6824_v27 = vpop.permute.xlu0 %3401  ;;  %8798 = vst [vmem:[#allocation46_spill] sm:$0xff] %v6827_v12  ;;  %v806_v12 = vrot.slane %v8806_v1, 5  ;;  %v863_v7 = vsel %vm761_vm1, %v862_v59, %v8809_v25  ;;  %8811 = vst [vmem:[#allocation43_spill] sm:$0xff] %v6849_v23  ;;  %v8816_v59 = vld [vmem:[#allocation58_spill] sm:$0xff]  ;;  %v800_v23 = vrot.slane %v8817_v56, 2 }
 0x3e8   :  { %8797 = vst [vmem:[#allocation27_spill] sm:$0xff] %v6824_v27  ;;  %v8805_v27 = vld [vmem:[#allocation37_spill] sm:$0xff]  ;;  %v798_v25 = vrot.slane %v8816_v59, 3  ;;  %3447 = vrot.lane.b32.xlu1 %v6720_v37, %s4493_s11 }
 0x3e9   :  { %v803_v35 = vsel %vm761_vm1, %v802_v9, %v8805_v27  ;;  %738 = vrot.lane.b32.xlu0 %v8769_v15, %s4494_s30  ;;  %v8813_v27 = vld [vmem:[#allocation38_spill] sm:$0xff]  ;;  %v793_v9 = vsel %vm764_vm2, %v792_v26, %v791_v3  ;;  %v8814_v15 = vld [vmem:[#allocation52_spill] sm:$0xff]  ;;  %v8818_v3 = vld [vmem:[#allocation65_spill] sm:$0xff] }
 0x3ea   :  { %v875_v1 = vsel %vm761_vm1, %v874_v34, %v8813_v27  ;;  %v878_v24 = vrot.slane %v8814_v15, 5  ;;  %v795_v43 = vsel %vm767_vm3, %v794_v33, %v793_v9  ;;  %v805_v41 = vsel %vm764_vm2, %v804_v47, %v803_v35  ;;  %v6874_v15 = vpop.permute.xlu1 %3331 }
 0x3eb   :  { %v6856_v54 = vpop.permute.xlu0 %3429  ;;  %v865_v34 = vsel %vm764_vm2, %v864_v17, %v863_v7  ;;  %v807_v26 = vsel %vm767_vm3, %v806_v12, %v805_v41  ;;  %v810_v27 = vrot.slane %v8818_v3, 3  ;;  %v808_v33 = vrot.slane %v8819_v22, 4  ;;  %v8820_v7 = vld [vmem:[#allocation51_spill] sm:$0xff]  ;;  %v8822_v3 = vld [vmem:[#allocation54_spill] sm:$0xff] }
 0x3ec   :  { %v781_v9 = vsel %vm764_vm2, %v780_v0, %v779_v48  ;;  %v867_v35 = vsel %vm767_vm3, %v866_v28, %v865_v34  ;;  %v877_v47 = vsel %vm764_vm2, %v876_v38, %v875_v1  ;;  %v786_v17 = vrot.slane %v8820_v7, 3  ;;  %v8823_v28 = vld [vmem:[#allocation69_spill] sm:$0xff]  ;;  %734 = vrot.lane.b32.xlu1 %v8759_v19, %s4494_s30  ;;  %v8825_v34 = vld [vmem:[#allocation47_spill] sm:$0xff] }
 0x3ed   :  { %752 = vrot.lane.b32.xlu0 %v8770_v18, %s4494_s30  ;;  %v783_v59 = vsel %vm767_vm3, %v782_v63, %v781_v9  ;;  %v879_v12 = vsel %vm767_vm3, %v878_v24, %v877_v47  ;;  %v797_v41 = vsel %vm770_vm4, %v796_v60, %v795_v43  ;;  %v882_v0 = vrot.slane %v8822_v3, 3  ;;  %v8824_v63 = vld [vmem:[#allocation42_spill] sm:$0xff]  ;;  %v8826_v24 = vld [vmem:[#allocation59_spill] sm:$0xff] }
 0x3ee   :  { %v799_v18 = vsel %vm773_vm5, %v798_v25, %v797_v41  ;;  %v809_v48 = vsel %vm770_vm4, %v808_v33, %v807_v26  ;;  %v888_v1 = vrot.slane %v8823_v28, 6  ;;  %v880_v38 = vrot.slane %v8824_v63, 4  ;;  %v8827_v26 = vld [vmem:[#allocation57_spill] sm:$0xff]  ;;  %v8828_v47 = vld [vmem:[#allocation75_spill] sm:$0xff]  ;;  %v6898_v19 = vpop.permute.xlu1 %3359 }
 0x3ef   :  { %v6880_v56 = vpop.permute.xlu0 %3453  ;;  %v870_v22 = vrot.slane %v8825_v34, 3  ;;  %v886_v9 = vrot.slane %v8826_v24, 7  ;;  %v811_v60 = vsel %vm773_vm5, %v810_v27, %v809_v48  ;;  %v785_v43 = vsel %vm770_vm4, %v784_v49, %v783_v59  ;;  %v8830_v48 = vld [vmem:[#allocation67_spill] sm:$0xff]  ;;  %v8835_v24 = vld [vmem:[#allocation61_spill] sm:$0xff] }
 0x3f0   :  { %8821 = vst [vmem:[#allocation28_spill] sm:$0xff] %v6880_v56  ;;  %v869_v25 = vsel %vm770_vm4, %v868_v61, %v867_v35  ;;  %v812_v33 = vrot.slane %v8827_v26, 2  ;;  %v814_v7 = vrot.slane %v8828_v47, 7  ;;  %v787_v41 = vsel %vm773_vm5, %v786_v17, %v785_v43  ;;  %v8832_v59 = vld [vmem:[#allocation71_spill] sm:$0xff]  ;;  %736 = vrot.lane.b32.xlu1 %v8766_v10, %s4494_s30  ;;  %v8838_v10 = vld [vmem:[#allocation66_spill] sm:$0xff]  ;;  %v8839_v26 = vld [vmem:[#allocation77_spill] sm:$0xff] }
 0x3f1   :  { %754 = vrot.lane.b32.xlu0 %v8773_v45, %s4494_s30  ;;  %v6902_v3 = vsel %vm776_vm6, %v800_v23, %v799_v18  ;;  %v881_v27 = vsel %vm770_vm4, %v880_v38, %v879_v12  ;;  %v887_v28 = vsel %vm761_vm1, %v886_v9, %v8830_v48  ;;  %v892_v34 = vrot.slane %v8832_v59, 4  ;;  %v8833_v23 = vld [vmem:[#allocation36_spill] sm:$0xff]  ;;  %v8842_v59 = vld [vmem:[#allocation73_spill] sm:$0xff] }
 0x3f2   :  { %8829 = vst [vmem:[#allocation29_spill] sm:$0xff] %v6902_v3  ;;  %v883_v49 = vsel %vm773_vm5, %v882_v0, %v881_v27  ;;  %v6911_v61 = vsel %vm776_vm6, %v812_v33, %v811_v60  ;;  %v889_v35 = vsel %vm764_vm2, %v888_v1, %v887_v28  ;;  %v872_v17 = vrot.slane %v8833_v23, 2  ;;  %v8834_v12 = vld [vmem:[#allocation44_spill] sm:$0xff]  ;;  %v6933_v47 = vpop.permute.xlu1 %3387 }
 0x3f3   :  { %v6907_v63 = vpop.permute.xlu0 %3485  ;;  %8831 = vst [vmem:[#allocation49_spill] sm:$0xff] %v6911_v61  ;;  %v884_v18 = vrot.slane %v8834_v12, 2  ;;  %v871_v38 = vsel %vm773_vm5, %v870_v22, %v869_v25  ;;  %v890_v9 = vrot.slane %v8835_v24, 5  ;;  %v8836_v0 = vrot.slane %v8795_v6, 2  ;;  %v8843_v23 = vld [vmem:[#allocation84_spill] sm:$0xff] }
 0x3f4   :  { %v948_v60 = vcombine.low %v6805_v51, %v6902_v3  ;;  %v815_v43 = vsel %vm761_vm1, %v814_v7, %v8838_v10  ;;  %v818_v33 = vrot.slane %v8839_v26, 5  ;;  %v896_v7 = vrot.slane %v8842_v59, 2  ;;  %732 = vrot.lane.b32.xlu1 %v8763_v53, %s4494_s30  ;;  %v8847_v26 = vld [vmem:[#allocation79_spill] sm:$0xff] }
 0x3f5   :  { %756 = vrot.lane.b32.xlu0 %v8776_v55, %s4494_s30  ;;  %v6926_v1 = vsel %vm776_vm6, %v8836_v0, %v787_v41  ;;  %v6936_v22 = vsel %vm776_vm6, %v884_v18, %v883_v49  ;;  %v891_v6 = vsel %vm767_vm3, %v890_v9, %v889_v35  ;;  %v8841_v41 = vld [vmem:[#allocation68_spill] sm:$0xff]  ;;  %v900_v12 = vrot.slane %v8843_v23, 6  ;;  %v8844_v49 = vld [vmem:[#allocation63_spill] sm:$0xff]  ;;  %v8846_v9 = vld [vmem:[#allocation74_spill] sm:$0xff] }
 0x3f6   :  { %8837 = vst [vmem:[#allocation33_spill] sm:$0xff] %v6926_v1  ;;  %8840 = vst [vmem:[#allocation32_spill] sm:$0xff] %v6936_v22  ;;  %v964_v25 = vcombine.low %v6926_v1, %v6911_v61  ;;  %v816_v27 = vrot.slane %v8841_v41, 6  ;;  %v893_v28 = vsel %vm770_vm4, %v892_v34, %v891_v6  ;;  %v894_v18 = vrot.slane %v8844_v49, 3  ;;  %v6961_v53 = vpop.permute.xlu1 %3415  ;;  %v8854_v49 = vld [vmem:[#allocation72_spill] sm:$0xff]  ;;  %v8908_v22 = vld [vmem:[#allocation106_spill] sm:$0xff] }
 0x3f7   :  { %v6942_v48 = vpop.permute.xlu0 %1991  ;;  %v6951_v24 = vsel %vm776_vm6, %v872_v17, %v871_v38  ;;  %v898_v0 = vrot.slane %v8846_v9, 7  ;;  %v822_v6 = vrot.slane %v8847_v26, 3  ;;  %8848 = vst [vmem:[#allocation56_spill] sm:$0xff] %v6961_v53  ;;  %v6964_v41 = vrot.slane %v948_v60, %v6817_v16  ;;  %v8850_v38 = vld [vmem:[#allocation70_spill] sm:$0xff]  ;;  %v8916_v61 = vld [vmem:[#allocation107_spill] sm:$0xff]  ;;  %v8986_v53 = vld [vmem:[#allocation185_spill] sm:$0xff] }
 0x3f8   :  { %8845 = vst [vmem:[#allocation30_spill] sm:$0xff] %v6951_v24  ;;  %v817_v35 = vsel %vm764_vm2, %v816_v27, %v815_v43  ;;  %v895_v17 = vsel %vm773_vm5, %v894_v18, %v893_v28  ;;  %v820_v43 = vrot.slane %v8850_v38, 4  ;;  %v8851_v27 = vld [vmem:[#allocation81_spill] sm:$0xff]  ;;  %v6973_v23 = vrot.slane %v964_v25, %v6817_v16  ;;  %v8855_v9 = vld [vmem:[#allocation86_spill] sm:$0xff]  ;;  %746 = vrot.lane.b32.xlu1 %v8764_v5, %s4494_s30  ;;  %v8856_v18 = vld [vmem:[#allocation76_spill] sm:$0xff] }
 0x3f9   :  { %744 = vrot.lane.b32.xlu0 %v8782_v4, %s4494_s30  ;;  %v819_v10 = vsel %vm767_vm3, %v818_v33, %v817_v35  ;;  %8849 = vst [vmem:[#allocation11_spill] sm:$0xff] %v6964_v41  ;;  %v899_v59 = vsel %vm761_vm1, %v898_v0, %v8851_v27  ;;  %v6976_v33 = vsel %vm776_vm6, %v896_v7, %v895_v17  ;;  %v824_v35 = vrot.slane %v8854_v49, 2  ;;  %v8857_v38 = vld [vmem:[#allocation91_spill] sm:$0xff]  ;;  %v8967_v16 = vld [vmem:[#allocation160_spill] sm:$0xff] }
 0x3fa   :  { %8852 = vst [vmem:[#allocation34_spill] sm:$0xff] %v6973_v23  ;;  %8853 = vst [vmem:[#allocation37_spill] sm:$0xff] %v6976_v33  ;;  %v901_v60 = vsel %vm764_vm2, %v900_v12, %v899_v59  ;;  %v904_v26 = vrot.slane %v8855_v9, 4  ;;  %v821_v28 = vsel %vm770_vm4, %v820_v43, %v819_v10  ;;  %v902_v0 = vrot.slane %v8856_v18, 5  ;;  %v8858_v12 = vld [vmem:[#allocation78_spill] sm:$0xff]  ;;  %v6994_v34 = vpop.permute.xlu1 %3439  ;;  %v8861_v43 = vld [vmem:[#allocation85_spill] sm:$0xff] }
 0x3fb   :  { %v6970_v4 = vpop.permute.xlu0 %2019  ;;  %v826_v27 = vrot.slane %v8857_v38, 7  ;;  %v2217_v25 = vrot.slane %v5890_v39, 7  ;;  %v6990_v7 = vsel %vm773_vm5, %v822_v6, %v821_v28  ;;  %v906_v17 = vrot.slane %v8858_v12, 3  ;;  %v8859_v59 = vld [vmem:[#allocation82_spill] sm:$0xff]  ;;  %8860 = vst [vmem:[#allocation62_spill] sm:$0xff] %v6994_v34  ;;  %v8862_v28 = vld [vmem:[#allocation88_spill] sm:$0xff] }
 0x3fc   :  { %v828_v9 = vrot.slane %v8859_v59, 6  ;;  %v2219_v5 = vrot.slane %v5988_v20, 6  ;;  %v903_v10 = vsel %vm767_vm3, %v902_v0, %v901_v60  ;;  %v832_v18 = vrot.slane %v8861_v43, 4  ;;  %740 = vrot.lane.b32.xlu1 %v8772_v30, %s4494_s30  ;;  %v8863_v60 = vld [vmem:[#allocation80_spill] sm:$0xff]  ;;  %v8910_v41 = vld [vmem:[#allocation99_spill] sm:$0xff]  ;;  %v8922_v34 = vld [vmem:[#allocation126_spill] sm:$0xff] }
 0x3fd   :  { %728 = vrot.lane.b32.xlu0 %v8776_v55, %s4493_s11  ;;  %v2133_v39 = vrot.slane %v5958_v21, 7  ;;  %v3575_v55 = vrot.slane %v6060_v36, 7  ;;  %v905_v6 = vsel %vm770_vm4, %v904_v26, %v903_v10  ;;  %v908_v12 = vrot.slane %v8862_v28, 2  ;;  %v8864_v26 = vld [vmem:[#allocation93_spill] sm:$0xff]  ;;  %v8911_v23 = vld [vmem:[#allocation131_spill] sm:$0xff] }
 0x3fe   :  { %v2135_v59 = vrot.slane %v6041_v44, 6  ;;  %v3577_v20 = vrot.slane %v6200_v58, 6  ;;  %v827_v0 = vsel %vm761_vm1, %v826_v27, %v8863_v60  ;;  %v2218_v43 = vsel %vm761_vm1, %v2217_v25, %v6150_v2  ;;  %v7016_v28 = vpop.permute.xlu1 %3471  ;;  %v8923_v24 = vld [vmem:[#allocation123_spill] sm:$0xff] }
 0x3ff   :  { %v6999_v38 = vpop.permute.xlu0 %2047  ;;  %v2221_v21 = vrot.slane %v6119_v32, 5  ;;  %v3491_v36 = vrot.slane %v6099_v62, 7  ;;  %v830_v10 = vrot.slane %v8864_v26, 5  ;;  %8865 = vst [vmem:[#allocation39_spill] sm:$0xff] %v7016_v28  ;;  %v2220_v30 = vsel %vm764_vm2, %v2219_v5, %v2218_v43 }
 0x400   :  { %v2223_v44 = vrot.slane %v6238_v40, 4  ;;  %v3493_v58 = vrot.slane %v6230_v13, 6  ;;  %v2134_v27 = vsel %vm761_vm1, %v2133_v39, %v6139_v50  ;;  %v2137_v60 = vrot.slane %v6113_v14, 5  ;;  %742 = vrot.lane.b32.xlu1 %v8775_v11, %s4494_s30 }
 0x401   :  { %v3576_v62 = vsel %vm761_vm1, %v3575_v55, %v6340_v52  ;;  %v3579_v32 = vrot.slane %v6304_v42, 5  ;;  %v2136_v25 = vsel %vm764_vm2, %v2135_v59, %v2134_v27  ;;  %v2139_v40 = vrot.slane %v6272_v31, 4  ;;  %v8867_v59 = vld [vmem:[#allocation150_spill] sm:$0xff]  ;;  %v8873_v27 = vld [vmem:[#allocation164_spill] sm:$0xff] }
 0x402   :  { %v3578_v13 = vsel %vm764_vm2, %v3577_v20, %v3576_v62  ;;  %v3581_v50 = vrot.slane %v6493_v29, 4  ;;  %v829_v14 = vsel %vm764_vm2, %v828_v9, %v827_v0  ;;  %v2222_v5 = vsel %vm767_vm3, %v2221_v21, %v2220_v30  ;;  %v7042_v55 = vpop.permute.xlu1 %1977  ;;  %v8868_v29 = vld [vmem:[#allocation132_spill] sm:$0xff]  ;;  %v8869_v0 = vld [vmem:[#allocation137_spill] sm:$0xff] }
 0x403   :  { %v7024_v2 = vpop.permute.xlu0 %2075  ;;  %v3492_v52 = vsel %vm761_vm1, %v3491_v36, %v6328_v8  ;;  %v3495_v42 = vrot.slane %v6294_v46, 5  ;;  %v831_v39 = vsel %vm767_vm3, %v830_v10, %v829_v14  ;;  %v2224_v11 = vsel %vm770_vm4, %v2223_v44, %v2222_v5  ;;  %v8871_v8 = vld [vmem:[#allocation156_spill] sm:$0xff]  ;;  %v8872_v44 = vld [vmem:[#allocation170_spill] sm:$0xff] }
 0x404   :  { %8866 = vst [vmem:[#allocation26_spill] sm:$0xff] %v7024_v2  ;;  %v3494_v31 = vsel %vm764_vm2, %v3493_v58, %v3492_v52  ;;  %v3497_v20 = vrot.slane %v8867_v59, 4  ;;  %v2225_v43 = vrot.slane %v8868_v29, 3  ;;  %v2138_v9 = vsel %vm767_vm3, %v2137_v60, %v2136_v25  ;;  %726 = vrot.lane.b32.xlu1 %v8773_v45, %s4493_s11  ;;  %v8874_v60 = vld [vmem:[#allocation188_spill] sm:$0xff]  ;;  %v8875_v5 = vld [vmem:[#allocation178_spill] sm:$0xff] }
 0x405   :  { %v2141_v21 = vrot.slane %v8869_v0, 3  ;;  %v3580_v46 = vsel %vm767_vm3, %v3579_v32, %v3578_v13  ;;  %v2227_v36 = vrot.slane %v8871_v8, 2  ;;  %v2140_v10 = vsel %vm770_vm4, %v2139_v40, %v2138_v9  ;;  %v8876_v13 = vld [vmem:[#allocation89_spill] sm:$0xff]  ;;  %v8881_v0 = vld [vmem:[#allocation95_spill] sm:$0xff]  ;;  %v8886_v8 = vld [vmem:[#allocation50_spill] sm:$0xff] }
 0x406   :  { %v3582_v30 = vsel %vm770_vm4, %v3581_v50, %v3580_v46  ;;  %v3583_v58 = vrot.slane %v8872_v44, 3  ;;  %v2143_v62 = vrot.slane %v8873_v27, 2  ;;  %v3585_v25 = vrot.slane %v8874_v60, 2  ;;  %v7064_v29 = vpop.permute.xlu1 %2005 }
 0x407   :  { %v7049_v26 = vpop.permute.xlu0 %2099  ;;  %v3496_v14 = vsel %vm767_vm3, %v3495_v42, %v3494_v31  ;;  %v3499_v52 = vrot.slane %v8875_v5, 3  ;;  %v907_v32 = vsel %vm773_vm5, %v906_v17, %v905_v6  ;;  %v910_v59 = vrot.slane %v8876_v13, 7  ;;  %v8893_v5 = vld [vmem:[#allocation98_spill] sm:$0xff]  ;;  %v8895_v13 = vld [vmem:[#allocation83_spill] sm:$0xff]  ;;  %v8903_v6 = vld [vmem:[#allocation108_spill] sm:$0xff] }
 0x408   :  { %8870 = vst [vmem:[#allocation31_spill] sm:$0xff] %v7049_v26  ;;  %v3498_v45 = vsel %vm770_vm4, %v3497_v20, %v3496_v14  ;;  %v3501_v40 = vrot.slane %v6720_v37, 2  ;;  %v7072_v50 = vsel %vm776_vm6, %v824_v35, %v6990_v7  ;;  %v7075_v42 = vsel %vm776_vm6, %v908_v12, %v907_v32  ;;  %v8883_v35 = vld [vmem:[#allocation19_spill] sm:$0xff]  ;;  %v8917_v17 = vld [vmem:[#allocation121_spill] sm:$0xff]  ;;  %v8927_v26 = vld [vmem:[#allocation138_spill] sm:$0xff] }
 0x409   :  { %8877 = vst [vmem:[#allocation45_spill] sm:$0xff] %v7072_v50  ;;  %8878 = vst [vmem:[#allocation48_spill] sm:$0xff] %v7075_v42  ;;  %v7078_v31 = vsel %vm770_vm4, %v832_v18, %v831_v39  ;;  %v7085_v20 = vsel %vm761_vm1, %v910_v59, %v8881_v0  ;;  %v2226_v37 = vsel %vm773_vm5, %v2225_v43, %v2224_v11  ;;  %758 = vrot.lane.b32.xlu1 %v8883_v35, %s4494_s30  ;;  %v8887_v43 = vld [vmem:[#allocation111_spill] sm:$0xff] }
 0x40a   :  { %8879 = vst [vmem:[#allocation38_spill] sm:$0xff] %v7078_v31  ;;  %8882 = vst [vmem:[#allocation52_spill] sm:$0xff] %v7085_v20  ;;  %v2142_v49 = vsel %vm773_vm5, %v2141_v21, %v2140_v10  ;;  %v3584_v7 = vsel %vm773_vm5, %v3583_v58, %v3582_v30  ;;  %v7093_v18 = vsel %vm776_vm6, %v2227_v36, %v2226_v37  ;;  %v2229_v11 = vrot.slane %v8886_v8, 7  ;;  %v8888_v10 = vld [vmem:[#allocation113_spill] sm:$0xff]  ;;  %v7105_v27 = vpop.permute.xlu1 %2033  ;;  %v8892_v14 = vld [vmem:[#allocation119_spill] sm:$0xff] }
 0x40b   :  { %v7081_v9 = vpop.permute.xlu0 %2131  ;;  %v7096_v12 = vsel %vm776_vm6, %v2143_v62, %v2142_v49  ;;  %v7099_v39 = vsel %vm776_vm6, %v3585_v25, %v3584_v7  ;;  %v3500_v46 = vsel %vm773_vm5, %v3499_v52, %v3498_v45  ;;  %v2241_v21 = vrot.slane %v8887_v43, 7  ;;  %v8890_v36 = vld [vmem:[#allocation101_spill] sm:$0xff]  ;;  %v8891_v62 = vld [vmem:[#allocation120_spill] sm:$0xff]  ;;  %v8898_v7 = vld [vmem:[#allocation55_spill] sm:$0xff] }
 0x40c   :  { %8884 = vst [vmem:[#allocation40_spill] sm:$0xff] %v7096_v12  ;;  %8885 = vst [vmem:[#allocation58_spill] sm:$0xff] %v7099_v39  ;;  %v2253_v44 = vrot.slane %v8888_v10, 7  ;;  %v7108_v30 = vsel %vm776_vm6, %v3501_v40, %v3500_v46  ;;  %v2145_v58 = vrot.slane %v8890_v36, 7  ;;  %v2157_v60 = vrot.slane %v8891_v62, 7  ;;  %v8896_v45 = vld [vmem:[#allocation117_spill] sm:$0xff] }
 0x40d   :  { %8889 = vst [vmem:[#allocation35_spill] sm:$0xff] %v7108_v30  ;;  %v2265_v25 = vrot.slane %v8892_v14, 7  ;;  %v2289_v32 = vrot.slane %v8893_v5, 7  ;;  %v2169_v59 = vrot.slane %v8895_v13, 7  ;;  %v2181_v0 = vrot.slane %v8896_v45, 7  ;;  %v8897_v37 = vld [vmem:[#allocation104_spill] sm:$0xff]  ;;  %730 = vrot.lane.b32.xlu1 %v8883_v35, %s4493_s11 }
 0x40e   :  { %v2231_v49 = vrot.slane %v8897_v37, 6  ;;  %v2243_v8 = vrot.slane %v8898_v7, 6  ;;  %v8899_v40 = vld [vmem:[#allocation64_spill] sm:$0xff]  ;;  %v8902_v14 = vld [vmem:[#allocation105_spill] sm:$0xff]  ;;  %v2159_v51 = vrot.slane %v8903_v6, 6  ;;  %v8905_v45 = vld [vmem:[#allocation90_spill] sm:$0xff]  ;;  %v7130_v7 = vpop.permute.xlu1 %2061  ;;  %v2230_v50 = vsel %vm761_vm1, %v2229_v11, %v8916_v61 }
 0x40f   :  { %v7114_v52 = vpop.permute.xlu0 %3347  ;;  %v2205_v46 = vrot.slane %v8899_v40, 7  ;;  %v8900_v43 = vld [vmem:[#allocation112_spill] sm:$0xff]  ;;  %v2267_v5 = vrot.slane %v8902_v14, 6  ;;  %v2291_v1 = vrot.slane %v8905_v45, 6  ;;  %8907 = vst [vmem:[#allocation41_spill] sm:$0xff] %v7130_v7  ;;  %v2183_v35 = vrot.slane %v8908_v22, 6 }
 0x410   :  { %8894 = vst [vmem:[#allocation65_spill] sm:$0xff] %v7114_v52  ;;  %v2147_v10 = vrot.slane %v8900_v43, 6  ;;  %v8901_v36 = vld [vmem:[#allocation100_spill] sm:$0xff]  ;;  %v8913_v6 = vld [vmem:[#allocation109_spill] sm:$0xff]  ;;  %v8915_v45 = vld [vmem:[#allocation115_spill] sm:$0xff]  ;;  %v2158_v33 = vsel %vm761_vm1, %v2157_v60, %v8923_v24  ;;  %v2232_v22 = vsel %vm764_vm2, %v2231_v49, %v2230_v50  ;;  %s4503_s11 = smov 42  }
 0x411   :  { %v2255_v62 = vrot.slane %v8901_v36, 6  ;;  %v8904_v13 = vld [vmem:[#allocation96_spill] sm:$0xff]  ;;  %v2146_v36 = vsel %vm761_vm1, %v2145_v58, %v8911_v23  ;;  %v2207_v42 = vrot.slane %v8913_v6, 6  ;;  %v8918_v31 = vld [vmem:[#allocation125_spill] sm:$0xff]  ;;  %v8919_v20 = vld [vmem:[#allocation114_spill] sm:$0xff]  ;;  %v2160_v50 = vsel %vm764_vm2, %v2159_v51, %v2158_v33 }
 0x412   :  { %v2171_v3 = vrot.slane %v8904_v13, 6  ;;  %v8906_v37 = vld [vmem:[#allocation116_spill] sm:$0xff]  ;;  %v8914_v13 = vld [vmem:[#allocation103_spill] sm:$0xff]  ;;  %v2148_v6 = vsel %vm764_vm2, %v2147_v10, %v2146_v36  ;;  %v7153_v52 = vpop.permute.xlu1 %2085  ;;  %v8930_v10 = vld [vmem:[#allocation130_spill] sm:$0xff] }
 0x413   :  { %v7137_v14 = vpop.permute.xlu0 %3375  ;;  %v8920_v30 = vld [vmem:[#allocation124_spill] sm:$0xff]  ;;  %v8921_v23 = vld [vmem:[#allocation127_spill] sm:$0xff]  ;;  %8924 = vst [vmem:[#allocation54_spill] sm:$0xff] %v7153_v52  ;;  %v2245_v36 = vrot.slane %v8930_v10, 5  ;;  %v8931_v7 = vld [vmem:[#allocation133_spill] sm:$0xff] }
 0x414   :  { %8912 = vst [vmem:[#allocation51_spill] sm:$0xff] %v7137_v14  ;;  %v2149_v39 = vrot.slane %v8920_v30, 5  ;;  %v2233_v14 = vrot.slane %v8922_v34, 5  ;;  %v8925_v61 = vld [vmem:[#allocation128_spill] sm:$0xff]  ;;  %v8926_v40 = vld [vmem:[#allocation135_spill] sm:$0xff]  ;;  %v2170_v30 = vsel %vm761_vm1, %v2169_v59, %v8927_v26  ;;  %v8929_v34 = vld [vmem:[#allocation129_spill] sm:$0xff] }
 0x415   :  { %v2161_v11 = vrot.slane %v8925_v61, 5  ;;  %v2242_v43 = vsel %vm761_vm1, %v2241_v21, %v8926_v40  ;;  %v2173_v24 = vrot.slane %v8931_v7, 5  ;;  %v8932_v60 = vld [vmem:[#allocation110_spill] sm:$0xff]  ;;  %v8933_v49 = vld [vmem:[#allocation140_spill] sm:$0xff]  ;;  %v2172_v7 = vsel %vm764_vm2, %v2171_v3, %v2170_v30 }
 0x416   :  { %v2254_v52 = vsel %vm761_vm1, %v2253_v44, %v8932_v60  ;;  %v2150_v61 = vsel %vm767_vm3, %v2149_v39, %v2148_v6  ;;  %v2182_v21 = vsel %vm761_vm1, %v2181_v0, %v8933_v49  ;;  %v8934_v40 = vld [vmem:[#allocation142_spill] sm:$0xff]  ;;  %v2234_v59 = vsel %vm767_vm3, %v2233_v14, %v2232_v22  ;;  %v7178_v56 = vpop.permute.xlu1 %2117  ;;  %v8939_v6 = vld [vmem:[#allocation148_spill] sm:$0xff] }
 0x417   :  { %v7161_v58 = vpop.permute.xlu0 %3403  ;;  %v2266_v26 = vsel %vm761_vm1, %v2265_v25, %v8934_v40  ;;  %v2244_v28 = vsel %vm764_vm2, %v2243_v8, %v2242_v43  ;;  %v8935_v10 = vld [vmem:[#allocation118_spill] sm:$0xff]  ;;  %8936 = vst [vmem:[#allocation42_spill] sm:$0xff] %v7178_v56  ;;  %v2256_v51 = vsel %vm764_vm2, %v2255_v62, %v2254_v52  ;;  %v2290_v25 = vsel %vm761_vm1, %v2289_v32, %v8939_v6  ;;  %v8941_v43 = vld [vmem:[#allocation136_spill] sm:$0xff]  ;;  %v8942_v62 = vld [vmem:[#allocation139_spill] sm:$0xff] }
 0x418   :  { %8928 = vst [vmem:[#allocation69_spill] sm:$0xff] %v7161_v58  ;;  %v2257_v58 = vrot.slane %v8935_v10, 5  ;;  %v8937_v44 = vld [vmem:[#allocation134_spill] sm:$0xff]  ;;  %v2162_v8 = vsel %vm767_vm3, %v2161_v11, %v2160_v50  ;;  %v2269_v14 = vrot.slane %v8941_v43, 5  ;;  %v2184_v3 = vsel %vm764_vm2, %v2183_v35, %v2182_v21  ;;  %v8944_v10 = vld [vmem:[#allocation141_spill] sm:$0xff]  ;;  %v8946_v35 = vld [vmem:[#allocation143_spill] sm:$0xff] }
 0x419   :  { %v2185_v39 = vrot.slane %v8937_v44, 5  ;;  %v8938_v33 = vld [vmem:[#allocation146_spill] sm:$0xff]  ;;  %v2268_v22 = vsel %vm764_vm2, %v2267_v5, %v2266_v26  ;;  %v2246_v30 = vsel %vm767_vm3, %v2245_v36, %v2244_v28  ;;  %v2174_v52 = vsel %vm767_vm3, %v2173_v24, %v2172_v7  ;;  %v8949_v7 = vld [vmem:[#allocation144_spill] sm:$0xff]  ;;  %v8951_v43 = vld [vmem:[#allocation147_spill] sm:$0xff] }
 0x41a   :  { %v2206_v0 = vsel %vm761_vm1, %v2205_v46, %v8938_v33  ;;  %v8943_v46 = vld [vmem:[#allocation122_spill] sm:$0xff]  ;;  %v2258_v32 = vsel %vm767_vm3, %v2257_v58, %v2256_v51  ;;  %v2293_v44 = vrot.slane %v8944_v10, 5  ;;  %v2292_v50 = vsel %vm764_vm2, %v2291_v1, %v2290_v25  ;;  %v7200_v33 = vpop.permute.xlu1 %3333  ;;  %v8950_v51 = vld [vmem:[#allocation145_spill] sm:$0xff]  ;;  %v8955_v10 = vld [vmem:[#allocation151_spill] sm:$0xff] }
 0x41b   :  { %v7186_v60 = vpop.permute.xlu0 %3431  ;;  %v2209_v40 = vrot.slane %v8943_v46, 5  ;;  %v2208_v11 = vsel %vm764_vm2, %v2207_v42, %v2206_v0  ;;  %8945 = vst [vmem:[#allocation59_spill] sm:$0xff] %v7200_v33  ;;  %v2186_v5 = vsel %vm767_vm3, %v2185_v39, %v2184_v3  ;;  %v2270_v28 = vsel %vm767_vm3, %v2269_v14, %v2268_v22  ;;  %v8947_v24 = vld [vmem:[#allocation154_spill] sm:$0xff]  ;;  %v8952_v0 = vld [vmem:[#allocation157_spill] sm:$0xff]  ;;  %v8954_v22 = vld [vmem:[#allocation159_spill] sm:$0xff] }
 0x41c   :  { %8940 = vst [vmem:[#allocation47_spill] sm:$0xff] %v7186_v60  ;;  %v3589_v36 = vrot.slane %v8946_v35, 6  ;;  %v2235_v21 = vrot.slane %v8947_v24, 4  ;;  %v3601_v6 = vrot.slane %v8950_v51, 6  ;;  %v3613_v42 = vrot.slane %v8951_v43, 6  ;;  %v8953_v3 = vld [vmem:[#allocation149_spill] sm:$0xff] }
 0x41d   :  { %v2247_v1 = vrot.slane %v8952_v0, 4  ;;  %v2210_v25 = vsel %vm767_vm3, %v2209_v40, %v2208_v11  ;;  %v2294_v39 = vsel %vm767_vm3, %v2293_v44, %v2292_v50  ;;  %v2259_v46 = vrot.slane %v8954_v22, 4  ;;  %v8956_v24 = vld [vmem:[#allocation152_spill] sm:$0xff]  ;;  %v8958_v33 = vld [vmem:[#allocation161_spill] sm:$0xff]  ;;  %v8962_v50 = vld [vmem:[#allocation166_spill] sm:$0xff] }
 0x41e   :  { %v3505_v35 = vrot.slane %v8955_v10, 6  ;;  %v2271_v51 = vrot.slane %v8958_v33, 4  ;;  %v7220_v60 = vpop.permute.xlu1 %3361  ;;  %v8960_v43 = vld [vmem:[#allocation153_spill] sm:$0xff]  ;;  %v7224_v40 = vsel %vm770_vm4, %v2235_v21, %v2234_v59  ;;  %v2295_v14 = vrot.slane %v8962_v50, 4  ;;  %v8964_v10 = vld [vmem:[#allocation155_spill] sm:$0xff]  ;;  %v8965_v49 = vld [vmem:[#allocation158_spill] sm:$0xff] }
 0x41f   :  { %v7206_v26 = vpop.permute.xlu0 %3441  ;;  %8959 = vst [vmem:[#allocation75_spill] sm:$0xff] %v7220_v60  ;;  %v3517_v0 = vrot.slane %v8960_v43, 6  ;;  %v8961_v44 = vld [vmem:[#allocation165_spill] sm:$0xff]  ;;  %v3529_v56 = vrot.slane %v8964_v10, 6  ;;  %v3541_v2 = vrot.slane %v8965_v49, 6  ;;  %v8966_v33 = vld [vmem:[#allocation167_spill] sm:$0xff]  ;;  %v7238_v59 = vsel %vm770_vm4, %v2259_v46, %v2258_v32 }
 0x420   :  { %8948 = vst [vmem:[#allocation57_spill] sm:$0xff] %v7206_v26  ;;  %v8957_v26 = vld [vmem:[#allocation162_spill] sm:$0xff]  ;;  %v2163_v11 = vrot.slane %v8961_v44, 4  ;;  %v2175_v60 = vrot.slane %v8966_v33, 4  ;;  %v3565_v43 = vrot.slane %v8967_v16, 6  ;;  %v8968_v21 = vld [vmem:[#allocation169_spill] sm:$0xff] }
 0x421   :  { %v2151_v58 = vrot.slane %v8957_v26, 4  ;;  %v7233_v26 = vsel %vm770_vm4, %v2247_v1, %v2246_v30  ;;  %v2187_v44 = vrot.slane %v8968_v21, 4  ;;  %v8969_v12 = vld [vmem:[#allocation176_spill] sm:$0xff]  ;;  %v8970_v50 = vrot.slane %v8914_v13, 7  ;;  %v8971_v49 = vld [vmem:[#allocation163_spill] sm:$0xff]  ;;  %v8975_v13 = vld [vmem:[#allocation174_spill] sm:$0xff] }
 0x422   :  { %v7249_v30 = vsel %vm770_vm4, %v2271_v51, %v2270_v28  ;;  %v8972_v33 = vld [vmem:[#allocation179_spill] sm:$0xff]  ;;  %v8973_v16 = vrot.slane %v8906_v37, 7  ;;  %v7256_v46 = vpop.permute.xlu1 %3389  ;;  %v7259_v21 = vsel %vm770_vm4, %v2163_v11, %v2162_v8  ;;  %v8977_v28 = vrot.slane %v8917_v17, 7 }
 0x423   :  { %v7228_v22 = vpop.permute.xlu0 %3455  ;;  %v7246_v10 = vsel %vm770_vm4, %v2151_v58, %v2150_v61  ;;  %8974 = vst [vmem:[#allocation71_spill] sm:$0xff] %v7256_v46  ;;  %v2211_v61 = vrot.slane %v8975_v13, 4  ;;  %v8976_v58 = vld [vmem:[#allocation181_spill] sm:$0xff]  ;;  %v7272_v37 = vsel %vm770_vm4, %v2175_v60, %v2174_v52  ;;  %v8980_v1 = vld [vmem:[#allocation171_spill] sm:$0xff]  ;;  %v8998_v13 = vld [vmem:[#allocation196_spill] sm:$0xff] }
 0x424   :  { %8963 = vst [vmem:[#allocation67_spill] sm:$0xff] %v7228_v22  ;;  %v3504_v22 = vsel %vm761_vm1, %v8970_v50, %v8969_v12  ;;  %v3588_v32 = vsel %vm761_vm1, %v8973_v16, %v8972_v33  ;;  %v7262_v12 = vsel %vm770_vm4, %v2295_v14, %v2294_v39  ;;  %v3516_v51 = vsel %vm761_vm1, %v8977_v28, %v8976_v58  ;;  %v8979_v33 = vld [vmem:[#allocation168_spill] sm:$0xff]  ;;  %v8982_v46 = vld [vmem:[#allocation173_spill] sm:$0xff]  ;;  %v8983_v28 = vld [vmem:[#allocation175_spill] sm:$0xff] }
 0x425   :  { %v3507_v16 = vrot.slane %v8979_v33, 5  ;;  %v3591_v8 = vrot.slane %v8980_v1, 5  ;;  %v3506_v11 = vsel %vm764_vm2, %v3505_v35, %v3504_v22  ;;  %v7278_v39 = vsel %vm770_vm4, %v2187_v44, %v2186_v5  ;;  %v8981_v14 = vld [vmem:[#allocation172_spill] sm:$0xff]  ;;  %v8984_v52 = vld [vmem:[#allocation183_spill] sm:$0xff] }
 0x426   :  { %v3519_v17 = vrot.slane %v8982_v46, 5  ;;  %v3590_v58 = vsel %vm764_vm2, %v3589_v36, %v3588_v32  ;;  %v3518_v60 = vsel %vm764_vm2, %v3517_v0, %v3516_v51  ;;  %v8985_v33 = vrot.slane %v8909_v57, 7  ;;  %v7293_v22 = vpop.permute.xlu1 %3417  ;;  %v8988_v32 = vld [vmem:[#allocation177_spill] sm:$0xff]  ;;  %v8989_v46 = vld [vmem:[#allocation187_spill] sm:$0xff] }
 0x427   :  { %v7269_v50 = vpop.permute.xlu0 %3487  ;;  %v8987_v35 = vrot.slane %v8918_v31, 7  ;;  %v7296_v44 = vsel %vm770_vm4, %v2211_v61, %v2210_v25  ;;  %v7299_v36 = vsel %vm767_vm3, %v3507_v16, %v3506_v11  ;;  %v3531_v0 = vrot.slane %v8988_v32, 5  ;;  %v8994_v16 = vld [vmem:[#allocation192_spill] sm:$0xff] }
 0x428   :  { %8978 = vst [vmem:[#allocation36_spill] sm:$0xff] %v7269_v50  ;;  %v3603_v50 = vrot.slane %v8983_v28, 5  ;;  %v3600_v1 = vsel %vm761_vm1, %v8985_v33, %v8984_v52  ;;  %v8990_v57 = vrot.slane %v8910_v41, 7  ;;  %v7309_v31 = vsel %vm767_vm3, %v3591_v8, %v3590_v58  ;;  %v8992_v33 = vld [vmem:[#allocation190_spill] sm:$0xff] }
 0x429   :  { %v3528_v5 = vsel %vm761_vm1, %v8987_v35, %v8986_v53  ;;  %v8991_v53 = vld [vmem:[#allocation180_spill] sm:$0xff]  ;;  %v8993_v25 = vrot.slane %v8921_v23, 7  ;;  %v8995_v11 = vrot.slane %v8915_v45, 7  ;;  %v7321_v41 = vsel %vm767_vm3, %v3519_v17, %v3518_v60  ;;  %v8996_v58 = vld [vmem:[#allocation182_spill] sm:$0xff] }
 0x42a   :  { %v3612_v51 = vsel %vm761_vm1, %v8990_v57, %v8989_v46  ;;  %v3615_v52 = vrot.slane %v8991_v53, 5  ;;  %v3602_v32 = vsel %vm764_vm2, %v3601_v6, %v3600_v1  ;;  %v3530_v8 = vsel %vm764_vm2, %v3529_v56, %v3528_v5  ;;  %v8997_v53 = vld [vmem:[#allocation184_spill] sm:$0xff]  ;;  %v7336_v60 = vpop.permute.xlu1 %3435  ;;  %v9003_v1 = vld [vmem:[#allocation193_spill] sm:$0xff] }
 0x42b   :  { %v7306_v28 = vpop.permute.xlu0 %2101  ;;  %v3540_v61 = vsel %vm761_vm1, %v8993_v25, %v8992_v33  ;;  %v3624_v35 = vsel %vm761_vm1, %v8995_v11, %v8994_v16  ;;  %v3543_v46 = vrot.slane %v8996_v58, 5  ;;  %v3614_v57 = vsel %vm764_vm2, %v3613_v42, %v3612_v51  ;;  %v9000_v25 = vld [vmem:[#allocation198_spill] sm:$0xff]  ;;  %v9004_v51 = vld [vmem:[#allocation195_spill] sm:$0xff] }
 0x42c   :  { %v3627_v23 = vrot.slane %v8997_v53, 5  ;;  %v8999_v33 = vrot.slane %v8929_v34, 7  ;;  %v9001_v16 = vrot.slane %v8919_v20, 7  ;;  %v3542_v56 = vsel %vm764_vm2, %v3541_v2, %v3540_v61  ;;  %v9006_v58 = vld [vmem:[#allocation186_spill] sm:$0xff]  ;;  %v9008_v2 = vld [vmem:[#allocation189_spill] sm:$0xff] }
 0x42d   :  { %v9002_v6 = vrot.slane %v8953_v3, 6  ;;  %v2237_v5 = vrot.slane %v9003_v1, 3  ;;  %v2249_v11 = vrot.slane %v9004_v51, 3  ;;  %v7348_v20 = vsel %vm767_vm3, %v3531_v0, %v3530_v8 }
 0x42e   :  { %v3564_v45 = vsel %vm761_vm1, %v8999_v33, %v8998_v13  ;;  %v3648_v17 = vsel %vm761_vm1, %v9001_v16, %v9000_v25  ;;  %v3604_v13 = vsel %vm767_vm3, %v3603_v50, %v3602_v32  ;;  %v9007_v33 = vld [vmem:[#allocation197_spill] sm:$0xff]  ;;  %v3567_v61 = vrot.slane %v9008_v2, 5  ;;  %v9011_v32 = vld [vmem:[#allocation191_spill] sm:$0xff]  ;;  %v9012_v2 = vld [vmem:[#allocation194_spill] sm:$0xff] }
 0x42f   :  { %v3626_v42 = vsel %vm764_vm2, %v9002_v6, %v3624_v35  ;;  %v7344_v34 = vpop.permute.xlu0 %3349  ;;  %v2261_v25 = vrot.slane %v9007_v33, 3  ;;  %v3566_v3 = vsel %vm764_vm2, %v3565_v43, %v3564_v45  ;;  %v9009_v35 = vrot.slane %v8956_v24, 6  ;;  %v9010_v6 = vld [vmem:[#allocation199_spill] sm:$0xff]  ;;  %v7366_v33 = vpop.permute.xlu1 %3449 }
 0x430   :  { %9005 = vst [vmem:[#allocation44_spill] sm:$0xff] %v7344_v34  ;;  %v2273_v1 = vrot.slane %v9010_v6, 3  ;;  %v3616_v51 = vsel %vm767_vm3, %v3615_v52, %v3614_v57  ;;  %v7360_v50 = vsel %vm767_vm3, %v3543_v46, %v3542_v56  ;;  %v7363_v0 = vsel %vm767_vm3, %v3627_v23, %v3626_v42  ;;  %v9014_v42 = vld [vmem:[#allocation18_spill] sm:$0xff]  ;;  %v9017_v6 = vld [vmem:[#allocation13_spill] sm:$0xff] }
 0x431   :  { %v3650_v16 = vsel %vm764_vm2, %v9009_v35, %v3648_v17  ;;  %v3651_v8 = vrot.slane %v9011_v32, 5  ;;  %v2238_v24 = vsel %vm773_vm5, %v2237_v5, %v7224_v40  ;;  %v2250_v45 = vsel %vm773_vm5, %v2249_v11, %v7233_v26  ;;  %v9013_v17 = vld [vmem:[#allocation22_spill] sm:$0xff]  ;;  %v9016_v5 = vld [vmem:[#allocation12_spill] sm:$0xff] }
 0x432   :  { %v2153_v52 = vrot.slane %v9013_v17, 3  ;;  %v7377_v46 = vsel %vm767_vm3, %v3567_v61, %v3566_v3  ;;  %v2262_v56 = vsel %vm773_vm5, %v2261_v25, %v7238_v59  ;;  %v9015_v35 = vrot.slane %v8949_v7, 7  ;;  %v9018_v3 = vld [vmem:[#allocation20_spill] sm:$0xff]  ;;  %v9020_v17 = vld [vmem:[#allocation17_spill] sm:$0xff] }
 0x433   :  { %v7374_v57 = vpop.permute.xlu0 %3377  ;;  %v7380_v23 = vsel %vm767_vm3, %v3651_v8, %v3650_v16  ;;  %v2165_v26 = vrot.slane %v9016_v5, 3  ;;  %v7391_v11 = vsel %vm773_vm5, %v2273_v1, %v7249_v30  ;;  %v2177_v61 = vrot.slane %v9017_v6, 3  ;;  %v9019_v16 = vld [vmem:[#allocation24_spill] sm:$0xff]  ;;  %v9021_v59 = vld [vmem:[#allocation21_spill] sm:$0xff]  ;;  %v7399_v53 = vpop.permute.xlu1 %3473 }
 0x434   :  { %v2194_v40 = vsel %vm761_vm1, %v9015_v35, %v9014_v42  ;;  %v2197_v32 = vrot.slane %v9018_v3, 5  ;;  %v2189_v8 = vrot.slane %v9019_v16, 3  ;;  %v2297_v43 = vrot.slane %v9020_v17, 3  ;;  %9022 = vst [vmem:[#allocation61_spill] sm:$0xff] %v7399_v53  ;;  %v9023_v35 = vld [vmem:[#allocation16_spill] sm:$0xff] }
 0x435   :  { %v3593_v25 = vrot.slane %v9021_v59, 4  ;;  %v2263_v7 = vrot.slane %v6999_v38, 2  ;;  %v2154_v42 = vsel %vm773_vm5, %v2153_v52, %v7246_v10  ;;  %v2281_v30 = vrot.slane %v9023_v35, 5  ;;  %v9025_v16 = vld [vmem:[#allocation60_spill] sm:$0xff]  ;;  %v9027_v59 = vld [vmem:[#allocation25_spill] sm:$0xff] }
 0x436   :  { %v9024_v1 = vrot.slane %v8981_v14, 6  ;;  %v2179_v6 = vrot.slane %v7105_v27, 2  ;;  %v9026_v17 = vrot.slane %v8942_v62, 7  ;;  %v3605_v53 = vrot.slane %v9027_v59, 4 }
 0x437   :  { %v7408_v3 = vpop.permute.xlu0 %3405  ;;  %v2239_v34 = vrot.slane %v6942_v48, 2  ;;  %v2251_v10 = vrot.slane %v6970_v4, 2  ;;  %v2166_v14 = vsel %vm773_vm5, %v2165_v26, %v7259_v21  ;;  %v2178_v52 = vsel %vm773_vm5, %v2177_v61, %v7272_v37  ;;  %v7434_v21 = vpop.permute.xlu1 %2087 }
 0x438   :  { %v2196_v5 = vsel %vm764_vm2, %v9024_v1, %v2194_v40  ;;  %v2278_v38 = vsel %vm761_vm1, %v9026_v17, %v9025_v16  ;;  %v2155_v27 = vrot.slane %v7042_v55, 2  ;;  %v2167_v40 = vrot.slane %v7064_v29, 2 }
 0x439   :  { %v2190_v62 = vsel %vm773_vm5, %v2189_v8, %v7278_v39  ;;  %v2298_v35 = vsel %vm773_vm5, %v2297_v43, %v7262_v12  ;;  %v7429_v48 = vsel %vm770_vm4, %v3593_v25, %v7309_v31  ;;  %v7432_v4 = vsel %vm776_vm6, %v2263_v7, %v2262_v56  ;;  %v9029_v39 = vld [vmem:[#allocation27_spill] sm:$0xff] }
 0x43a   :  { %v7437_v37 = vsel %vm767_vm3, %v2197_v32, %v2196_v5  ;;  %v9028_v55 = vrot.slane %v8971_v49, 6  ;;  %v3617_v26 = vrot.slane %v9029_v39, 4  ;;  %v7444_v12 = vsel %vm776_vm6, %v2179_v6, %v2178_v52  ;;  %v9030_v31 = vld [vmem:[#allocation43_spill] sm:$0xff]  ;;  %v9036_v52 = vld [vmem:[#allocation42_spill] sm:$0xff] }
 0x43b   :  { %v7446_v43 = vpop.permute.xlu0 %3433  ;;  %v2213_v61 = vrot.slane %v9030_v31, 3  ;;  %v7450_v56 = vsel %vm770_vm4, %v3605_v53, %v3604_v13  ;;  %v7453_v8 = vsel %vm776_vm6, %v2239_v34, %v2238_v24  ;;  %v7456_v32 = vsel %vm776_vm6, %v2251_v10, %v2250_v45  ;;  %v7472_v45 = vpop.permute.xlu1 %3335  ;;  %v9038_v31 = vld [vmem:[#allocation41_spill] sm:$0xff] }
 0x43c   :  { %v2280_v29 = vsel %vm764_vm2, %v9028_v55, %v2278_v38  ;;  %v3629_v49 = vrot.slane %v6856_v54, 4  ;;  %v7460_v25 = vsel %vm776_vm6, %v2155_v27, %v2154_v42  ;;  %v2465_v7 = vcombine.low %v7453_v8, %v7432_v4  ;;  %v9033_v38 = vld [vmem:[#allocation40_spill] sm:$0xff] }
 0x43d   :  { %v7465_v1 = vsel %vm776_vm6, %v2167_v40, %v2166_v14  ;;  %v2282_v13 = vsel %vm767_vm3, %v2281_v30, %v2280_v29  ;;  %v3509_v53 = vrot.slane %v6874_v15, 4  ;;  %v3521_v34 = vrot.slane %v6898_v19, 4  ;;  %v9032_v30 = vld [vmem:[#allocation56_spill] sm:$0xff]  ;;  %v9035_v14 = vld [vmem:[#allocation26_spill] sm:$0xff] }
 0x43e   :  { %9031 = vst [vmem:[#allocation66_spill] sm:$0xff] %v7465_v1  ;;  %v2331_v24 = vcombine.low %v7460_v25, %v7444_v12  ;;  %v3618_v54 = vsel %vm770_vm4, %v3617_v26, %v3616_v51  ;;  %v3653_v42 = vrot.slane %v6907_v63, 4  ;;  %v2449_v5 = vcombine.low %v7093_v18, %v7456_v32  ;;  %v9034_v51 = vld [vmem:[#allocation53_spill] sm:$0xff]  ;;  %v9037_v40 = vld [vmem:[#allocation28_spill] sm:$0xff] }
 0x43f   :  { %v2299_v6 = vrot.slane %v7081_v9, 2  ;;  %v7479_v16 = vpop.permute.xlu0 %3457  ;;  %v2214_v15 = vsel %vm773_vm5, %v2213_v61, %v7296_v44  ;;  %v3533_v19 = vrot.slane %v6933_v47, 4  ;;  %v3545_v17 = vrot.slane %v9032_v30, 4  ;;  %v7502_v39 = vpop.permute.xlu1 %3363  ;;  %v9045_v30 = vld [vmem:[#allocation51_spill] sm:$0xff] }
 0x440   :  { %v2315_v59 = vcombine.low %v9033_v38, %v7465_v1  ;;  %v3630_v63 = vsel %vm770_vm4, %v3629_v49, %v7363_v0  ;;  %v7490_v10 = vrot.slane %v2465_v7, %v9034_v51  ;;  %v2275_v9 = vrot.slane %v9035_v14, 2  ;;  %v9059_v38 = vld [vmem:[#allocation67_spill] sm:$0xff]  ;;  %v9060_v1 = vld [vmem:[#allocation44_spill] sm:$0xff] }
 0x441   :  { %v2215_v27 = vrot.slane %v9036_v52, 2  ;;  %v3510_v44 = vsel %vm770_vm4, %v3509_v53, %v7299_v36  ;;  %v7498_v47 = vsel %vm770_vm4, %v3521_v34, %v7321_v41  ;;  %v2339_v29 = vrot.slane %v2331_v24, %v9034_v51  ;;  %v9040_v53 = vld [vmem:[#allocation39_spill] sm:$0xff] }
 0x442   :  { %v7506_v0 = vsel %vm770_vm4, %v3653_v42, %v7380_v23  ;;  %v7509_v26 = vrot.slane %v2449_v5, %v9034_v51  ;;  %v2191_v61 = vrot.slane %v9038_v31, 2  ;;  %v7513_v36 = vsel %vm776_vm6, %v2299_v6, %v2298_v35  ;;  %v9042_v42 = vld [vmem:[#allocation31_spill] sm:$0xff] }
 0x443   :  { %9039 = vst [vmem:[#allocation77_spill] sm:$0xff] %v7513_v36  ;;  %v7515_v41 = vpop.permute.xlu0 %3489  ;;  %v3534_v49 = vsel %vm770_vm4, %v3533_v19, %v7348_v20  ;;  %v3546_v7 = vsel %vm770_vm4, %v3545_v17, %v7360_v50  ;;  %v3569_v34 = vrot.slane %v9040_v53, 4  ;;  %v2323_v23 = vrot.slane %v2315_v59, %v9034_v51  ;;  %v9044_v50 = vld [vmem:[#allocation65_spill] sm:$0xff]  ;;  %v7537_v59 = vpop.permute.xlu1 %3391 }
 0x444   :  { %v7525_v24 = vsel %vm776_vm6, %v2275_v9, %v7391_v11  ;;  %v2283_v5 = vrot.slane %v9042_v42, 4  ;;  %v7529_v35 = vsel %vm776_vm6, %v2215_v27, %v2214_v15  ;;  %v2512_v6 = vcombine.low %v7509_v26, %v7490_v10  ;;  %v9047_v9 = vld [vmem:[#allocation54_spill] sm:$0xff]  ;;  %v9048_v15 = vld [vmem:[#allocation69_spill] sm:$0xff] }
 0x445   :  { %9041 = vst [vmem:[#allocation68_spill] sm:$0xff] %v7525_v24  ;;  %9043 = vst [vmem:[#allocation73_spill] sm:$0xff] %v7529_v35  ;;  %v2481_v20 = vcombine.low %v7525_v24, %v7513_v36  ;;  %v3595_v19 = vrot.slane %v9044_v50, 3  ;;  %v3607_v17 = vrot.slane %v9045_v30, 3  ;;  %v2378_v14 = vcombine.low %v2323_v23, %v2339_v29  ;;  %v9049_v42 = vld [vmem:[#allocation62_spill] sm:$0xff]  ;;  %v9050_v30 = vld [vmem:[#allocation47_spill] sm:$0xff] }
 0x446   :  { %v7540_v11 = vsel %vm776_vm6, %v2191_v61, %v2190_v62  ;;  %v2199_v52 = vrot.slane %v9047_v9, 4  ;;  %v3619_v27 = vrot.slane %v9048_v15, 3  ;;  %v2379_v53 = vcombine.high %v2323_v23, %v2339_v29  ;;  %v9051_v15 = vld [vmem:[#allocation46_spill] sm:$0xff] }
 0x447   :  { %9046 = vst [vmem:[#allocation84_spill] sm:$0xff] %v7540_v11  ;;  %v2104_v31 = vpop.permute.xlu0 %2103  ;;  %v3553_v55 = vrot.slane %v9049_v42, 6  ;;  %v2347_v50 = vcombine.low %v7540_v11, %v7529_v35  ;;  %v3631_v36 = vrot.slane %v9050_v30, 3  ;;  %v3570_v62 = vsel %vm770_vm4, %v3569_v34, %v7377_v46  ;;  %v7565_v24 = vpop.permute.xlu1 %3419  ;;  %v9052_v34 = vld [vmem:[#allocation59_spill] sm:$0xff] }
 0x448   :  { %v2284_v9 = vsel %vm770_vm4, %v2283_v5, %v2282_v13  ;;  %v7556_v29 = vrot.slane %v2512_v6, %v9051_v15  ;;  %v7559_v23 = vrot.slane %v2481_v20, %v9034_v51  ;;  %v3596_v42 = vsel %vm773_vm5, %v3595_v19, %v7429_v48 }
 0x449   :  { %v3608_v30 = vsel %vm773_vm5, %v3607_v17, %v7450_v56  ;;  %v7568_v46 = vrot.slane %v2378_v14, %v9051_v15  ;;  %v2200_v13 = vsel %vm770_vm4, %v2199_v52, %v7437_v37  ;;  %v3511_v5 = vrot.slane %v9052_v34, 3  ;;  %v9053_v56 = vld [vmem:[#allocation75_spill] sm:$0xff]  ;;  %v9055_v37 = vld [vmem:[#allocation36_spill] sm:$0xff]  ;;  %v9057_v34 = vld [vmem:[#allocation57_spill] sm:$0xff] }
 0x44a   :  { %v3620_v6 = vsel %vm773_vm5, %v3619_v27, %v3618_v54  ;;  %v7575_v61 = vrot.slane %v2379_v53, %v9051_v15  ;;  %v7578_v48 = vrot.slane %v2347_v50, %v9034_v51  ;;  %v3523_v19 = vrot.slane %v9053_v56, 3  ;;  %v9054_v14 = vld [vmem:[#allocation71_spill] sm:$0xff] }
 0x44b   :  { %v3460_v20 = vpop.permute.xlu0 %3459  ;;  %v3632_v17 = vsel %vm773_vm5, %v3631_v36, %v3630_v63  ;;  %v3535_v11 = vrot.slane %v9054_v14, 3  ;;  %v3547_v35 = vrot.slane %v7293_v22, 3  ;;  %v3655_v52 = vrot.slane %v9055_v37, 3  ;;  %v7596_v14 = vpop.permute.xlu1 %3443 }
 0x44c   :  { %v9056_v54 = vrot.slane %v9006_v58, 7  ;;  %v2285_v53 = vrot.slane %v7306_v28, 3  ;;  %v3555_v50 = vrot.slane %v9057_v34, 5  ;;  %v9058_v56 = vrot.slane %v9012_v2, 7 }
 0x44d   :  { %v3609_v36 = vrot.slane %v7374_v57, 2  ;;  %v2287_v22 = vrot.slane %v2104_v31, 2  ;;  %v3512_v37 = vsel %vm773_vm5, %v3511_v5, %v3510_v44  ;;  %v3639_v58 = vrot.slane %v9059_v38, 5  ;;  %v9062_v5 = vld [vmem:[#allocation61_spill] sm:$0xff] }
 0x44e   :  { %v3636_v27 = vsel %vm761_vm1, %v9056_v54, %v7366_v33  ;;  %v3552_v63 = vsel %vm761_vm1, %v9058_v56, %v7336_v60  ;;  %v3597_v33 = vrot.slane %v9060_v1, 2  ;;  %v3621_v28 = vrot.slane %v7408_v3, 2 }
 0x44f   :  { %v3462_v54 = vpop.permute.xlu0 %3461  ;;  %v3524_v34 = vsel %vm773_vm5, %v3523_v19, %v7498_v47  ;;  %v3536_v2 = vsel %vm773_vm5, %v3535_v11, %v3534_v49  ;;  %v9061_v60 = vrot.slane %v9037_v40, 6  ;;  %v3537_v31 = vrot.slane %v7537_v59, 2  ;;  %v3476_v59 = vpop.permute.xlu1 %3475 }
 0x450   :  { %v3548_v44 = vsel %vm773_vm5, %v3547_v35, %v3546_v7  ;;  %v3554_v38 = vsel %vm764_vm2, %v3553_v55, %v3552_v63  ;;  %v3656_v1 = vsel %vm773_vm5, %v3655_v52, %v7506_v0  ;;  %v2286_v3 = vsel %vm773_vm5, %v2285_v53, %v2284_v9  ;;  %v9063_v52 = vld [vmem:[#allocation58_spill] sm:$0xff] }
 0x451   :  { %v3638_v57 = vsel %vm764_vm2, %v9061_v60, %v3636_v27  ;;  %v3571_v56 = vrot.slane %v9062_v5, 3  ;;  %v7616_v47 = vsel %vm776_vm6, %v3609_v36, %v3608_v30  ;;  %v3513_v40 = vrot.slane %v7472_v45, 2 }
 0x452   :  { %v7620_v49 = vsel %vm776_vm6, %v2287_v22, %v2286_v3  ;;  %v3640_v7 = vsel %vm767_vm3, %v3639_v58, %v3638_v57  ;;  %v7624_v55 = vsel %vm776_vm6, %v3597_v33, %v3596_v42  ;;  %v7627_v0 = vsel %vm776_vm6, %v3621_v28, %v3620_v6 }
 0x453   :  { %v3525_v35 = vrot.slane %v7502_v39, 2  ;;  %v2201_v11 = vrot.slane %v7434_v21, 3  ;;  %v7632_v9 = vsel %vm776_vm6, %v3537_v31, %v3536_v2  ;;  %v3641_v45 = vrot.slane %v7479_v16, 4  ;;  %v7636_v19 = vpop.permute.xlu0 %748  ;;  %v2090_v63 = vpop.permute.xlu1 %2089 }
 0x454   :  { %v3657_v30 = vrot.slane %v7515_v41, 2  ;;  %v3807_v42 = vcombine.low %v9063_v52, %v7616_v47  ;;  %v3633_v27 = vrot.slane %v7446_v43, 2  ;;  %v7643_v6 = vrot.slane %v7620_v49, %v9034_v51 }
 0x455   :  { %v3643_v39 = vrot.slane %v3460_v20, 3  ;;  %v3572_v21 = vsel %vm773_vm5, %v3571_v56, %v3570_v62  ;;  %v7647_v53 = vsel %vm776_vm6, %v3513_v40, %v3512_v37  ;;  %v3573_v16 = vrot.slane %v3476_v59, 2 }
 0x456   :  { %v3645_v41 = vrot.slane %v3462_v54, 2  ;;  %v3823_v36 = vcombine.low %v7624_v55, %v7627_v0  ;;  %v7652_v22 = vsel %vm776_vm6, %v3525_v35, %v3524_v34  ;;  %v3689_v43 = vcombine.low %v7647_v53, %v7632_v9 }
 0x457   :  { %v2203_v58 = vrot.slane %v2090_v63, 2  ;;  %v2202_v20 = vsel %vm773_vm5, %v2201_v11, %v2200_v13  ;;  %v3642_v62 = vsel %vm770_vm4, %v3641_v45, %v3640_v7  ;;  %v3549_v37 = vrot.slane %v7565_v24, 2  ;;  %v9064_v13 = vld [vmem:[#allocation35_spill] sm:$0xff] }
 0x458   :  { %v7660_v33 = vsel %vm776_vm6, %v3657_v30, %v3656_v1  ;;  %v7663_v28 = vsel %vm776_vm6, %v3633_v27, %v3632_v17  ;;  %v3644_v54 = vsel %vm773_vm5, %v3643_v39, %v3642_v62  ;;  %v2544_v2 = vcombine.low %v7559_v23, %v7643_v6  ;;  %v3446_v17 = vpop.permute.xlu1 %3445  ;;  %v7678_v1 = vpop.permute.xlu0 %750 }
 0x459   :  { %v2204_v34 = vsel %vm776_vm6, %v2203_v58, %v2202_v20  ;;  %v3673_v60 = vcombine.low %v9064_v13, %v7652_v22  ;;  %v7672_v57 = vsel %vm776_vm6, %v3573_v16, %v3572_v21  ;;  %v7676_v31 = vsel %vm776_vm6, %v3645_v41, %v3644_v54 }
 0x45a   :  { %v2370_v24 = vrot.slane %v2204_v34, %v9034_v51  ;;  %v3556_v3 = vsel %vm767_vm3, %v3555_v50, %v3554_v38  ;;  %v7682_v5 = vrot.slane %v3689_v43, %v9034_v51  ;;  %v3839_v56 = vcombine.low %v7663_v28, %v7660_v33 }
 0x45b   :  { %v3557_v40 = vrot.slane %v7596_v14, 4  ;;  %v7688_v59 = vsel %vm776_vm6, %v3549_v37, %v3548_v44  ;;  %v3559_v7 = vrot.slane %v3446_v17, 3  ;;  %v7693_v45 = vrot.slane %v3807_v42, %v9034_v51  ;;  %v9065_v17 = vld [vmem:[#allocation97_spill] sm:$0xff] }
 0x45c   :  { %v2410_v35 = vcombine.low %v7578_v48, %v2370_v24  ;;  %v2411_v11 = vcombine.high %v7578_v48, %v2370_v24  ;;  %v3705_v50 = vcombine.low %v7688_v59, %v7672_v57  ;;  %v7699_v38 = vrot.slane %v7676_v31, %v9034_v51  ;;  %v3448_v27 = vpop.permute.xlu1 %3447  ;;  %v7721_v58 = vpop.permute.xlu0 %738 }
 0x45d   :  { %v2552_v14 = vrot.slane %v2544_v2, %v9051_v15  ;;  %v7703_v44 = vrot.slane %v3823_v36, %v9034_v51  ;;  %v7706_v30 = vrot.slane %v3673_v60, %v9034_v51  ;;  %v7713_v39 = vrot.slane %v3839_v56, %v9034_v51 }
 0x45e   :  { %v2418_v48 = vrot.slane %v2410_v35, %v9051_v15  ;;  %v7710_v42 = vrot.slane %v2411_v11, %v9051_v15  ;;  %v3558_v21 = vsel %vm770_vm4, %v3557_v40, %v3556_v3  ;;  %v3561_v16 = vrot.slane %v3448_v27, 2  ;;  %v9068_v27 = vld [vmem:[#allocation66_spill] sm:$0xff] }
 0x45f   :  { %v2545_v63 = vcombine.high %v7559_v23, %v7643_v6  ;;  %v3560_v41 = vsel %vm773_vm5, %v3559_v7, %v3558_v21  ;;  %v3736_v20 = vcombine.low %v7706_v30, %v7682_v5  ;;  %v7726_v62 = vrot.slane %v3705_v50, %v9034_v51 }
 0x460   :  { %v2443_v36 = vcombine.high %v7568_v46, %v2418_v48  ;;  %v2442_v43 = vcombine.low %v7568_v46, %v2418_v48  ;;  %v7729_v37 = vsel %vm776_vm6, %v3561_v16, %v3560_v41  ;;  %v2576_v54 = vcombine.low %v7556_v29, %v2552_v14  ;;  %v7738_v46 = vpop.permute.xlu1 %734  ;;  %v9069_v48 = vld [vmem:[#allocation40_spill] sm:$0xff] }
 0x461   :  { %v3902_v23 = vcombine.low %v7713_v39, %v7699_v38  ;;  %v7736_v6 = vrot.slane %v7729_v37, %v9034_v51  ;;  %v2444_v24 = vcombine.low %v7575_v61, %v7710_v42  ;;  %v912_v3 = vrot.slane %v9065_v17, 6 }
 0x462   :  { %v2586_v2 = vsel %vm1216_vm7, %v2443_v36, -inf  ;;  %v2583_v60 = vsel %vm1216_vm7, %v2442_v43, -inf  ;;  %v9066_v56 = vcombine.high %v7093_v18, %v7456_v32  ;;  %v2332_v7 = vcombine.high %v7460_v25, %v7444_v12  ;;  %v7779_v36 = vpop.permute.xlu0 %752 }
 0x463   :  { %2587 = vmax.xlane.f32.xlu1 %v2586_v2  ;;  %2584 = vmax.xlane.f32.xlu0 %v2583_v60  ;;  %v2513_v35 = vcombine.high %v7509_v26, %v7490_v10  ;;  %v9067_v11 = vcombine.high %v7453_v8, %v7432_v4  ;;  %v2316_v21 = vcombine.high %v9069_v48, %v9068_v27  ;;  %v4497_v32 = vmov 0.0   ;;  %v9071_v2 = vld [vmem:[#allocation73_spill] sm:$0xff]  ;;  %v9075_v48 = vld [vmem:[#allocation68_spill] sm:$0xff] }
 0x464   :  { %v7749_v40 = vrot.slane %v9066_v56, %v9034_v51  ;;  %v3768_v18 = vcombine.low %v7726_v62, %v7736_v6  ;;  %v3870_v12 = vcombine.low %v7693_v45, %v7703_v44  ;;  %v2363_v25 = vcombine.high %v2204_v34, %v4497_v32  ;;  %v7775_v8 = vpop.permute.xlu1 %736  ;;  %v9074_v27 = vld [vmem:[#allocation77_spill] sm:$0xff] }
 0x465   :  { %v7759_v50 = vrot.slane %v9067_v11, %v9034_v51  ;;  %v2577_v10 = vcombine.high %v7556_v29, %v2552_v14  ;;  %v7770_v26 = vrot.slane %v3736_v20, %v9051_v15  ;;  %v7773_v4 = vrot.slane %v2545_v63, %v9051_v15  ;;  %v9070_v29 = vld [vmem:[#allocation94_spill] sm:$0xff]  ;;  %v9072_v63 = vld [vmem:[#allocation84_spill] sm:$0xff] }
 0x466   :  { %v2589_v16 = vsel %vm1216_vm7, %v2444_v24, -inf  ;;  %v2604_v41 = vsel %vm1216_vm7, %v2576_v54, -inf  ;;  %v3776_v43 = vrot.slane %v3768_v18, %v9051_v15  ;;  %v7783_v34 = vrot.slane %v3902_v23, %v9051_v15  ;;  %v9073_v54 = vld [vmem:[#allocation52_spill] sm:$0xff] }
 0x467   :  { %v834_v14 = vrot.slane %v9070_v29, 3  ;;  %v2346_v20 = vrot.slane %v2332_v7, %v9034_v51  ;;  %v2348_v60 = vcombine.high %v9072_v63, %v9071_v2  ;;  %2590 = vmax.xlane.f32.xlu1 %v2589_v16  ;;  %2605 = vmax.xlane.f32.xlu0 %v2604_v41  ;;  %v7790_v24 = vrot.slane %v2513_v35, %v9051_v15  ;;  %v9076_v2 = vld [vmem:[#allocation38_spill] sm:$0xff] }
 0x468   :  { %v913_v17 = vsel %vm764_vm2, %v912_v3, %v9073_v54  ;;  %v3800_v56 = vcombine.low %v7770_v26, %v3776_v43  ;;  %v7796_v23 = vrot.slane %v3870_v12, %v9051_v15  ;;  %v2528_v11 = vcombine.low %v7749_v40, %v7759_v50  ;;  %v733_v3 = vpop.permute.xlu1 %732 }
 0x469   :  { %v2330_v7 = vrot.slane %v2316_v21, %v9034_v51  ;;  %v2482_v18 = vcombine.high %v9075_v48, %v9074_v27  ;;  %v7804_v16 = vrot.slane %v2363_v25, %v9034_v51  ;;  %v2578_v35 = vcombine.low %v7790_v24, %v7773_v4  ;;  %v9077_v48 = vld [vmem:[#allocation92_spill] sm:$0xff] }
 0x46a   :  { %v2607_v41 = vsel %vm1216_vm7, %v2577_v10, -inf  ;;  %v3941_v12 = vsel %vm1216_vm7, %v3800_v56, -inf  ;;  %v3934_v29 = vcombine.low %v7796_v23, %v7783_v34  ;;  %v3769_v21 = vcombine.high %v7726_v62, %v7736_v6  ;;  %v7823_v56 = vpop.permute.xlu0 %754 }
 0x46b   :  { %v7816_v63 = vsel %vm773_vm5, %v834_v14, %v9076_v2  ;;  %v7819_v25 = vrot.slane %v2348_v60, %v9034_v51  ;;  %2608 = vmax.xlane.f32.xlu0 %v2607_v41  ;;  %3942 = vmax.xlane.f32.xlu1 %v3941_v12  ;;  %v2394_v54 = vcombine.low %v2330_v7, %v2346_v20  ;;  %v9078_v62 = vrot.slane %v9077_v48, 5 }
 0x46c   :  { %v2497_v10 = vcombine.high %v7620_v49, %v4497_v32  ;;  %v3737_v27 = vcombine.high %v7706_v30, %v7682_v5  ;;  %v2395_v14 = vcombine.high %v2330_v7, %v2346_v20  ;;  %v7833_v60 = vrot.slane %v2482_v18, %v9034_v51  ;;  %v747_v2 = vpop.permute.xlu1 %746 }
 0x46d   :  { %v7830_v6 = vsel %vm767_vm3, %v9078_v62, %v913_v17  ;;  %v2610_v41 = vsel %vm1216_vm7, %v2578_v35, -inf  ;;  %v2426_v12 = vcombine.low %v7819_v25, %v7804_v16  ;;  %v7839_v49 = vrot.slane %v2528_v11, %v9051_v15 }
 0x46e   :  { %v3962_v5 = vsel %vm1216_vm7, %v3934_v29, -inf  ;;  %v3801_v30 = vcombine.high %v7770_v26, %v3776_v43  ;;  %v2445_v17 = vcombine.high %v7575_v61, %v7710_v42  ;;  %v7846_v20 = vrot.slane %v3769_v21, %v9051_v15 }
 0x46f   :  { %v3808_v7 = vcombine.high %v9063_v52, %v7616_v47  ;;  %2611 = vmax.xlane.f32.xlu0 %v2610_v41  ;;  %3963 = vmax.xlane.f32.xlu1 %v3962_v5  ;;  %v7851_v18 = vrot.slane %v2394_v54, %v9051_v15  ;;  %v3871_v11 = vcombine.high %v7693_v45, %v7703_v44  ;;  %v7876_v44 = vpop.permute.xlu0 %756  ;;  %v9079_v54 = vld [vmem:[#allocation87_spill] sm:$0xff]  ;;  %v840_v62 = vrot.slane %v7775_v8, 6 }
 0x470   :  { %v3674_v26 = vcombine.high %v9064_v13, %v7652_v22  ;;  %v7858_v43 = vrot.slane %v2497_v10, %v9034_v51  ;;  %v7861_v61 = vrot.slane %v3737_v27, %v9051_v15  ;;  %v7864_v42 = vrot.slane %v2395_v14, %v9051_v15  ;;  %v741_v35 = vpop.permute.xlu1 %740 }
 0x471   :  { %v3721_v47 = vcombine.high %v7729_v37, %v4497_v32  ;;  %v3935_v52 = vcombine.high %v7796_v23, %v7783_v34  ;;  %v7871_v45 = vrot.slane %v2426_v12, %v9051_v15  ;;  %v3903_v22 = vcombine.high %v7713_v39, %v7699_v38 }
 0x472   :  { %v838_v13 = vrot.slane %v7738_v46, 7  ;;  %v3944_v29 = vsel %vm1216_vm7, %v3801_v30, -inf  ;;  %v2592_v21 = vsel %vm1216_vm7, %v2445_v17, -inf  ;;  %v3802_v37 = vcombine.low %v7861_v61, %v7846_v20 }
 0x473   :  { %v836_v34 = vrot.slane %v9079_v54, 2  ;;  %v7884_v23 = vrot.slane %v3808_v7, %v9034_v51  ;;  %v3690_v38 = vcombine.high %v7647_v53, %v7632_v9  ;;  %3945 = vmax.xlane.f32.xlu0 %v3944_v29  ;;  %2593 = vmax.xlane.f32.xlu1 %v2592_v21  ;;  %v7889_v39 = vrot.slane %v3871_v11, %v9051_v15  ;;  %v745_v17 = vpop.permute.xlu0 %744 }
 0x474   :  { %v3840_v46 = vcombine.high %v7663_v28, %v7660_v33  ;;  %v3706_v10 = vcombine.high %v7688_v59, %v7672_v57  ;;  %v839_v27 = vsel %vm761_vm1, %v838_v13, %v733_v3  ;;  %v2560_v48 = vcombine.low %v7833_v60, %v7858_v43  ;;  %v743_v57 = vpop.permute.xlu1 %742 }
 0x475   :  { %v2579_v9 = vcombine.high %v7790_v24, %v7773_v4  ;;  %v2446_v53 = vcombine.low %v7851_v18, %v7871_v45  ;;  %v7904_v14 = vrot.slane %v3903_v22, %v9051_v15  ;;  %v7907_v33 = vrot.slane %v3674_v26, %v9034_v51 }
 0x476   :  { %v7910_v28 = vrot.slane %v3721_v47, %v9034_v51  ;;  %v3965_v59 = vsel %vm1216_vm7, %v3935_v52, -inf  ;;  %v3947_v8 = vsel %vm1216_vm7, %v3802_v37, -inf  ;;  %v7915_v3 = vrot.slane %v3690_v38, %v9034_v51 }
 0x477   :  { %v3855_v4 = vcombine.high %v7676_v31, %v4497_v32  ;;  %v841_v24 = vsel %vm764_vm2, %v840_v62, %v839_v27  ;;  %v844_v41 = vrot.slane %v741_v35, 4  ;;  %3966 = vmax.xlane.f32.xlu0 %v3965_v59  ;;  %3948 = vmax.xlane.f32.xlu1 %v3947_v8  ;;  %v7921_v12 = vrot.slane %v3706_v10, %v9034_v51 }
 0x478   :  { %v922_v5 = vrot.slane %v7636_v19, 7  ;;  %v842_v30 = vrot.slane %v7721_v58, 5  ;;  %v846_v7 = vrot.slane %v743_v57, 3  ;;  %v2613_v11 = vsel %vm1216_vm7, %v2579_v9, -inf  ;;  %v727_v13 = vpop.permute.xlu1 %726 }
 0x479   :  { %v2595_v26 = vsel %vm1216_vm7, %v2446_v53, -inf  ;;  %v3936_v31 = vcombine.low %v7889_v39, %v7904_v14  ;;  %v7930_v47 = vrot.slane %v2560_v48, %v9051_v15  ;;  %v3803_v19 = vcombine.high %v7861_v61, %v7846_v20 }
 0x47a   :  { %v843_v52 = vsel %vm767_vm3, %v842_v30, %v841_v24  ;;  %v923_v22 = vsel %vm761_vm1, %v922_v5, %v747_v2  ;;  %v3784_v58 = vcombine.low %v7921_v12, %v7910_v28  ;;  %v3824_v35 = vcombine.high %v7624_v55, %v7627_v0  ;;  %v9080_v5 = vld [vmem:[#allocation45_spill] sm:$0xff] }
 0x47b   :  { %v924_v29 = vrot.slane %v7678_v1, 6  ;;  %v845_v21 = vsel %vm770_vm4, %v844_v41, %v843_v52  ;;  %v848_v37 = vrot.slane %v745_v17, 2  ;;  %2614 = vmax.xlane.f32.xlu0 %v2613_v11  ;;  %2596 = vmax.xlane.f32.xlu1 %v2595_v26  ;;  %v7943_v38 = vrot.slane %v3840_v46, %v9034_v51 }
 0x47c   :  { %v7946_v2 = vrot.slane %v3855_v4, %v9034_v51  ;;  %v847_v20 = vsel %vm773_vm5, %v846_v7, %v845_v21  ;;  %v3752_v61 = vcombine.low %v7907_v33, %v7915_v3  ;;  %v3968_v0 = vsel %vm1216_vm7, %v3936_v31, -inf  ;;  %v759_v27 = vpop.permute.xlu1 %758  ;;  %v9082_v21 = vld [vmem:[#allocation30_spill] sm:$0xff] }
 0x47d   :  { %v925_v55 = vsel %vm764_vm2, %v924_v29, %v923_v22  ;;  %v2580_v1 = vcombine.low %v7839_v49, %v7930_v47  ;;  %v2427_v10 = vcombine.high %v7819_v25, %v7804_v16  ;;  %v926_v46 = vrot.slane %v7779_v36, 5  ;;  %v729_v16 = vpop.permute.xlu0 %728 }
 0x47e   :  { %v3950_v48 = vsel %vm1216_vm7, %v3803_v19, -inf  ;;  %v2447_v62 = vcombine.high %v7851_v18, %v7871_v45  ;;  %v7962_v9 = vrot.slane %v3784_v58, %v9051_v15  ;;  %v7965_v53 = vrot.slane %v3824_v35, %v9034_v51 }
 0x47f   :  { %v928_v57 = vrot.slane %v7823_v56, 4  ;;  %v7969_v59 = vsel %vm776_vm6, %v848_v37, %v847_v20  ;;  %v916_v25 = vrot.slane %v727_v13, 4  ;;  %3969 = vmax.xlane.f32.xlu0 %v3968_v0  ;;  %3951 = vmax.xlane.f32.xlu1 %v3950_v48  ;;  %v927_v36 = vsel %vm767_vm3, %v926_v46, %v925_v55 }
 0x480   :  { %v930_v8 = vrot.slane %v7876_v44, 3  ;;  %v3760_v18 = vrot.slane %v3752_v61, %v9051_v15  ;;  %v3918_v45 = vcombine.low %v7943_v38, %v7946_v2  ;;  %v932_v4 = vrot.slane %v759_v27, 2  ;;  %v731_v7 = vpop.permute.xlu1 %730  ;;  %v9083_v61 = vld [vmem:[#allocation48_spill] sm:$0xff] }
 0x481   :  { %v2616_v24 = vsel %vm1216_vm7, %v2580_v1, -inf  ;;  %v3937_v56 = vcombine.high %v7889_v39, %v7904_v14  ;;  %v2441_v41 = vrot.slane %v2427_v10, %v9051_v15  ;;  %v980_v30 = vcombine.low %v9080_v5, %v7969_v59 }
 0x482   :  { %v918_v17 = vrot.slane %v729_v16, 3  ;;  %v2598_v44 = vsel %vm1216_vm7, %v2447_v62, -inf  ;;  %v3804_v11 = vcombine.low %v3760_v18, %v7962_v9  ;;  %v929_v26 = vsel %vm770_vm4, %v928_v57, %v927_v36  ;;  %v9084_v57 = vld [vmem:[#allocation34_spill] sm:$0xff]  ;;  %v9085_v16 = vld [vmem:[#allocation11_spill] sm:$0xff] }
 0x483   :  { %v917_v31 = vsel %vm770_vm4, %v916_v25, %v7830_v6  ;;  %v920_v52 = vrot.slane %v731_v7, 2  ;;  %2617 = vmax.xlane.f32.xlu0 %v2616_v24  ;;  %2599 = vmax.xlane.f32.xlu1 %v2598_v44  ;;  %v3886_v39 = vcombine.low %v7884_v23, %v7965_v53  ;;  %v837_v14 = vsel %vm776_vm6, %v836_v34, %v7816_v63 }
 0x484   :  { %v931_v22 = vsel %vm773_vm5, %v930_v8, %v929_v26  ;;  %v2581_v13 = vcombine.high %v7839_v49, %v7930_v47  ;;  %v2561_v19 = vcombine.high %v7833_v60, %v7858_v43  ;;  %v3971_v58 = vsel %vm1216_vm7, %v3937_v56, -inf  ;;  %v9081_v47 = vld [vmem:[#allocation37_spill] sm:$0xff] }
 0x485   :  { %v7999_v6 = vsel %vm776_vm6, %v932_v4, %v931_v22  ;;  %v2448_v35 = vcombine.low %v7864_v42, %v2441_v41  ;;  %v3926_v29 = vrot.slane %v3918_v45, %v9051_v15  ;;  %v919_v54 = vsel %vm773_vm5, %v918_v17, %v917_v31  ;;  %v9087_v45 = vld [vmem:[#allocation32_spill] sm:$0xff] }
 0x486   :  { %v3953_v63 = vsel %vm1216_vm7, %v3804_v11, -inf  ;;  %v3785_v34 = vcombine.high %v7921_v12, %v7910_v28  ;;  %v988_v49 = vrot.slane %v980_v30, %v9034_v51  ;;  %v8010_v60 = vsel %vm776_vm6, %v920_v52, %v919_v54  ;;  %v9092_v54 = vld [vmem:[#allocation23_spill] sm:$0xff] }
 0x487   :  { %3972 = vmax.xlane.f32.xlu0 %v3971_v58  ;;  %3954 = vmax.xlane.f32.xlu1 %v3953_v63  ;;  %v3894_v43 = vrot.slane %v3886_v39, %v9051_v15  ;;  %v2529_v42 = vcombine.high %v7749_v40, %v7759_v50  ;;  %v1098_v37 = vcombine.low %v9082_v21, %v9081_v47  ;;  %v2619_v55 = vsel %vm1216_vm7, %v2581_v13, -inf }
 0x488   :  { %v1003_v20 = vrot.slane %v837_v14, %v9034_v51  ;;  %v1114_v28 = vcombine.low %v9083_v61, %v7999_v6  ;;  %v3753_v12 = vcombine.high %v7907_v33, %v7915_v3  ;;  %v2601_v0 = vsel %vm1216_vm7, %v2448_v35, -inf }
 0x489   :  { %v3938_v1 = vcombine.low %v3894_v43, %v3926_v29  ;;  %v2575_v10 = vrot.slane %v2561_v19, %v9051_v15  ;;  %v8027_v40 = vrot.slane %v8010_v60, %v9034_v51  ;;  %v3805_v50 = vcombine.high %v3760_v18, %v7962_v9  ;;  %v9086_v18 = vld [vmem:[#allocation15_spill] sm:$0xff] }
 0x48a   :  { %v3799_v46 = vrot.slane %v3785_v34, %v9051_v15  ;;  %v1043_v27 = vcombine.low %v988_v49, %v1003_v20  ;;  %v2543_v33 = vrot.slane %v2529_v42, %v9051_v15  ;;  %v8033_v3 = vrot.slane %v1098_v37, %v9034_v51 }
 0x48b   :  { %2620 = vmax.xlane.f32.xlu0 %v2619_v55  ;;  %2602 = vmax.xlane.f32.xlu1 %v2601_v0  ;;  %v8036_v48 = vrot.slane %v1114_v28, %v9034_v51  ;;  %v3767_v62 = vrot.slane %v3753_v12, %v9051_v15  ;;  %v1011_v25 = vcombine.low %v9085_v16, %v9084_v57  ;;  %v3974_v9 = vsel %vm1216_vm7, %v3938_v1, -inf }
 0x48c   :  { %v2582_v36 = vcombine.low %v2543_v33, %v2575_v10  ;;  %v3919_v8 = vcombine.high %v7943_v38, %v7946_v2  ;;  %v9088_v4 = vcombine.low %v9086_v18, %v9087_v45  ;;  %v3956_v56 = vsel %vm1216_vm7, %v3805_v50, -inf }
 0x48d   :  { %v3806_v41 = vcombine.low %v3767_v62, %v3799_v46  ;;  %v1051_v30 = vrot.slane %v1043_v27, %v9051_v15  ;;  %v1177_v17 = vcombine.low %v8036_v48, %v8027_v40  ;;  %v3887_v7 = vcombine.high %v7884_v23, %v7965_v53  ;;  %v9089_v23 = vld [vmem:[#allocation49_spill] sm:$0xff] }
 0x48e   :  { %v8048_v24 = vrot.slane %v9088_v4, %v9034_v51  ;;  %v1019_v38 = vrot.slane %v1011_v25, %v9051_v15  ;;  %v981_v44 = vcombine.high %v9080_v5, %v7969_v59  ;;  %v2622_v11 = vsel %vm1216_vm7, %v2582_v36, -inf  ;;  %v9090_v53 = vld [vmem:[#allocation33_spill] sm:$0xff] }
 0x48f   :  { %3975 = vmax.xlane.f32.xlu0 %v3974_v9  ;;  %3957 = vmax.xlane.f32.xlu1 %v3956_v56  ;;  %v3939_v26 = vcombine.high %v3894_v43, %v3926_v29  ;;  %v3933_v31 = vrot.slane %v3919_v8, %v9051_v15  ;;  %v3959_v52 = vsel %vm1216_vm7, %v3806_v41, -inf  ;;  %v1185_v22 = vrot.slane %v1177_v17, %v9051_v15  ;;  %v9091_v29 = vld [vmem:[#allocation29_spill] sm:$0xff] }
 0x490   :  { %v1145_v2 = vcombine.low %v8048_v24, %v8033_v3  ;;  %v1075_v39 = vcombine.low %v1019_v38, %v1051_v30  ;;  %v1044_v13 = vcombine.high %v988_v49, %v1003_v20  ;;  %v965_v19 = vcombine.high %v9090_v53, %v9089_v23 }
 0x491   :  { %v996_v58 = vcombine.high %v837_v14, %v4497_v32  ;;  %v3901_v59 = vrot.slane %v3887_v7, %v9051_v15  ;;  %v1012_v35 = vcombine.high %v9085_v16, %v9084_v57  ;;  %v949_v63 = vcombine.high %v9092_v54, %v9091_v29 }
 0x492   :  { %v1153_v5 = vrot.slane %v1145_v2, %v9051_v15  ;;  %v995_v49 = vrot.slane %v981_v44, %v9034_v51  ;;  %v3977_v43 = vsel %vm1216_vm7, %v3939_v26, -inf  ;;  %v1217_v42 = vsel %vm1216_vm7, %v1075_v39, -inf }
 0x493   :  { %2623 = vmax.xlane.f32.xlu0 %v2622_v11  ;;  %3960 = vmax.xlane.f32.xlu1 %v3959_v52  ;;  %v3940_v34 = vcombine.low %v3901_v59, %v3933_v31  ;;  %v1058_v37 = vrot.slane %v1044_v13, %v9051_v15  ;;  %v979_v20 = vrot.slane %v965_v19, %v9034_v51 }
 0x494   :  { %v1209_v14 = vcombine.low %v1153_v5, %v1185_v22  ;;  %v1010_v28 = vrot.slane %v996_v58, %v9034_v51  ;;  %v1026_v12 = vrot.slane %v1012_v35, %v9051_v15  ;;  %v1076_v0 = vcombine.high %v1019_v38, %v1051_v30 }
 0x495   :  { %v3980_v55 = vsel %vm1216_vm7, %v3940_v34, -inf  ;;  %v963_v1 = vrot.slane %v949_v63, %v9034_v51  ;;  %v1130_v50 = vcombine.high %v8010_v60, %v4497_v32  ;;  %v1178_v33 = vcombine.high %v8036_v48, %v8027_v40 }
 0x496   :  { %v1059_v10 = vcombine.low %v995_v49, %v1010_v28  ;;  %v1238_v46 = vsel %vm1216_vm7, %v1209_v14, -inf  ;;  %v1077_v27 = vcombine.low %v1026_v12, %v1058_v37  ;;  %v1099_v57 = vcombine.high %v9082_v21, %v9081_v47 }
 0x497   :  { %3978 = vmax.xlane.f32.xlu0 %v3977_v43  ;;  %1218 = vmax.xlane.f32.xlu1 %v1217_v42  ;;  %v1027_v62 = vcombine.low %v963_v1, %v979_v20  ;;  %v1115_v16 = vcombine.high %v9083_v61, %v7999_v6  ;;  %v1146_v25 = vcombine.high %v8048_v24, %v8033_v3  ;;  %v1220_v9 = vsel %vm1216_vm7, %v1076_v0, -inf }
 0x498   :  { %v1083_v60 = vcombine.high %v9086_v18, %v9087_v45  ;;  %v1078_v36 = vcombine.high %v1026_v12, %v1058_v37  ;;  %v1067_v40 = vrot.slane %v1059_v10, %v9051_v15  ;;  %v1144_v48 = vrot.slane %v1130_v50, %v9034_v51 }
 0x499   :  { %v1223_v8 = vsel %vm1216_vm7, %v1077_v27, -inf  ;;  %v1210_v4 = vcombine.high %v1153_v5, %v1185_v22  ;;  %v1192_v47 = vrot.slane %v1178_v33, %v9051_v15  ;;  %v1035_v6 = vrot.slane %v1027_v62, %v9051_v15 }
 0x49a   :  { %v1113_v21 = vrot.slane %v1099_v57, %v9034_v51  ;;  %v1129_v61 = vrot.slane %v1115_v16, %v9034_v51  ;;  %v1160_v3 = vrot.slane %v1146_v25, %v9051_v15  ;;  %v1097_v45 = vrot.slane %v1083_v60, %v9034_v51 }
 0x49b   :  { %3981 = vmax.xlane.f32.xlu0 %v3980_v55  ;;  %1239 = vmax.xlane.f32.xlu1 %v1238_v46  ;;  %v1079_v18 = vcombine.low %v1035_v6, %v1067_v40  ;;  %v1060_v24 = vcombine.high %v995_v49, %v1010_v28  ;;  %v1241_v56 = vsel %vm1216_vm7, %v1210_v4, -inf  ;;  %v1226_v41 = vsel %vm1216_vm7, %v1078_v36, -inf  ;;  %v9094_v36 = vld [vmem:[#allocation14_spill] sm:$0xff] }
 0x49c   :  { %v1211_v30 = vcombine.low %v1160_v3, %v1192_v47  ;;  %v1193_v17 = vcombine.low %v1129_v61, %v1144_v48  ;;  %v1028_v7 = vcombine.high %v963_v1, %v979_v20  ;;  %v1161_v38 = vcombine.low %v1097_v45, %v1113_v21 }
 0x49d   :  { %v1229_v2 = vsel %vm1216_vm7, %v1079_v18, -inf  ;;  %v1074_v44 = vrot.slane %v1060_v24, %v9051_v15  ;;  %v1212_v26 = vcombine.high %v1160_v3, %v1192_v47  ;;  %v1080_v31 = vcombine.high %v1035_v6, %v1067_v40 }
 0x49e   :  { %v1244_v11 = vsel %vm1216_vm7, %v1211_v30, -inf  ;;  %v1201_v52 = vrot.slane %v1193_v17, %v9051_v15  ;;  %v1042_v39 = vrot.slane %v1028_v7, %v9051_v15  ;;  %v1169_v22 = vrot.slane %v1161_v38, %v9051_v15 }
 0x49f   :  { %1221 = vmax.xlane.f32.xlu0 %v1220_v9  ;;  %1224 = vmax.xlane.f32.xlu1 %v1223_v8  ;;  %v1247_v23 = vsel %vm1216_vm7, %v1212_v26, -inf  ;;  %v1232_v53 = vsel %vm1216_vm7, %v1080_v31, -inf  ;;  %v1194_v58 = vcombine.high %v1129_v61, %v1144_v48  ;;  %v1162_v59 = vcombine.high %v1097_v45, %v1113_v21 }
 0x4a0   :  { %v1081_v13 = vcombine.low %v1042_v39, %v1074_v44  ;;  %v1213_v19 = vcombine.low %v1169_v22, %v1201_v52  ;;  %v1214_v29 = vcombine.high %v1169_v22, %v1201_v52  ;;  %v9093_v16 = vlaneseq }
 0x4a1   :  { %v1208_v54 = vrot.slane %v1194_v58, %v9051_v15  ;;  %v1176_v63 = vrot.slane %v1162_v59, %v9051_v15 }
 0x4a2   :  { %v1250_v5 = vsel %vm1216_vm7, %v1213_v19, -inf  ;;  %v1235_v35 = vsel %vm1216_vm7, %v1081_v13, -inf  ;;  %v1253_v34 = vsel %vm1216_vm7, %v1214_v29, -inf  ;;  %v1274_v25 = vand.u32 127, %v9093_v16 }
 0x4a3   :  { %1242 = vmax.xlane.f32.xlu0 %v1241_v56  ;;  %1227 = vmax.xlane.f32.xlu1 %v1226_v41  ;;  %v1215_v49 = vcombine.low %v1176_v63, %v1208_v54 }
 0x4a4   :  { %v8128_v40 = vsub.s32 %v1274_v25, %v9094_v36 }
 0x4a5   :  { %v1256_v43 = vsel %vm1216_vm7, %v1215_v49, -inf }
 0x4a7   :  { %1245 = vmax.xlane.f32.xlu0 %v1244_v11  ;;  %1230 = vmax.xlane.f32.xlu1 %v1229_v2 }
 0x4ab   :  { %1248 = vmax.xlane.f32.xlu0 %v1247_v23  ;;  %1233 = vmax.xlane.f32.xlu1 %v1232_v53 }
 0x4af   :  { %1251 = vmax.xlane.f32.xlu0 %v1250_v5  ;;  %1236 = vmax.xlane.f32.xlu1 %v1235_v35 }
 0x4b3   :  { %1254 = vmax.xlane.f32.xlu0 %v1253_v34 }
 0x4b7   :  { %1257 = vmax.xlane.f32.xlu0 %v1256_v43 }
 0x4f0   :  { %v2585_v42 = vpop.xlane.xlu0 %2584  ;;  %v2588_v14 = vpop.xlane.xlu1 %2587 }
 0x4f1   :  { %v2642_v4 = vrot.slane %v2585_v42, %v8128_v40  ;;  %v2646_v47 = vrot.slane %v2588_v14, %v8128_v40 }
 0x4f3   :  { %v2695_v56 = vsel %vm761_vm1, %v2646_v47, %v2642_v4 }
 0x4f4   :  { %v2606_v37 = vpop.xlane.xlu0 %2605  ;;  %v2591_v20 = vpop.xlane.xlu1 %2590 }
 0x4f5   :  { %v2650_v61 = vrot.slane %v2591_v20, %v8128_v40  ;;  %v2670_v41 = vrot.slane %v2606_v37, %v8128_v40 }
 0x4f7   :  { %v2696_v2 = vsel %vm764_vm2, %v2650_v61, %v2695_v56 }
 0x4f8   :  { %v2609_v28 = vpop.xlane.xlu0 %2608  ;;  %v3943_v12 = vpop.xlane.xlu1 %3942 }
 0x4f9   :  { %v2674_v3 = vrot.slane %v2609_v28, %v8128_v40  ;;  %v4000_v23 = vrot.slane %v3943_v12, %v8128_v40 }
 0x4fb   :  { %v2701_v26 = vsel %vm761_vm1, %v2674_v3, %v2670_v41 }
 0x4fc   :  { %v2612_v55 = vpop.xlane.xlu0 %2611  ;;  %v8122_v0 = vpop.xlane.xlu1 %3963 }
 0x4fd   :  { %v2678_v45 = vrot.slane %v2612_v55, %v8128_v40  ;;  %v4028_v34 = vrot.slane %v8122_v0, %v8128_v40 }
 0x4ff   :  { %v2702_v39 = vsel %vm764_vm2, %v2678_v45, %v2701_v26 }
 0x500   :  { %v3946_v1 = vpop.xlane.xlu0 %3945  ;;  %v2594_v10 = vpop.xlane.xlu1 %2593 }
 0x501   :  { %v2654_v18 = vrot.slane %v2594_v10, %v8128_v40  ;;  %v4004_v22 = vrot.slane %v3946_v1, %v8128_v40 }
 0x503   :  { %v2697_v31 = vsel %vm767_vm3, %v2654_v18, %v2696_v2  ;;  %v4053_v42 = vsel %vm761_vm1, %v4004_v22, %v4000_v23 }
 0x504   :  { %v3967_v50 = vpop.xlane.xlu0 %3966  ;;  %v3949_v46 = vpop.xlane.xlu1 %3948 }
 0x505   :  { %v4032_v53 = vrot.slane %v3967_v50, %v8128_v40  ;;  %v4008_v35 = vrot.slane %v3949_v46, %v8128_v40 }
 0x507   :  { %v4059_v50 = vsel %vm761_vm1, %v4032_v53, %v4028_v34  ;;  %v4054_v46 = vsel %vm764_vm2, %v4008_v35, %v4053_v42 }
 0x508   :  { %v2615_v27 = vpop.xlane.xlu0 %2614  ;;  %v2597_v33 = vpop.xlane.xlu1 %2596 }
 0x509   :  { %v2658_v24 = vrot.slane %v2597_v33, %v8128_v40  ;;  %v2682_v30 = vrot.slane %v2615_v27, %v8128_v40 }
 0x50b   :  { %v2698_v13 = vsel %vm770_vm4, %v2658_v24, %v2697_v31  ;;  %v2703_v19 = vsel %vm767_vm3, %v2682_v30, %v2702_v39 }
 0x50c   :  { %v8124_v62 = vpop.xlane.xlu0 %3969  ;;  %v3952_v57 = vpop.xlane.xlu1 %3951 }
 0x50d   :  { %v4012_v49 = vrot.slane %v3952_v57, %v8128_v40  ;;  %v4036_v14 = vrot.slane %v8124_v62, %v8128_v40 }
 0x50f   :  { %v4055_v62 = vsel %vm767_vm3, %v4012_v49, %v4054_v46 }
 0x510   :  { %v2618_v60 = vpop.xlane.xlu0 %2617  ;;  %v2600_v9 = vpop.xlane.xlu1 %2599 }
 0x511   :  { %v2662_v17 = vrot.slane %v2600_v9, %v8128_v40  ;;  %v2686_v44 = vrot.slane %v2618_v60, %v8128_v40  ;;  %v4060_v60 = vsel %vm764_vm2, %v4036_v14, %v4059_v50 }
 0x513   :  { %v2699_v58 = vsel %vm773_vm5, %v2662_v17, %v2698_v13  ;;  %v2704_v29 = vsel %vm770_vm4, %v2686_v44, %v2703_v19 }
 0x514   :  { %v3973_v48 = vpop.xlane.xlu0 %3972  ;;  %v3955_v8 = vpop.xlane.xlu1 %3954 }
 0x515   :  { %v4016_v37 = vrot.slane %v3955_v8, %v8128_v40  ;;  %v4040_v28 = vrot.slane %v3973_v48, %v8128_v40 }
 0x517   :  { %v4056_v9 = vsel %vm770_vm4, %v4016_v37, %v4055_v62  ;;  %v4061_v36 = vsel %vm767_vm3, %v4040_v28, %v4060_v60 }
 0x518   :  { %v2621_v6 = vpop.xlane.xlu0 %2620  ;;  %v2603_v21 = vpop.xlane.xlu1 %2602 }
 0x519   :  { %v2666_v11 = vrot.slane %v2603_v21, %v8128_v40  ;;  %v2690_v52 = vrot.slane %v2621_v6, %v8128_v40 }
 0x51b   :  { %v2700_v54 = vsel %vm776_vm6, %v2666_v11, %v2699_v58  ;;  %v2705_v43 = vsel %vm773_vm5, %v2690_v52, %v2704_v29 }
 0x51c   :  { %v3976_v7 = vpop.xlane.xlu0 %3975  ;;  %v3958_v38 = vpop.xlane.xlu1 %3957  ;;  %v2716_v12 = vrot.slane %v2700_v54, %v9034_v51  ;;  %v2709_v26 = vcombine.high %v2700_v54, %v4497_v32 }
 0x51d   :  { %v4020_v55 = vrot.slane %v3958_v38, %v8128_v40  ;;  %v4044_v27 = vrot.slane %v3976_v7, %v8128_v40 }
 0x51e   :  { %v2723_v58 = vrot.slane %v2709_v26, %v9034_v51 }
 0x51f   :  { %v4057_v48 = vsel %vm773_vm5, %v4020_v55, %v4056_v9  ;;  %v4062_v21 = vsel %vm770_vm4, %v4044_v27, %v4061_v36 }
 0x520   :  { %v2624_v59 = vpop.xlane.xlu0 %2623  ;;  %v3961_v5 = vpop.xlane.xlu1 %3960 }
 0x521   :  { %v2694_v63 = vrot.slane %v2624_v59, %v8128_v40  ;;  %v4024_v33 = vrot.slane %v3961_v5, %v8128_v40 }
 0x523   :  { %v2706_v20 = vsel %vm776_vm6, %v2694_v63, %v2705_v43  ;;  %v4058_v61 = vsel %vm776_vm6, %v4024_v33, %v4057_v48 }
 0x524   :  { %v2731_v0 = vrot.slane %v2706_v20, %v9034_v51  ;;  %v3979_v1 = vpop.xlane.xlu0 %3978  ;;  %v8171_v10 = vpop.xlane.xlu1 %1218  ;;  %v4074_v56 = vrot.slane %v4058_v61, %v9034_v51  ;;  %v2724_v38 = vcombine.high %v2706_v20, %v4497_v32  ;;  %v4067_v2 = vcombine.high %v4058_v61, %v4497_v32 }
 0x525   :  { %v4048_v25 = vrot.slane %v3979_v1, %v8128_v40  ;;  %v1278_v14 = vrot.slane %v8171_v10, %v8128_v40 }
 0x526   :  { %v2739_v57 = vcombine.low %v2716_v12, %v2731_v0  ;;  %v2740_v16 = vcombine.high %v2716_v12, %v2731_v0  ;;  %v2738_v23 = vrot.slane %v2724_v38, %v9034_v51  ;;  %v4081_v53 = vrot.slane %v4067_v2, %v9034_v51 }
 0x527   :  { %v4063_v18 = vsel %vm773_vm5, %v4048_v25, %v4062_v21 }
 0x528   :  { %v3982_v8 = vpop.xlane.xlu0 %3981  ;;  %v8183_v4 = vpop.xlane.xlu1 %1239  ;;  %v2754_v47 = vrot.slane %v2740_v16, %v9051_v15  ;;  %v8187_v6 = vrot.slane %v2739_v57, %v9051_v15  ;;  %v2755_v63 = vcombine.low %v2723_v58, %v2738_v23  ;;  %v2756_v10 = vcombine.high %v2723_v58, %v2738_v23  ;;  %v4175_v23 = vld [vmem:[%s8387_s4 + $0x8] sm:$0xff] }
 0x529   :  { %v4052_v3 = vrot.slane %v3982_v8, %v8128_v40  ;;  %v1306_v25 = vrot.slane %v8183_v4, %v8128_v40 }
 0x52a   :  { %2779 = vrot.lane.b32.xlu0 %v2754_v47, %s4498_s1  ;;  %v2764_v45 = vcombine.high %v8187_v6, %v4497_v32  ;;  %v2765_v54 = vcombine.high %v2754_v47, %v4497_v32  ;;  %v2763_v37 = vrot.slane %v2755_v63, %v9051_v15  ;;  %v2773_v47 = vrot.slane %v2756_v10, %v9051_v15  ;;  %v4185_v10 = vld [vmem:[%s8387_s4 + $0x58] sm:$0xff] }
 0x52b   :  { %v4064_v24 = vsel %vm776_vm6, %v4052_v3, %v4063_v18 }
 0x52c   :  { %v4082_v41 = vcombine.high %v4064_v24, %v4497_v32  ;;  %v4089_v30 = vrot.slane %v4064_v24, %v9034_v51  ;;  %v1222_v17 = vpop.xlane.xlu0 %1221  ;;  %2775 = vrot.lane.b32.xlu1 %v2764_v45, %s4499_s27  ;;  %v1225_v7 = vpop.xlane.xlu1 %1224  ;;  %v2766_v33 = vcombine.high %v2763_v37, %v4497_v32 }
 0x52d   :  { %v1282_v34 = vrot.slane %v1222_v17, %v8128_v40  ;;  %v1286_v20 = vrot.slane %v1225_v7, %v8128_v40 }
 0x52e   :  { %v4097_v44 = vcombine.low %v4074_v56, %v4089_v30  ;;  %v4098_v11 = vcombine.high %v4074_v56, %v4089_v30  ;;  %v8205_v31 = vrot.slane %v4082_v41, %v9034_v51 }
 0x52f   :  { %v1331_v28 = vsel %vm761_vm1, %v1282_v34, %v1278_v14 }
 0x530   :  { %v1243_v52 = vpop.xlane.xlu0 %1242  ;;  %v1228_v39 = vpop.xlane.xlu1 %1227  ;;  %v4112_v22 = vrot.slane %v4098_v11, %v9051_v15  ;;  %v8209_v13 = vrot.slane %v4097_v44, %v9051_v15  ;;  %v4113_v29 = vcombine.low %v4081_v53, %v8205_v31  ;;  %v1332_v62 = vsel %vm764_vm2, %v1286_v20, %v1331_v28  ;;  %v4180_v20 = vld [vmem:[%s8387_s4 + $0x30] sm:$0xff]  ;;  %v4181_v28 = vld [vmem:[%s8387_s4 + $0x38] sm:$0xff] }
 0x531   :  { %v1290_v12 = vrot.slane %v1228_v39, %v8128_v40  ;;  %v1310_v46 = vrot.slane %v1243_v52, %v8128_v40  ;;  %v4114_v4 = vcombine.high %v4081_v53, %v8205_v31 }
 0x532   :  { %4137 = vrot.lane.b32.xlu0 %v4112_v22, %s4498_s1  ;;  %v4122_v19 = vcombine.high %v8209_v13, %v4497_v32  ;;  %v4123_v35 = vcombine.high %v4112_v22, %v4497_v32  ;;  %v4121_v42 = vrot.slane %v4113_v29, %v9051_v15  ;;  %v4174_v22 = vld [vmem:[%s8387_s4] sm:$0xff] }
 0x533   :  { %v1333_v60 = vsel %vm767_vm3, %v1290_v12, %v1332_v62  ;;  %v1337_v21 = vsel %vm761_vm1, %v1310_v46, %v1306_v25  ;;  %v4131_v38 = vrot.slane %v4114_v4, %v9051_v15  ;;  %vm4172_vm1 = vcmask 801792  }
 0x534   :  { %v1246_v59 = vpop.xlane.xlu0 %1245  ;;  %4133 = vrot.lane.b32.xlu1 %v4122_v19, %s4499_s27  ;;  %v1231_v5 = vpop.xlane.xlu1 %1230  ;;  %v4124_v1 = vcombine.high %v4121_v42, %v4497_v32 }
 0x535   :  { %v1294_v50 = vrot.slane %v1231_v5, %v8128_v40  ;;  %v1314_v57 = vrot.slane %v1246_v59, %v8128_v40  ;;  %v4504_v59 = vmov 0.0|0.0   ;;  %v4177_v5 = vld [vmem:[%s8387_s4 + $0x18] sm:$0xff] }
 0x536   :  { %4141 = vrot.lane.b32.xlu0 %v4123_v35, %s4500_s8  ;;  %4353 = vmatprep.subr.bf16.mxu0 %v4504_v59  ;;  %v4354_v35 = vpack.c.bf16 %v4175_v23, %v4174_v22 }
 0x537   :  { %v1334_v48 = vsel %vm770_vm4, %v1294_v50, %v1333_v60  ;;  %v1338_v18 = vsel %vm764_vm2, %v1314_v57, %v1337_v21  ;;  %v4184_v50 = vld [vmem:[%s8387_s4 + $0x50] sm:$0xff]  ;;  %v4190_v21 = vld [vmem:[%s8387_s4 + $0x80] sm:$0xff]  ;;  %vm4277_vm2 = vcmask 74752  }
 0x538   :  { %v1249_v49 = vpop.xlane.xlu0 %1248  ;;  %2783 = vrot.lane.b32.xlu1 %v2765_v54, %s4500_s8  ;;  %v1234_v43 = vpop.xlane.xlu1 %1233  ;;  %4355 = vmatpush1.bf16.msra.mxu0 %v4354_v35  ;;  %v4369_v46 = vpack.c.bf16 %v4185_v10, %v4184_v50  ;;  %v4188_v57 = vld [vmem:[%s8387_s4 + $0x70] sm:$0xff] }
 0x539   :  { %v1298_v27 = vrot.slane %v1234_v43, %v8128_v40  ;;  %v1318_v9 = vrot.slane %v1249_v49, %v8128_v40  ;;  %4356 = vmatprep.subr.bf16.mxu0 %v4504_v59  ;;  %v4178_v49 = vld [vmem:[%s8387_s4 + $0x20] sm:$0xff]  ;;  %v4179_v43 = vld [vmem:[%s8387_s4 + $0x28] sm:$0xff] }
 0x53a   :  { %4145 = vrot.lane.b32.xlu0 %v4121_v42, %s4501_s9  ;;  %v4360_v14 = vpack.c.bf16 %v4179_v43, %v4178_v49  ;;  %v4350_v43 = vld [vmem:[%s8388_s5] ss:$0 sm:$0xff]  ;;  %s4457_s5 = scalar_lea.vmem %s4297_s7, 32 }
 0x53b   :  { %v1335_v61 = vsel %vm773_vm5, %v1298_v27, %v1334_v48  ;;  %v1339_v24 = vsel %vm767_vm3, %v1318_v9, %v1338_v18  ;;  %v4186_v27 = vld [vmem:[%s8387_s4 + $0x60] sm:$0xff]  ;;  %v4192_v18 = vld [vmem:[%s8387_s4 + $0x90] sm:$0x7]  ;;  %p4458_p10 = scmp.ne.s32.totalorder %s4297_s7, %s4457_s5  ;;  %p4463_p12 = scmp.lt.s32.totalorder %s4457_s5, %s4457_s5 }
 0x53c   :  { %v1252_v55 = vpop.xlane.xlu0 %1251  ;;  %2787 = vrot.lane.b32.xlu1 %v2763_v37, %s4501_s9  ;;  %v1237_v0 = vpop.xlane.xlu1 %1236 }
 0x53d   :  { %v1302_v16 = vrot.slane %v1237_v0, %v8128_v40  ;;  %v1322_v8 = vrot.slane %v1252_v55, %v8128_v40  ;;  %v4363_v55 = vpack.c.bf16 %v4181_v28, %v4180_v20  ;;  %v4183_v0 = vld [vmem:[%s8387_s4 + $0x48] sm:$0xff]  ;;  %p4464_p13 = por %p4463_p12, %p4462_p11 }
 0x53e   :  { %4149 = vrot.lane.b32.xlu0 %v4124_v1, %s4502_s10 }
 0x53f   :  { %v1336_v45 = vsel %vm776_vm6, %v1302_v16, %v1335_v61  ;;  %v1340_v41 = vsel %vm770_vm4, %v1322_v8, %v1339_v24  ;;  %v4189_v16 = vld [vmem:[%s8387_s4 + $0x78] sm:$0xff]  ;;  %v4191_v61 = vld [vmem:[%s8387_s4 + $0x88] sm:$0xff]  ;;  %p4465_p0 = pnand %p4464_p13, %p4458_p10 }
 0x540   :  { %v1255_v36 = vpop.xlane.xlu0 %1254  ;;  %2791 = vrot.lane.b32.xlu1 %v2766_v33, %s4502_s10  ;;  %v1345_v17 = vcombine.high %v1336_v45, %v4497_v32  ;;  %v1352_v44 = vrot.slane %v1336_v45, %v9034_v51  ;;  %v4187_v33 = vld [vmem:[%s8387_s4 + $0x68] sm:$0xff]  ;;  %v4375_v25 = vpack.c.bf16 %v4189_v16, %v4188_v57 }
 0x541   :  { %v1326_v3 = vrot.slane %v1255_v36, %v8128_v40  ;;  %v4372_v62 = vpack.c.bf16 %v4187_v33, %v4186_v27 }
 0x542   :  { %v1359_v31 = vrot.slane %v1345_v17, %v9034_v51 }
 0x543   :  { %v1341_v7 = vsel %vm773_vm5, %v1326_v3, %v1340_v41  ;;  %v4378_v3 = vpack.c.bf16 %v4191_v61, %v4190_v21 }
 0x544   :  { %v1258_v56 = vpop.xlane.xlu0 %1257  ;;  %2795 = vrot.lane.b32.xlu1 %v2773_v47, %s4503_s11 }
 0x545   :  { %v1330_v30 = vrot.slane %v1258_v56, %v8128_v40 }
 0x547   :  { %v1342_v2 = vsel %vm776_vm6, %v1330_v30, %v1341_v7 }
 0x548   :  { %v1360_v11 = vcombine.high %v1342_v2, %v4497_v32  ;;  %v1367_v26 = vrot.slane %v1342_v2, %v9034_v51  ;;  %4153 = vrot.lane.b32.xlu1 %v4131_v38, %s4503_s11 }
 0x54a   :  { %v1374_v40 = vrot.slane %v1360_v11, %v9034_v51  ;;  %v1375_v52 = vcombine.low %v1352_v44, %v1367_v26  ;;  %v1376_v39 = vcombine.high %v1352_v44, %v1367_v26  ;;  %v4176_v51 = vld [vmem:[%s8387_s4 + $0x10] sm:$0xff] }
 0x54b   :  { %v4357_v54 = vpack.c.bf16 %v4177_v5, %v4176_v51 }
 0x54c   :  { %v1390_v53 = vrot.slane %v1376_v39, %v9051_v15  ;;  %v8278_v19 = vrot.slane %v1375_v52, %v9051_v15  ;;  %v1391_v58 = vcombine.low %v1359_v31, %v1374_v40  ;;  %v1392_v34 = vcombine.high %v1359_v31, %v1374_v40 }
 0x54d   :  { %4358 = vmatpush1.bf16.msra.mxu0 %v4357_v54 }
 0x54e   :  { %1415 = vrot.lane.b32.xlu1 %v1390_v53, %s4498_s1  ;;  %v1400_v29 = vcombine.high %v8278_v19, %v4497_v32  ;;  %v1399_v63 = vrot.slane %v1391_v58, %v9051_v15  ;;  %v1401_v42 = vcombine.high %v1390_v53, %v4497_v32  ;;  %v1409_v37 = vrot.slane %v1392_v34, %v9051_v15  ;;  %v4182_v15 = vld [vmem:[%s8387_s4 + $0x40] sm:$0xff]  ;;  %s4505_s4 = smov 49  }
 0x54f   :  { %4359 = vmatprep.subr.bf16.mxu0 %v4504_v59  ;;  %v4366_v1 = vpack.c.bf16 %v4183_v0, %v4182_v15 }
 0x550   :  { %1411 = vrot.lane.b32.xlu0 %v1400_v29, %s4499_s27  ;;  %v1402_v12 = vcombine.high %v1399_v63, %v4497_v32 }
 0x551   :  { %4361 = vmatpush1.bf16.msra.mxu0 %v4360_v14 }
 0x552   :  { %1423 = vrot.lane.b32.xlu1 %v1399_v63, %s4501_s9  ;;  %4362 = vmatprep.subr.bf16.mxu0 %v4504_v59 }
 0x554   :  { %1419 = vrot.lane.b32.xlu0 %v1401_v42, %s4500_s8 }
 0x555   :  { %4364 = vmatpush1.bf16.msra.mxu0 %v4363_v55 }
 0x556   :  { %1431 = vrot.lane.b32.xlu1 %v1409_v37, %s4503_s11  ;;  %4365 = vmatprep.subr.bf16.mxu0 %v4504_v59 }
 0x558   :  { %1427 = vrot.lane.b32.xlu0 %v1402_v12, %s4502_s10 }
 0x559   :  { %4367 = vmatpush1.bf16.msra.mxu0 %v4366_v1 }
 0x55a   :  { %4368 = vmatprep.subr.bf16.mxu0 %v4504_v59 }
 0x55d   :  { %4370 = vmatpush1.bf16.msra.mxu0 %v4369_v46 }
 0x55e   :  { %4371 = vmatprep.subr.bf16.mxu0 %v4504_v59 }
 0x561   :  { %4373 = vmatpush1.bf16.msra.mxu0 %v4372_v62 }
 0x562   :  { %4374 = vmatprep.subr.bf16.mxu0 %v4504_v59 }
 0x565   :  { %4376 = vmatpush1.bf16.msra.mxu0 %v4375_v25 }
 0x566   :  { %4377 = vmatprep.subr.bf16.mxu0 %v4504_v59 }
 0x569   :  { %4379 = vmatpush1.bf16.msra.mxu0 %v4378_v3 }
 0x56a   :  { %4243 = vmatprep.subr.mxu0 %v4497_v32 }
 0x56d   :  { %4351 = vmatpush1.msk.msra.mxu0 %vm4203_vm9, %v4192_v18 }
 0x59c   :  { %v2780_v60 = vpop.permute.xlu0 %2779 }
 0x59e   :  { %v2776_v9 = vpop.permute.xlu1 %2775 }
 0x59f   :  { %v2798_v45 = vsel %vm1434_vm8, %v8187_v6, %v2776_v9 }
 0x5a0   :  { %v2799_v30 = vsel %vm1436_vm10, %v2798_v45, %v2780_v60 }
 0x5a4   :  { %v4138_v36 = vpop.permute.xlu0 %4137 }
 0x5a6   :  { %v4134_v48 = vpop.permute.xlu1 %4133 }
 0x5a7   :  { %v4156_v56 = vsel %vm1434_vm8, %v8209_v13, %v4134_v48 }
 0x5a8   :  { %v4142_v47 = vpop.permute.xlu0 %4141  ;;  %v4157_v17 = vsel %vm1436_vm10, %v4156_v56, %v4138_v36 }
 0x5a9   :  { %v4158_v44 = vsel %vm1438_vm11, %v4157_v17, %v4142_v47 }
 0x5aa   :  { %v2784_v8 = vpop.permute.xlu1 %2783 }
 0x5ab   :  { %v2800_v32 = vsel %vm1438_vm11, %v2799_v30, %v2784_v8 }
 0x5ac   :  { %v4146_v24 = vpop.permute.xlu0 %4145 }
 0x5ad   :  { %v4159_v11 = vsel %vm1440_vm12, %v4158_v44, %v4146_v24 }
 0x5ae   :  { %v2788_v4 = vpop.permute.xlu1 %2787 }
 0x5af   :  { %v2801_v7 = vsel %vm1440_vm12, %v2800_v32, %v2788_v4 }
 0x5b0   :  { %v4150_v2 = vpop.permute.xlu0 %4149 }
 0x5b1   :  { %v4160_v26 = vsel %vm1442_vm14, %v4159_v11, %v4150_v2 }
 0x5b2   :  { %v2792_v41 = vpop.permute.xlu1 %2791 }
 0x5b3   :  { %v2802_v6 = vsel %vm1442_vm14, %v2801_v7, %v2792_v41 }
 0x5b6   :  { %v2796_v38 = vpop.permute.xlu1 %2795 }
 0x5b7   :  { %v2803_v13 = vsel %vm1444_vm13, %v2802_v6, %v2796_v38 }
 0x5b8   :  { %4163 = vrot.lane.b32.xlu0 %v2803_v13, %s4505_s4 }
 0x5ba   :  { %v4154_v31 = vpop.permute.xlu1 %4153 }
 0x5bb   :  { %v4161_v40 = vsel %vm1444_vm13, %v4160_v26, %v4154_v31 }
 0x5bc   :  { %4167 = vrot.lane.b32.xlu1 %v4161_v40, %s4506_s28 }
 0x5c0   :  { %v1416_v52 = vpop.permute.xlu1 %1415 }
 0x5c2   :  { %v1412_v39 = vpop.permute.xlu0 %1411 }
 0x5c3   :  { %v1435_v22 = vsel %vm1434_vm8, %v8278_v19, %v1412_v39 }
 0x5c4   :  { %v1437_v23 = vsel %vm1436_vm10, %v1435_v22, %v1416_v52  ;;  %v1424_v53 = vpop.permute.xlu1 %1423 }
 0x5c6   :  { %v1420_v58 = vpop.permute.xlu0 %1419 }
 0x5c7   :  { %v1439_v59 = vsel %vm1438_vm11, %v1437_v23, %v1420_v58 }
 0x5c8   :  { %v1441_v51 = vsel %vm1440_vm12, %v1439_v59, %v1424_v53  ;;  %v1432_v35 = vpop.permute.xlu1 %1431 }
 0x5ca   :  { %v1428_v5 = vpop.permute.xlu0 %1427 }
 0x5cb   :  { %v1443_v29 = vsel %vm1442_vm14, %v1441_v51, %v1428_v5 }
 0x5cc   :  { %v1445_v54 = vsel %vm1444_vm13, %v1443_v29, %v1432_v35 }
 0x62a   :  { %v4164_v63 = vpop.permute.xlu0 %4163 }
 0x62b   :  { %v4171_v34 = vsel %vm4170_vm15, %v1445_v54, %v4164_v63 }
 0x62e   :  { %v4168_v19 = vpop.permute.xlu1 %4167 }
 0x62f   :  { %4352 = vmatprep.mubr.msk.f32.mxu0 %vm4200_vm0, %v4168_v19  ;;  %v4173_v49 = vsel %vm4172_vm1, %v4171_v34, %v4168_v19 }
 0x630   :  { %4272 = vmatmul.mubr.f32.vlgmr.msra.gmra.mrb[0].mxu0 %v4173_v49 }
 0x703   :  { %v4273_v42 = vpop.f32.mrb[0].mxu0 }
 0x704   :  { %v4274_v14 = vadd.f32 %v4350_v43, %v4273_v42  ;;  %v4275_v37 = vpop.f32.mrb[1].mxu0 }
 0x706   :  { %v4278_v20 = vsel %vm4277_vm2, %v4274_v14, -inf }
 0x707   :  { %4279 = vmax.xlane.f32.xlu0 %v4278_v20 }
 0x794   :  { %v4280_v28 = vpop.xlane.xlu0 %4279 }
 0x795   :  { %v4281_v12 = vsub.f32 %v4274_v14, %v4280_v28 }
 0x797   :  { %v4282_v55 = vmul.f32 1.442695, %v4281_v12 }
 0x799   :  { %4403 = vpow2.f32 %v4282_v55 }
 0x7a3   :  { %v4404_v15 = vpop.eup %4403 }
 0x7a4   :  { %v4284_v0 = vsel %vm4277_vm2, %v4404_v15, 0.0 }
 0x7a5   :  { %4285 = vadd.xlane.f32.xlu1 %v4284_v0 }
 0x832   :  { %v4286_v1 = vpop.xlane.xlu1 %4285 }
 0x833   :  { %4405 = vrcp.f32 %v4286_v1 }
 0x83d   :  { %v4406_v50 = vpop.eup %4405 }
 0x83e   :  { %v4288_v10 = vmul.f32 %v4406_v50, %v4404_v15 }
 0x840   :  { %4289 = vst.msk [vmem:[#allocation7] sm:$0x3] %vm4277_vm2, %v4288_v10 }
 0x841   :  { %4468 = shalt.err (!%p4465_p0)
}
 0x842   :  { %s4469_s13 = scalar_lea.hbm %s8389_s6, 32 }
 0x843   :  { %p4470_p1 = scmp.ne.s32.totalorder %s8389_s6, %s4469_s13  ;;  %p4473_p2 = scmp.lt.u32.totalorder %s4469_s13, %s8389_s6 }
 0x845   :  { %p4475_p3 = pnand %p4473_p2, %p4470_p1 }
 0x847   :  { %4478 = shalt.err (!%p4475_p3)
}
 0x848   :  { %4299 = dma.vmem_to_hbm [thread:$0]  %s4297_s7, 32, %s8389_s6, [#allocation3]  }
 0x849   :  { %4483 = dma.done.wait [#allocation3], 32  }
 0x84a   :  { %4484 = vsyncadd [#allocation3], 4294967264 }
 0x84b   :  { %4303 = vsyncpa [#allocation3], 1 }
 0x84c   :  { %4304 = vsyncpa [#allocation4], 1 }
 0x84d   :  { %4305 = vsyncpa [#allocation6], 1 }

</bundles_post_ra>
